<compile_context>
chip_gen: v7x
topology: tpu7x:2x2x1
jax: 0.10.0
libtpu: 0.0.40
codegen_flags: <defaults>
</compile_context>

<pallas_src>
from functools import partial

import jax
import jax.numpy as jnp
from jax import lax
from jax.experimental import pallas as pl
from jax.experimental.pallas import tpu as pltpu


# ----------------------------- Pallas kernel --------------------------------

def lstm_recurrence_kernel(x_ref, wih_ref, b_ref, whht_ref, h_out_ref,
                           h_sc, c_sc, *, unroll):
    """One (batch-tile, seq-chunk) grid step of the LSTM recurrence (transposed).

    x_ref    : (TS, TB)  f32   dropout-applied inputs for this chunk (time, batch)
    wih_ref  : (4H, 1)   f32   input->gates weight column (input_dim == 1)
    b_ref    : (4H, 1)   f32   gate bias column
    whht_ref : (4H, H)   bf16  W_hh^T
    h_out_ref: (H, TB)   f32   final hidden state h_S^T for this batch tile
    h_sc,c_sc: (H, TB)   f32   recurrent state carried across sequence chunks
    """
    si = pl.program_id(1)
    ts = x_ref.shape[0]
    hdim = whht_ref.shape[1]

    @pl.when(si == 0)
    def _():
        h_sc[...] = jnp.zeros_like(h_sc)
        c_sc[...] = jnp.zeros_like(c_sc)

    wih = wih_ref[...]           # (4H, 1)  -- hoisted out of the time loop
    bias = b_ref[...]            # (4H, 1)
    whht = whht_ref[...]         # (4H, H)  bf16

    def step(t, carry):
        h, c = carry                                     # (H, TB) f32 each
        x_t = x_ref[pl.ds(t, 1), :]                      # (1, TB)
        # gates^T = W_hh^T @ h^T (MXU, bf16 in / f32 acc) + w_ih x_t^T + b (VPU)
        gates = (jnp.dot(whht, h.astype(jnp.bfloat16),
                         preferred_element_type=jnp.float32)
                 + wih * x_t + bias)                     # (4H, TB) f32
        sig = jax.nn.sigmoid(gates)                      # full-tile EUP pass
        tnh = jnp.tanh(gates)                            # full-tile EUP pass
        # blitz BayesianLSTM gate order i, f, g, o; sublane slices at multiples
        # of 8 -> pure vreg selection, no lane shuffles on the serial path.
        i_g = sig[0 * hdim:1 * hdim]
        f_g = sig[1 * hdim:2 * hdim]
        g_g = tnh[2 * hdim:3 * hdim]
        o_g = sig[3 * hdim:4 * hdim]
        c_new = f_g * c + i_g * g_g
        h_new = o_g * jnp.tanh(c_new)
        return (h_new, c_new)

    h_f, c_f = lax.fori_loop(0, ts, step, (h_sc[...], c_sc[...]), unroll=unroll)
    h_sc[...] = h_f
    c_sc[...] = c_f
    h_out_ref[...] = h_f          # lane-dense (H, TB); written back once per tile


# ------------------------------ JAX wrapper ----------------------------------

def _seq_tile(S, target):
    """Largest multiple-of-8 divisor of S that is <= target (else S: one chunk)."""
    if S <= target:
        return S
    best = S
    for ts in range(8, target + 1, 8):
        if S % ts == 0:
            best = ts
    return best


def blstm_nmc_forward(x, params, drop_rate, dropout_key, *,
                      batch_tile=256, seq_tile=512):
    """x: (batch, seq) f32 -> (batch, output_dim) f32.

    batch_tile: 256 for v6e/v7x, 128 for v5e (only kicks in once batch >= 128).
    """
    B, S = x.shape
    w_ih, w_hh, b, w_lin, b_lin = params
    H = w_hh.shape[0]
    G = 4 * H

    # F.dropout masks, training=True (stochastic in torch; explicit key here).
    keep = 1.0 - drop_rate
    k_in, k_out = jax.random.split(dropout_key)
    m_in = (jax.random.bernoulli(k_in, keep, (B, S)) / keep).astype(jnp.float32)
    m_h = (jax.random.bernoulli(k_out, keep, (B, H)) / keep).astype(jnp.float32)

    # torch.reshape(x,(B,S,1)) => input_dim == 1; fold the input dropout here.
    xd = x.astype(jnp.float32) * m_in                        # (B, S)

    # ---- batch tiling (lane-dense tiles once batch is large) ----------------
    if B < 128:
        TB, B_pad = B, B
    else:
        TB = batch_tile if batch_tile % 128 == 0 else 128
        B_pad = ((B + TB - 1) // TB) * TB
    if B_pad != B:
        xd = jnp.pad(xd, ((0, B_pad - B), (0, 0)))           # padded rows discarded
    nb = B_pad // TB

    # ---- sequence chunking (pipelined "arbitrary" grid axis) ----------------
    TS = _seq_tile(S, seq_tile)
    ns = S // TS
    unroll = TS if (TB <= 64 and TS <= 64) else 4

    x_tm = xd.T                                              # (S, B_pad) time-major
    wih_col = w_ih.reshape(G, 1).astype(jnp.float32)         # (4H, 1)
    bias_col = b.reshape(G, 1).astype(jnp.float32)           # (4H, 1)
    whht = w_hh.T.astype(jnp.bfloat16)                       # (4H, H) bf16 for MXU

    h_t = pl.pallas_call(
        partial(lstm_recurrence_kernel, unroll=unroll),
        out_shape=jax.ShapeDtypeStruct((H, B_pad), jnp.float32),
        grid=(nb, ns),
        in_specs=[
            pl.BlockSpec((TS, TB), lambda bi, si: (si, bi)),   # x chunk
            pl.BlockSpec((G, 1), lambda bi, si: (0, 0)),       # w_ih column
            pl.BlockSpec((G, 1), lambda bi, si: (0, 0)),       # bias column
            pl.BlockSpec((G, H), lambda bi, si: (0, 0)),       # W_hh^T (bf16)
        ],
        out_specs=pl.BlockSpec((H, TB), lambda bi, si: (0, bi)),
        scratch_shapes=[pltpu.VMEM((H, TB), jnp.float32),      # h carry
                        pltpu.VMEM((H, TB), jnp.float32)],     # c carry
        compiler_params=pltpu.CompilerParams(
            dimension_semantics=("parallel", "arbitrary"),
            vmem_limit_bytes=32 * 1024 * 1024),
    )(x_tm, wih_col, bias_col, whht)

    h_last = h_t[:, :B].T                                    # (B, H)
    # Output dropout + lane-sparse (O=4) linear head stay in plain XLA (run once).
    return (h_last * m_h) @ w_lin + b_lin


# --------------------- deterministic parameter sampling ----------------------

def sample_bayesian_weight(key, shape, scale):
    """mu + softplus(rho) * eps  (one deterministic draw of a Bayesian weight)."""
    k_mu, k_eps = jax.random.split(key)
    mu = jax.random.uniform(k_mu, shape, jnp.float32, -scale, scale)
    rho = jnp.full(shape, -5.0, jnp.float32)
    eps = jax.random.normal(k_eps, shape, jnp.float32)
    return mu + jax.nn.softplus(rho) * eps


def init_params(key, input_dim, hidden, output_dim):
    k1, k2, k3, k4, k5 = jax.random.split(key, 5)
    s_lstm = 1.0 / jnp.sqrt(hidden)
    w_ih = sample_bayesian_weight(k1, (input_dim, 4 * hidden), s_lstm)
    w_hh = sample_bayesian_weight(k2, (hidden, 4 * hidden), s_lstm)
    b = sample_bayesian_weight(k3, (4 * hidden,), s_lstm)
    s_lin = 1.0 / jnp.sqrt(hidden)
    w_lin = jax.random.uniform(k4, (hidden, output_dim), jnp.float32, -s_lin, s_lin)
    b_lin = jax.random.uniform(k5, (output_dim,), jnp.float32, -s_lin, s_lin)
    return (w_ih, w_hh, b, w_lin, b_lin)


# ------------------------------ pure-JAX reference ---------------------------

def ref_forward(x, params, drop_rate, dropout_key, recurrent_dtype=jnp.float32):
    """Pure-XLA reference; recurrent_dtype=bfloat16 mirrors the kernel's MXU cast."""
    B, S = x.shape
    w_ih, w_hh, b, w_lin, b_lin = params
    H = w_hh.shape[0]
    keep = 1.0 - drop_rate
    k_in, k_out = jax.random.split(dropout_key)
    m_in = (jax.random.bernoulli(k_in, keep, (B, S)) / keep).astype(jnp.float32)
    m_h = (jax.random.bernoulli(k_out, keep, (B, H)) / keep).astype(jnp.float32)
    xd = (x.astype(jnp.float32) * m_in).T                    # (S, B)
    w_hh_r = w_hh.astype(recurrent_dtype)

    def step(carry, x_t):
        h, c = carry
        gates = (x_t[:, None] * w_ih[0][None, :]
                 + jnp.dot(h.astype(recurrent_dtype), w_hh_r,
                           preferred_element_type=jnp.float32)
                 + b[None, :])
        i = jax.nn.sigmoid(gates[:, :H])
        f = jax.nn.sigmoid(gates[:, H:2 * H])
        g = jnp.tanh(gates[:, 2 * H:3 * H])
        o = jax.nn.sigmoid(gates[:, 3 * H:])
        c = f * c + i * g
        h = o * jnp.tanh(c)
        return (h, c), None

    z = jnp.zeros((B, H), jnp.float32)
    (h, _), _ = lax.scan(step, (z, z), xd)
    return (h * m_h) @ w_lin + b_lin


# ---------------------------------- main --------------------------------------

if __name__ == "__main__":
    batch, seq = 8, 16
    input_dim, hidden, output_dim = 1, 32, 4
    drop_rate = 0.1

    root = jax.random.PRNGKey(0)
    k_x, k_p, k_drop = jax.random.split(root, 3)

    x = jax.random.normal(k_x, (batch, seq), jnp.float32)
    params = init_params(k_p, input_dim, hidden, output_dim)

    out = jax.block_until_ready(blstm_nmc_forward(x, params, drop_rate, k_drop))
    assert out.shape == (batch, output_dim)

    # Tight check vs. a reference that uses the same bf16 recurrent matmul,
    # loose check vs. the pure-f32 module semantics (bf16 MXU rounding).
    ref_bf16 = ref_forward(x, params, drop_rate, k_drop, jnp.bfloat16)
    ref_f32 = ref_forward(x, params, drop_rate, k_drop, jnp.float32)
    assert jnp.allclose(out, ref_bf16, rtol=5e-3, atol=5e-3), (out, ref_bf16)
    assert jnp.allclose(out, ref_f32, rtol=5e-2, atol=5e-2), (out, ref_f32)

    print("KERNEL_OK")
</pallas_src>

<mosaic_0001>
module attributes {stable_mosaic.version = 11 : i64} {
  func.func @lstm_recurrence_kernel(%arg0: i32, %arg1: i32, %arg2: memref<16x8xf32, #tpu.memory_space<vmem>>, %arg3: memref<128x1xf32, #tpu.memory_space<vmem>>, %arg4: memref<128x1xf32, #tpu.memory_space<vmem>>, %arg5: memref<128x32xbf16, #tpu.memory_space<vmem>>, %arg6: memref<32x8xf32, #tpu.memory_space<vmem>>, %arg7: memref<32x8xf32, #tpu.memory_space<vmem>>, %arg8: memref<32x8xf32, #tpu.memory_space<vmem>>) attributes {dimension_semantics = [#tpu.dimension_semantics<parallel>, #tpu.dimension_semantics<arbitrary>], iteration_bounds = array<i64: 1, 1>, scalar_prefetch = 0 : i64, scratch_operands = 2 : i64, tpu.core_type = #tpu.core_type<tc>, window_params = [{transform_indices = @transform_0, window_bounds = array<i64: 16, 8>}, {pipeline_mode = #tpu.pipeline_mode<synchronous>, transform_indices = @transform_1, window_bounds = array<i64: 128, 1>}, {pipeline_mode = #tpu.pipeline_mode<synchronous>, transform_indices = @transform_2, window_bounds = array<i64: 128, 1>}, {pipeline_mode = #tpu.pipeline_mode<synchronous>, transform_indices = @transform_3, window_bounds = array<i64: 128, 32>}, {transform_indices = @transform_4, window_bounds = array<i64: 32, 8>}]} {
    %c0_i32 = arith.constant 0 : i32
    %0 = arith.cmpi eq, %arg1, %c0_i32 : i32
    %1 = arith.extui %0 : i1 to i32
    %c0_i32_0 = arith.constant 0 : i32
    %2 = arith.cmpi ne, %1, %c0_i32_0 : i32
    scf.if %2 {
      %cst_64 = arith.constant 0.000000e+00 : f32
      %411 = vector.broadcast %cst_64 : f32 to vector<32x8xf32>
      %c0_65 = arith.constant 0 : index
      %c0_66 = arith.constant 0 : index
      %412 = vector.load %arg7[%c0_65, %c0_66] : memref<32x8xf32, #tpu.memory_space<vmem>>, vector<32x8xf32>
      tpu.vector_store %arg7[%c0_65, %c0_66], %411 {strides = array<i32>} : memref<32x8xf32, #tpu.memory_space<vmem>>, vector<32x8xf32>,
      %cst_67 = arith.constant 0.000000e+00 : f32
      %413 = vector.broadcast %cst_67 : f32 to vector<32x8xf32>
      %c0_68 = arith.constant 0 : index
      %c0_69 = arith.constant 0 : index
      %414 = vector.load %arg8[%c0_68, %c0_69] : memref<32x8xf32, #tpu.memory_space<vmem>>, vector<32x8xf32>
      tpu.vector_store %arg8[%c0_68, %c0_69], %413 {strides = array<i32>} : memref<32x8xf32, #tpu.memory_space<vmem>>, vector<32x8xf32>,
    } else {
    }
    %c0 = arith.constant 0 : index
    %c0_1 = arith.constant 0 : index
    %3 = vector.load %arg3[%c0, %c0_1] : memref<128x1xf32, #tpu.memory_space<vmem>>, vector<128x1xf32>
    %c0_2 = arith.constant 0 : index
    %c0_3 = arith.constant 0 : index
    %4 = vector.load %arg4[%c0_2, %c0_3] : memref<128x1xf32, #tpu.memory_space<vmem>>, vector<128x1xf32>
    %c0_4 = arith.constant 0 : index
    %c0_5 = arith.constant 0 : index
    %5 = vector.load %arg5[%c0_4, %c0_5] : memref<128x32xbf16, #tpu.memory_space<vmem>>, vector<128x32xbf16>
    %c0_6 = arith.constant 0 : index
    %c0_7 = arith.constant 0 : index
    %6 = vector.load %arg7[%c0_6, %c0_7] : memref<32x8xf32, #tpu.memory_space<vmem>>, vector<32x8xf32>
    %c0_8 = arith.constant 0 : index
    %c0_9 = arith.constant 0 : index
    %7 = vector.load %arg8[%c0_8, %c0_9] : memref<32x8xf32, #tpu.memory_space<vmem>>, vector<32x8xf32>
    %c0_i32_10 = arith.constant 0 : i32
    %8 = arith.index_cast %c0_i32_10 : i32 to index
    %c0_11 = arith.constant 0 : index
    %9 = vector.load %arg2[%8, %c0_11] : memref<16x8xf32, #tpu.memory_space<vmem>>, vector<1x8xf32>
    %10 = arith.truncf %6 : vector<32x8xf32> to vector<32x8xbf16>
    %cst = arith.constant dense<0.000000e+00> : vector<128x8xf32>
    %11 = tpu.matmul %5, %10, %cst {dimension_numbers = #tpu.dot_dimension_numbers<[1], [0], [0], [1], [0, 0, 1, 1], [], []>} : vector<128x32xbf16>, vector<32x8xbf16>, vector<128x8xf32> -> vector<128x8xf32>
    %12 = vector.broadcast %3 : vector<128x1xf32> to vector<128x8xf32>
    %13 = vector.broadcast %9 : vector<1x8xf32> to vector<128x8xf32>
    %14 = arith.mulf %12, %13 : vector<128x8xf32>
    %15 = arith.addf %11, %14 : vector<128x8xf32>
    %16 = vector.broadcast %4 : vector<128x1xf32> to vector<128x8xf32>
    %17 = arith.addf %15, %16 : vector<128x8xf32>
    %18 = arith.negf %17 : vector<128x8xf32>
    %19 = math.exp %18 : vector<128x8xf32>
    %cst_12 = arith.constant 1.000000e+00 : f32
    %20 = vector.broadcast %cst_12 : f32 to vector<128x8xf32>
    %21 = arith.addf %20, %19 : vector<128x8xf32>
    %22 = arith.divf %20, %21 : vector<128x8xf32>
    %23 = math.tanh %17 : vector<128x8xf32>
    %24 = vector.extract_strided_slice %22 {offsets = [0, 0], sizes = [32, 8], strides = [1, 1]} : vector<128x8xf32> to vector<32x8xf32>
    %25 = vector.extract_strided_slice %22 {offsets = [32, 0], sizes = [32, 8], strides = [1, 1]} : vector<128x8xf32> to vector<32x8xf32>
    %26 = vector.extract_strided_slice %23 {offsets = [64, 0], sizes = [32, 8], strides = [1, 1]} : vector<128x8xf32> to vector<32x8xf32>
    %27 = vector.extract_strided_slice %22 {offsets = [96, 0], sizes = [32, 8], strides = [1, 1]} : vector<128x8xf32> to vector<32x8xf32>
    %28 = arith.mulf %25, %7 : vector<32x8xf32>
    %29 = arith.mulf %24, %26 : vector<32x8xf32>
    %30 = arith.addf %28, %29 : vector<32x8xf32>
    %31 = math.tanh %30 : vector<32x8xf32>
    %32 = arith.mulf %27, %31 : vector<32x8xf32>
    %c1_i32 = arith.constant 1 : i32
    %33 = arith.index_cast %c1_i32 : i32 to index
    %c0_13 = arith.constant 0 : index
    %34 = vector.load %arg2[%33, %c0_13] : memref<16x8xf32, #tpu.memory_space<vmem>>, vector<1x8xf32>
    %35 = arith.truncf %32 : vector<32x8xf32> to vector<32x8xbf16>
    %cst_14 = arith.constant dense<0.000000e+00> : vector<128x8xf32>
    %36 = tpu.matmul %5, %35, %cst_14 {dimension_numbers = #tpu.dot_dimension_numbers<[1], [0], [0], [1], [0, 0, 1, 1], [], []>} : vector<128x32xbf16>, vector<32x8xbf16>, vector<128x8xf32> -> vector<128x8xf32>
    %37 = vector.broadcast %3 : vector<128x1xf32> to vector<128x8xf32>
    %38 = vector.broadcast %34 : vector<1x8xf32> to vector<128x8xf32>
    %39 = arith.mulf %37, %38 : vector<128x8xf32>
    %40 = arith.addf %36, %39 : vector<128x8xf32>
    %41 = vector.broadcast %4 : vector<128x1xf32> to vector<128x8xf32>
    %42 = arith.addf %40, %41 : vector<128x8xf32>
    %43 = arith.negf %42 : vector<128x8xf32>
    %44 = math.exp %43 : vector<128x8xf32>
    %cst_15 = arith.constant 1.000000e+00 : f32
    %45 = vector.broadcast %cst_15 : f32 to vector<128x8xf32>
    %46 = arith.addf %45, %44 : vector<128x8xf32>
    %47 = arith.divf %45, %46 : vector<128x8xf32>
    %48 = math.tanh %42 : vector<128x8xf32>
    %49 = vector.extract_strided_slice %47 {offsets = [0, 0], sizes = [32, 8], strides = [1, 1]} : vector<128x8xf32> to vector<32x8xf32>
    %50 = vector.extract_strided_slice %47 {offsets = [32, 0], sizes = [32, 8], strides = [1, 1]} : vector<128x8xf32> to vector<32x8xf32>
    %51 = vector.extract_strided_slice %48 {offsets = [64, 0], sizes = [32, 8], strides = [1, 1]} : vector<128x8xf32> to vector<32x8xf32>
    %52 = vector.extract_strided_slice %47 {offsets = [96, 0], sizes = [32, 8], strides = [1, 1]} : vector<128x8xf32> to vector<32x8xf32>
    %53 = arith.mulf %50, %30 : vector<32x8xf32>
    %54 = arith.mulf %49, %51 : vector<32x8xf32>
    %55 = arith.addf %53, %54 : vector<32x8xf32>
    %56 = math.tanh %55 : vector<32x8xf32>
    %57 = arith.mulf %52, %56 : vector<32x8xf32>
    %c2_i32 = arith.constant 2 : i32
    %58 = arith.index_cast %c2_i32 : i32 to index
    %c0_16 = arith.constant 0 : index
    %59 = vector.load %arg2[%58, %c0_16] : memref<16x8xf32, #tpu.memory_space<vmem>>, vector<1x8xf32>
    %60 = arith.truncf %57 : vector<32x8xf32> to vector<32x8xbf16>
    %cst_17 = arith.constant dense<0.000000e+00> : vector<128x8xf32>
    %61 = tpu.matmul %5, %60, %cst_17 {dimension_numbers = #tpu.dot_dimension_numbers<[1], [0], [0], [1], [0, 0, 1, 1], [], []>} : vector<128x32xbf16>, vector<32x8xbf16>, vector<128x8xf32> -> vector<128x8xf32>
    %62 = vector.broadcast %3 : vector<128x1xf32> to vector<128x8xf32>
    %63 = vector.broadcast %59 : vector<1x8xf32> to vector<128x8xf32>
    %64 = arith.mulf %62, %63 : vector<128x8xf32>
    %65 = arith.addf %61, %64 : vector<128x8xf32>
    %66 = vector.broadcast %4 : vector<128x1xf32> to vector<128x8xf32>
    %67 = arith.addf %65, %66 : vector<128x8xf32>
    %68 = arith.negf %67 : vector<128x8xf32>
    %69 = math.exp %68 : vector<128x8xf32>
    %cst_18 = arith.constant 1.000000e+00 : f32
    %70 = vector.broadcast %cst_18 : f32 to vector<128x8xf32>
    %71 = arith.addf %70, %69 : vector<128x8xf32>
    %72 = arith.divf %70, %71 : vector<128x8xf32>
    %73 = math.tanh %67 : vector<128x8xf32>
    %74 = vector.extract_strided_slice %72 {offsets = [0, 0], sizes = [32, 8], strides = [1, 1]} : vector<128x8xf32> to vector<32x8xf32>
    %75 = vector.extract_strided_slice %72 {offsets = [32, 0], sizes = [32, 8], strides = [1, 1]} : vector<128x8xf32> to vector<32x8xf32>
    %76 = vector.extract_strided_slice %73 {offsets = [64, 0], sizes = [32, 8], strides = [1, 1]} : vector<128x8xf32> to vector<32x8xf32>
    %77 = vector.extract_strided_slice %72 {offsets = [96, 0], sizes = [32, 8], strides = [1, 1]} : vector<128x8xf32> to vector<32x8xf32>
    %78 = arith.mulf %75, %55 : vector<32x8xf32>
    %79 = arith.mulf %74, %76 : vector<32x8xf32>
    %80 = arith.addf %78, %79 : vector<32x8xf32>
    %81 = math.tanh %80 : vector<32x8xf32>
    %82 = arith.mulf %77, %81 : vector<32x8xf32>
    %c3_i32 = arith.constant 3 : i32
    %83 = arith.index_cast %c3_i32 : i32 to index
    %c0_19 = arith.constant 0 : index
    %84 = vector.load %arg2[%83, %c0_19] : memref<16x8xf32, #tpu.memory_space<vmem>>, vector<1x8xf32>
    %85 = arith.truncf %82 : vector<32x8xf32> to vector<32x8xbf16>
    %cst_20 = arith.constant dense<0.000000e+00> : vector<128x8xf32>
    %86 = tpu.matmul %5, %85, %cst_20 {dimension_numbers = #tpu.dot_dimension_numbers<[1], [0], [0], [1], [0, 0, 1, 1], [], []>} : vector<128x32xbf16>, vector<32x8xbf16>, vector<128x8xf32> -> vector<128x8xf32>
    %87 = vector.broadcast %3 : vector<128x1xf32> to vector<128x8xf32>
    %88 = vector.broadcast %84 : vector<1x8xf32> to vector<128x8xf32>
    %89 = arith.mulf %87, %88 : vector<128x8xf32>
    %90 = arith.addf %86, %89 : vector<128x8xf32>
    %91 = vector.broadcast %4 : vector<128x1xf32> to vector<128x8xf32>
    %92 = arith.addf %90, %91 : vector<128x8xf32>
    %93 = arith.negf %92 : vector<128x8xf32>
    %94 = math.exp %93 : vector<128x8xf32>
    %cst_21 = arith.constant 1.000000e+00 : f32
    %95 = vector.broadcast %cst_21 : f32 to vector<128x8xf32>
    %96 = arith.addf %95, %94 : vector<128x8xf32>
    %97 = arith.divf %95, %96 : vector<128x8xf32>
    %98 = math.tanh %92 : vector<128x8xf32>
    %99 = vector.extract_strided_slice %97 {offsets = [0, 0], sizes = [32, 8], strides = [1, 1]} : vector<128x8xf32> to vector<32x8xf32>
    %100 = vector.extract_strided_slice %97 {offsets = [32, 0], sizes = [32, 8], strides = [1, 1]} : vector<128x8xf32> to vector<32x8xf32>
    %101 = vector.extract_strided_slice %98 {offsets = [64, 0], sizes = [32, 8], strides = [1, 1]} : vector<128x8xf32> to vector<32x8xf32>
    %102 = vector.extract_strided_slice %97 {offsets = [96, 0], sizes = [32, 8], strides = [1, 1]} : vector<128x8xf32> to vector<32x8xf32>
    %103 = arith.mulf %100, %80 : vector<32x8xf32>
    %104 = arith.mulf %99, %101 : vector<32x8xf32>
    %105 = arith.addf %103, %104 : vector<32x8xf32>
    %106 = math.tanh %105 : vector<32x8xf32>
    %107 = arith.mulf %102, %106 : vector<32x8xf32>
    %c4_i32 = arith.constant 4 : i32
    %108 = arith.index_cast %c4_i32 : i32 to index
    %c0_22 = arith.constant 0 : index
    %109 = vector.load %arg2[%108, %c0_22] : memref<16x8xf32, #tpu.memory_space<vmem>>, vector<1x8xf32>
    %110 = arith.truncf %107 : vector<32x8xf32> to vector<32x8xbf16>
    %cst_23 = arith.constant dense<0.000000e+00> : vector<128x8xf32>
    %111 = tpu.matmul %5, %110, %cst_23 {dimension_numbers = #tpu.dot_dimension_numbers<[1], [0], [0], [1], [0, 0, 1, 1], [], []>} : vector<128x32xbf16>, vector<32x8xbf16>, vector<128x8xf32> -> vector<128x8xf32>
    %112 = vector.broadcast %3 : vector<128x1xf32> to vector<128x8xf32>
    %113 = vector.broadcast %109 : vector<1x8xf32> to vector<128x8xf32>
    %114 = arith.mulf %112, %113 : vector<128x8xf32>
    %115 = arith.addf %111, %114 : vector<128x8xf32>
    %116 = vector.broadcast %4 : vector<128x1xf32> to vector<128x8xf32>
    %117 = arith.addf %115, %116 : vector<128x8xf32>
    %118 = arith.negf %117 : vector<128x8xf32>
    %119 = math.exp %118 : vector<128x8xf32>
    %cst_24 = arith.constant 1.000000e+00 : f32
    %120 = vector.broadcast %cst_24 : f32 to vector<128x8xf32>
    %121 = arith.addf %120, %119 : vector<128x8xf32>
    %122 = arith.divf %120, %121 : vector<128x8xf32>
    %123 = math.tanh %117 : vector<128x8xf32>
    %124 = vector.extract_strided_slice %122 {offsets = [0, 0], sizes = [32, 8], strides = [1, 1]} : vector<128x8xf32> to vector<32x8xf32>
    %125 = vector.extract_strided_slice %122 {offsets = [32, 0], sizes = [32, 8], strides = [1, 1]} : vector<128x8xf32> to vector<32x8xf32>
    %126 = vector.extract_strided_slice %123 {offsets = [64, 0], sizes = [32, 8], strides = [1, 1]} : vector<128x8xf32> to vector<32x8xf32>
    %127 = vector.extract_strided_slice %122 {offsets = [96, 0], sizes = [32, 8], strides = [1, 1]} : vector<128x8xf32> to vector<32x8xf32>
    %128 = arith.mulf %125, %105 : vector<32x8xf32>
    %129 = arith.mulf %124, %126 : vector<32x8xf32>
    %130 = arith.addf %128, %129 : vector<32x8xf32>
    %131 = math.tanh %130 : vector<32x8xf32>
    %132 = arith.mulf %127, %131 : vector<32x8xf32>
    %c5_i32 = arith.constant 5 : i32
    %133 = arith.index_cast %c5_i32 : i32 to index
    %c0_25 = arith.constant 0 : index
    %134 = vector.load %arg2[%133, %c0_25] : memref<16x8xf32, #tpu.memory_space<vmem>>, vector<1x8xf32>
    %135 = arith.truncf %132 : vector<32x8xf32> to vector<32x8xbf16>
    %cst_26 = arith.constant dense<0.000000e+00> : vector<128x8xf32>
    %136 = tpu.matmul %5, %135, %cst_26 {dimension_numbers = #tpu.dot_dimension_numbers<[1], [0], [0], [1], [0, 0, 1, 1], [], []>} : vector<128x32xbf16>, vector<32x8xbf16>, vector<128x8xf32> -> vector<128x8xf32>
    %137 = vector.broadcast %3 : vector<128x1xf32> to vector<128x8xf32>
    %138 = vector.broadcast %134 : vector<1x8xf32> to vector<128x8xf32>
    %139 = arith.mulf %137, %138 : vector<128x8xf32>
    %140 = arith.addf %136, %139 : vector<128x8xf32>
    %141 = vector.broadcast %4 : vector<128x1xf32> to vector<128x8xf32>
    %142 = arith.addf %140, %141 : vector<128x8xf32>
    %143 = arith.negf %142 : vector<128x8xf32>
    %144 = math.exp %143 : vector<128x8xf32>
    %cst_27 = arith.constant 1.000000e+00 : f32
    %145 = vector.broadcast %cst_27 : f32 to vector<128x8xf32>
    %146 = arith.addf %145, %144 : vector<128x8xf32>
    %147 = arith.divf %145, %146 : vector<128x8xf32>
    %148 = math.tanh %142 : vector<128x8xf32>
    %149 = vector.extract_strided_slice %147 {offsets = [0, 0], sizes = [32, 8], strides = [1, 1]} : vector<128x8xf32> to vector<32x8xf32>
    %150 = vector.extract_strided_slice %147 {offsets = [32, 0], sizes = [32, 8], strides = [1, 1]} : vector<128x8xf32> to vector<32x8xf32>
    %151 = vector.extract_strided_slice %148 {offsets = [64, 0], sizes = [32, 8], strides = [1, 1]} : vector<128x8xf32> to vector<32x8xf32>
    %152 = vector.extract_strided_slice %147 {offsets = [96, 0], sizes = [32, 8], strides = [1, 1]} : vector<128x8xf32> to vector<32x8xf32>
    %153 = arith.mulf %150, %130 : vector<32x8xf32>
    %154 = arith.mulf %149, %151 : vector<32x8xf32>
    %155 = arith.addf %153, %154 : vector<32x8xf32>
    %156 = math.tanh %155 : vector<32x8xf32>
    %157 = arith.mulf %152, %156 : vector<32x8xf32>
    %c6_i32 = arith.constant 6 : i32
    %158 = arith.index_cast %c6_i32 : i32 to index
    %c0_28 = arith.constant 0 : index
    %159 = vector.load %arg2[%158, %c0_28] : memref<16x8xf32, #tpu.memory_space<vmem>>, vector<1x8xf32>
    %160 = arith.truncf %157 : vector<32x8xf32> to vector<32x8xbf16>
    %cst_29 = arith.constant dense<0.000000e+00> : vector<128x8xf32>
    %161 = tpu.matmul %5, %160, %cst_29 {dimension_numbers = #tpu.dot_dimension_numbers<[1], [0], [0], [1], [0, 0, 1, 1], [], []>} : vector<128x32xbf16>, vector<32x8xbf16>, vector<128x8xf32> -> vector<128x8xf32>
    %162 = vector.broadcast %3 : vector<128x1xf32> to vector<128x8xf32>
    %163 = vector.broadcast %159 : vector<1x8xf32> to vector<128x8xf32>
    %164 = arith.mulf %162, %163 : vector<128x8xf32>
    %165 = arith.addf %161, %164 : vector<128x8xf32>
    %166 = vector.broadcast %4 : vector<128x1xf32> to vector<128x8xf32>
    %167 = arith.addf %165, %166 : vector<128x8xf32>
    %168 = arith.negf %167 : vector<128x8xf32>
    %169 = math.exp %168 : vector<128x8xf32>
    %cst_30 = arith.constant 1.000000e+00 : f32
    %170 = vector.broadcast %cst_30 : f32 to vector<128x8xf32>
    %171 = arith.addf %170, %169 : vector<128x8xf32>
    %172 = arith.divf %170, %171 : vector<128x8xf32>
    %173 = math.tanh %167 : vector<128x8xf32>
    %174 = vector.extract_strided_slice %172 {offsets = [0, 0], sizes = [32, 8], strides = [1, 1]} : vector<128x8xf32> to vector<32x8xf32>
    %175 = vector.extract_strided_slice %172 {offsets = [32, 0], sizes = [32, 8], strides = [1, 1]} : vector<128x8xf32> to vector<32x8xf32>
    %176 = vector.extract_strided_slice %173 {offsets = [64, 0], sizes = [32, 8], strides = [1, 1]} : vector<128x8xf32> to vector<32x8xf32>
    %177 = vector.extract_strided_slice %172 {offsets = [96, 0], sizes = [32, 8], strides = [1, 1]} : vector<128x8xf32> to vector<32x8xf32>
    %178 = arith.mulf %175, %155 : vector<32x8xf32>
    %179 = arith.mulf %174, %176 : vector<32x8xf32>
    %180 = arith.addf %178, %179 : vector<32x8xf32>
    %181 = math.tanh %180 : vector<32x8xf32>
    %182 = arith.mulf %177, %181 : vector<32x8xf32>
    %c7_i32 = arith.constant 7 : i32
    %183 = arith.index_cast %c7_i32 : i32 to index
    %c0_31 = arith.constant 0 : index
    %184 = vector.load %arg2[%183, %c0_31] : memref<16x8xf32, #tpu.memory_space<vmem>>, vector<1x8xf32>
    %185 = arith.truncf %182 : vector<32x8xf32> to vector<32x8xbf16>
    %cst_32 = arith.constant dense<0.000000e+00> : vector<128x8xf32>
    %186 = tpu.matmul %5, %185, %cst_32 {dimension_numbers = #tpu.dot_dimension_numbers<[1], [0], [0], [1], [0, 0, 1, 1], [], []>} : vector<128x32xbf16>, vector<32x8xbf16>, vector<128x8xf32> -> vector<128x8xf32>
    %187 = vector.broadcast %3 : vector<128x1xf32> to vector<128x8xf32>
    %188 = vector.broadcast %184 : vector<1x8xf32> to vector<128x8xf32>
    %189 = arith.mulf %187, %188 : vector<128x8xf32>
    %190 = arith.addf %186, %189 : vector<128x8xf32>
    %191 = vector.broadcast %4 : vector<128x1xf32> to vector<128x8xf32>
    %192 = arith.addf %190, %191 : vector<128x8xf32>
    %193 = arith.negf %192 : vector<128x8xf32>
    %194 = math.exp %193 : vector<128x8xf32>
    %cst_33 = arith.constant 1.000000e+00 : f32
    %195 = vector.broadcast %cst_33 : f32 to vector<128x8xf32>
    %196 = arith.addf %195, %194 : vector<128x8xf32>
    %197 = arith.divf %195, %196 : vector<128x8xf32>
    %198 = math.tanh %192 : vector<128x8xf32>
    %199 = vector.extract_strided_slice %197 {offsets = [0, 0], sizes = [32, 8], strides = [1, 1]} : vector<128x8xf32> to vector<32x8xf32>
    %200 = vector.extract_strided_slice %197 {offsets = [32, 0], sizes = [32, 8], strides = [1, 1]} : vector<128x8xf32> to vector<32x8xf32>
    %201 = vector.extract_strided_slice %198 {offsets = [64, 0], sizes = [32, 8], strides = [1, 1]} : vector<128x8xf32> to vector<32x8xf32>
    %202 = vector.extract_strided_slice %197 {offsets = [96, 0], sizes = [32, 8], strides = [1, 1]} : vector<128x8xf32> to vector<32x8xf32>
    %203 = arith.mulf %200, %180 : vector<32x8xf32>
    %204 = arith.mulf %199, %201 : vector<32x8xf32>
    %205 = arith.addf %203, %204 : vector<32x8xf32>
    %206 = math.tanh %205 : vector<32x8xf32>
    %207 = arith.mulf %202, %206 : vector<32x8xf32>
    %c8_i32 = arith.constant 8 : i32
    %208 = arith.index_cast %c8_i32 : i32 to index
    %c0_34 = arith.constant 0 : index
    %209 = vector.load %arg2[%208, %c0_34] : memref<16x8xf32, #tpu.memory_space<vmem>>, vector<1x8xf32>
    %210 = arith.truncf %207 : vector<32x8xf32> to vector<32x8xbf16>
    %cst_35 = arith.constant dense<0.000000e+00> : vector<128x8xf32>
    %211 = tpu.matmul %5, %210, %cst_35 {dimension_numbers = #tpu.dot_dimension_numbers<[1], [0], [0], [1], [0, 0, 1, 1], [], []>} : vector<128x32xbf16>, vector<32x8xbf16>, vector<128x8xf32> -> vector<128x8xf32>
    %212 = vector.broadcast %3 : vector<128x1xf32> to vector<128x8xf32>
    %213 = vector.broadcast %209 : vector<1x8xf32> to vector<128x8xf32>
    %214 = arith.mulf %212, %213 : vector<128x8xf32>
    %215 = arith.addf %211, %214 : vector<128x8xf32>
    %216 = vector.broadcast %4 : vector<128x1xf32> to vector<128x8xf32>
    %217 = arith.addf %215, %216 : vector<128x8xf32>
    %218 = arith.negf %217 : vector<128x8xf32>
    %219 = math.exp %218 : vector<128x8xf32>
    %cst_36 = arith.constant 1.000000e+00 : f32
    %220 = vector.broadcast %cst_36 : f32 to vector<128x8xf32>
    %221 = arith.addf %220, %219 : vector<128x8xf32>
    %222 = arith.divf %220, %221 : vector<128x8xf32>
    %223 = math.tanh %217 : vector<128x8xf32>
    %224 = vector.extract_strided_slice %222 {offsets = [0, 0], sizes = [32, 8], strides = [1, 1]} : vector<128x8xf32> to vector<32x8xf32>
    %225 = vector.extract_strided_slice %222 {offsets = [32, 0], sizes = [32, 8], strides = [1, 1]} : vector<128x8xf32> to vector<32x8xf32>
    %226 = vector.extract_strided_slice %223 {offsets = [64, 0], sizes = [32, 8], strides = [1, 1]} : vector<128x8xf32> to vector<32x8xf32>
    %227 = vector.extract_strided_slice %222 {offsets = [96, 0], sizes = [32, 8], strides = [1, 1]} : vector<128x8xf32> to vector<32x8xf32>
    %228 = arith.mulf %225, %205 : vector<32x8xf32>
    %229 = arith.mulf %224, %226 : vector<32x8xf32>
    %230 = arith.addf %228, %229 : vector<32x8xf32>
    %231 = math.tanh %230 : vector<32x8xf32>
    %232 = arith.mulf %227, %231 : vector<32x8xf32>
    %c9_i32 = arith.constant 9 : i32
    %233 = arith.index_cast %c9_i32 : i32 to index
    %c0_37 = arith.constant 0 : index
    %234 = vector.load %arg2[%233, %c0_37] : memref<16x8xf32, #tpu.memory_space<vmem>>, vector<1x8xf32>
    %235 = arith.truncf %232 : vector<32x8xf32> to vector<32x8xbf16>
    %cst_38 = arith.constant dense<0.000000e+00> : vector<128x8xf32>
    %236 = tpu.matmul %5, %235, %cst_38 {dimension_numbers = #tpu.dot_dimension_numbers<[1], [0], [0], [1], [0, 0, 1, 1], [], []>} : vector<128x32xbf16>, vector<32x8xbf16>, vector<128x8xf32> -> vector<128x8xf32>
    %237 = vector.broadcast %3 : vector<128x1xf32> to vector<128x8xf32>
    %238 = vector.broadcast %234 : vector<1x8xf32> to vector<128x8xf32>
    %239 = arith.mulf %237, %238 : vector<128x8xf32>
    %240 = arith.addf %236, %239 : vector<128x8xf32>
    %241 = vector.broadcast %4 : vector<128x1xf32> to vector<128x8xf32>
    %242 = arith.addf %240, %241 : vector<128x8xf32>
    %243 = arith.negf %242 : vector<128x8xf32>
    %244 = math.exp %243 : vector<128x8xf32>
    %cst_39 = arith.constant 1.000000e+00 : f32
    %245 = vector.broadcast %cst_39 : f32 to vector<128x8xf32>
    %246 = arith.addf %245, %244 : vector<128x8xf32>
    %247 = arith.divf %245, %246 : vector<128x8xf32>
    %248 = math.tanh %242 : vector<128x8xf32>
    %249 = vector.extract_strided_slice %247 {offsets = [0, 0], sizes = [32, 8], strides = [1, 1]} : vector<128x8xf32> to vector<32x8xf32>
    %250 = vector.extract_strided_slice %247 {offsets = [32, 0], sizes = [32, 8], strides = [1, 1]} : vector<128x8xf32> to vector<32x8xf32>
    %251 = vector.extract_strided_slice %248 {offsets = [64, 0], sizes = [32, 8], strides = [1, 1]} : vector<128x8xf32> to vector<32x8xf32>
    %252 = vector.extract_strided_slice %247 {offsets = [96, 0], sizes = [32, 8], strides = [1, 1]} : vector<128x8xf32> to vector<32x8xf32>
    %253 = arith.mulf %250, %230 : vector<32x8xf32>
    %254 = arith.mulf %249, %251 : vector<32x8xf32>
    %255 = arith.addf %253, %254 : vector<32x8xf32>
    %256 = math.tanh %255 : vector<32x8xf32>
    %257 = arith.mulf %252, %256 : vector<32x8xf32>
    %c10_i32 = arith.constant 10 : i32
    %258 = arith.index_cast %c10_i32 : i32 to index
    %c0_40 = arith.constant 0 : index
    %259 = vector.load %arg2[%258, %c0_40] : memref<16x8xf32, #tpu.memory_space<vmem>>, vector<1x8xf32>
    %260 = arith.truncf %257 : vector<32x8xf32> to vector<32x8xbf16>
    %cst_41 = arith.constant dense<0.000000e+00> : vector<128x8xf32>
    %261 = tpu.matmul %5, %260, %cst_41 {dimension_numbers = #tpu.dot_dimension_numbers<[1], [0], [0], [1], [0, 0, 1, 1], [], []>} : vector<128x32xbf16>, vector<32x8xbf16>, vector<128x8xf32> -> vector<128x8xf32>
    %262 = vector.broadcast %3 : vector<128x1xf32> to vector<128x8xf32>
    %263 = vector.broadcast %259 : vector<1x8xf32> to vector<128x8xf32>
    %264 = arith.mulf %262, %263 : vector<128x8xf32>
    %265 = arith.addf %261, %264 : vector<128x8xf32>
    %266 = vector.broadcast %4 : vector<128x1xf32> to vector<128x8xf32>
    %267 = arith.addf %265, %266 : vector<128x8xf32>
    %268 = arith.negf %267 : vector<128x8xf32>
    %269 = math.exp %268 : vector<128x8xf32>
    %cst_42 = arith.constant 1.000000e+00 : f32
    %270 = vector.broadcast %cst_42 : f32 to vector<128x8xf32>
    %271 = arith.addf %270, %269 : vector<128x8xf32>
    %272 = arith.divf %270, %271 : vector<128x8xf32>
    %273 = math.tanh %267 : vector<128x8xf32>
    %274 = vector.extract_strided_slice %272 {offsets = [0, 0], sizes = [32, 8], strides = [1, 1]} : vector<128x8xf32> to vector<32x8xf32>
    %275 = vector.extract_strided_slice %272 {offsets = [32, 0], sizes = [32, 8], strides = [1, 1]} : vector<128x8xf32> to vector<32x8xf32>
    %276 = vector.extract_strided_slice %273 {offsets = [64, 0], sizes = [32, 8], strides = [1, 1]} : vector<128x8xf32> to vector<32x8xf32>
    %277 = vector.extract_strided_slice %272 {offsets = [96, 0], sizes = [32, 8], strides = [1, 1]} : vector<128x8xf32> to vector<32x8xf32>
    %278 = arith.mulf %275, %255 : vector<32x8xf32>
    %279 = arith.mulf %274, %276 : vector<32x8xf32>
    %280 = arith.addf %278, %279 : vector<32x8xf32>
    %281 = math.tanh %280 : vector<32x8xf32>
    %282 = arith.mulf %277, %281 : vector<32x8xf32>
    %c11_i32 = arith.constant 11 : i32
    %283 = arith.index_cast %c11_i32 : i32 to index
    %c0_43 = arith.constant 0 : index
    %284 = vector.load %arg2[%283, %c0_43] : memref<16x8xf32, #tpu.memory_space<vmem>>, vector<1x8xf32>
    %285 = arith.truncf %282 : vector<32x8xf32> to vector<32x8xbf16>
    %cst_44 = arith.constant dense<0.000000e+00> : vector<128x8xf32>
    %286 = tpu.matmul %5, %285, %cst_44 {dimension_numbers = #tpu.dot_dimension_numbers<[1], [0], [0], [1], [0, 0, 1, 1], [], []>} : vector<128x32xbf16>, vector<32x8xbf16>, vector<128x8xf32> -> vector<128x8xf32>
    %287 = vector.broadcast %3 : vector<128x1xf32> to vector<128x8xf32>
    %288 = vector.broadcast %284 : vector<1x8xf32> to vector<128x8xf32>
    %289 = arith.mulf %287, %288 : vector<128x8xf32>
    %290 = arith.addf %286, %289 : vector<128x8xf32>
    %291 = vector.broadcast %4 : vector<128x1xf32> to vector<128x8xf32>
    %292 = arith.addf %290, %291 : vector<128x8xf32>
    %293 = arith.negf %292 : vector<128x8xf32>
    %294 = math.exp %293 : vector<128x8xf32>
    %cst_45 = arith.constant 1.000000e+00 : f32
    %295 = vector.broadcast %cst_45 : f32 to vector<128x8xf32>
    %296 = arith.addf %295, %294 : vector<128x8xf32>
    %297 = arith.divf %295, %296 : vector<128x8xf32>
    %298 = math.tanh %292 : vector<128x8xf32>
    %299 = vector.extract_strided_slice %297 {offsets = [0, 0], sizes = [32, 8], strides = [1, 1]} : vector<128x8xf32> to vector<32x8xf32>
    %300 = vector.extract_strided_slice %297 {offsets = [32, 0], sizes = [32, 8], strides = [1, 1]} : vector<128x8xf32> to vector<32x8xf32>
    %301 = vector.extract_strided_slice %298 {offsets = [64, 0], sizes = [32, 8], strides = [1, 1]} : vector<128x8xf32> to vector<32x8xf32>
    %302 = vector.extract_strided_slice %297 {offsets = [96, 0], sizes = [32, 8], strides = [1, 1]} : vector<128x8xf32> to vector<32x8xf32>
    %303 = arith.mulf %300, %280 : vector<32x8xf32>
    %304 = arith.mulf %299, %301 : vector<32x8xf32>
    %305 = arith.addf %303, %304 : vector<32x8xf32>
    %306 = math.tanh %305 : vector<32x8xf32>
    %307 = arith.mulf %302, %306 : vector<32x8xf32>
    %c12_i32 = arith.constant 12 : i32
    %308 = arith.index_cast %c12_i32 : i32 to index
    %c0_46 = arith.constant 0 : index
    %309 = vector.load %arg2[%308, %c0_46] : memref<16x8xf32, #tpu.memory_space<vmem>>, vector<1x8xf32>
    %310 = arith.truncf %307 : vector<32x8xf32> to vector<32x8xbf16>
    %cst_47 = arith.constant dense<0.000000e+00> : vector<128x8xf32>
    %311 = tpu.matmul %5, %310, %cst_47 {dimension_numbers = #tpu.dot_dimension_numbers<[1], [0], [0], [1], [0, 0, 1, 1], [], []>} : vector<128x32xbf16>, vector<32x8xbf16>, vector<128x8xf32> -> vector<128x8xf32>
    %312 = vector.broadcast %3 : vector<128x1xf32> to vector<128x8xf32>
    %313 = vector.broadcast %309 : vector<1x8xf32> to vector<128x8xf32>
    %314 = arith.mulf %312, %313 : vector<128x8xf32>
    %315 = arith.addf %311, %314 : vector<128x8xf32>
    %316 = vector.broadcast %4 : vector<128x1xf32> to vector<128x8xf32>
    %317 = arith.addf %315, %316 : vector<128x8xf32>
    %318 = arith.negf %317 : vector<128x8xf32>
    %319 = math.exp %318 : vector<128x8xf32>
    %cst_48 = arith.constant 1.000000e+00 : f32
    %320 = vector.broadcast %cst_48 : f32 to vector<128x8xf32>
    %321 = arith.addf %320, %319 : vector<128x8xf32>
    %322 = arith.divf %320, %321 : vector<128x8xf32>
    %323 = math.tanh %317 : vector<128x8xf32>
    %324 = vector.extract_strided_slice %322 {offsets = [0, 0], sizes = [32, 8], strides = [1, 1]} : vector<128x8xf32> to vector<32x8xf32>
    %325 = vector.extract_strided_slice %322 {offsets = [32, 0], sizes = [32, 8], strides = [1, 1]} : vector<128x8xf32> to vector<32x8xf32>
    %326 = vector.extract_strided_slice %323 {offsets = [64, 0], sizes = [32, 8], strides = [1, 1]} : vector<128x8xf32> to vector<32x8xf32>
    %327 = vector.extract_strided_slice %322 {offsets = [96, 0], sizes = [32, 8], strides = [1, 1]} : vector<128x8xf32> to vector<32x8xf32>
    %328 = arith.mulf %325, %305 : vector<32x8xf32>
    %329 = arith.mulf %324, %326 : vector<32x8xf32>
    %330 = arith.addf %328, %329 : vector<32x8xf32>
    %331 = math.tanh %330 : vector<32x8xf32>
    %332 = arith.mulf %327, %331 : vector<32x8xf32>
    %c13_i32 = arith.constant 13 : i32
    %333 = arith.index_cast %c13_i32 : i32 to index
    %c0_49 = arith.constant 0 : index
    %334 = vector.load %arg2[%333, %c0_49] : memref<16x8xf32, #tpu.memory_space<vmem>>, vector<1x8xf32>
    %335 = arith.truncf %332 : vector<32x8xf32> to vector<32x8xbf16>
    %cst_50 = arith.constant dense<0.000000e+00> : vector<128x8xf32>
    %336 = tpu.matmul %5, %335, %cst_50 {dimension_numbers = #tpu.dot_dimension_numbers<[1], [0], [0], [1], [0, 0, 1, 1], [], []>} : vector<128x32xbf16>, vector<32x8xbf16>, vector<128x8xf32> -> vector<128x8xf32>
    %337 = vector.broadcast %3 : vector<128x1xf32> to vector<128x8xf32>
    %338 = vector.broadcast %334 : vector<1x8xf32> to vector<128x8xf32>
    %339 = arith.mulf %337, %338 : vector<128x8xf32>
    %340 = arith.addf %336, %339 : vector<128x8xf32>
    %341 = vector.broadcast %4 : vector<128x1xf32> to vector<128x8xf32>
    %342 = arith.addf %340, %341 : vector<128x8xf32>
    %343 = arith.negf %342 : vector<128x8xf32>
    %344 = math.exp %343 : vector<128x8xf32>
    %cst_51 = arith.constant 1.000000e+00 : f32
    %345 = vector.broadcast %cst_51 : f32 to vector<128x8xf32>
    %346 = arith.addf %345, %344 : vector<128x8xf32>
    %347 = arith.divf %345, %346 : vector<128x8xf32>
    %348 = math.tanh %342 : vector<128x8xf32>
    %349 = vector.extract_strided_slice %347 {offsets = [0, 0], sizes = [32, 8], strides = [1, 1]} : vector<128x8xf32> to vector<32x8xf32>
    %350 = vector.extract_strided_slice %347 {offsets = [32, 0], sizes = [32, 8], strides = [1, 1]} : vector<128x8xf32> to vector<32x8xf32>
    %351 = vector.extract_strided_slice %348 {offsets = [64, 0], sizes = [32, 8], strides = [1, 1]} : vector<128x8xf32> to vector<32x8xf32>
    %352 = vector.extract_strided_slice %347 {offsets = [96, 0], sizes = [32, 8], strides = [1, 1]} : vector<128x8xf32> to vector<32x8xf32>
    %353 = arith.mulf %350, %330 : vector<32x8xf32>
    %354 = arith.mulf %349, %351 : vector<32x8xf32>
    %355 = arith.addf %353, %354 : vector<32x8xf32>
    %356 = math.tanh %355 : vector<32x8xf32>
    %357 = arith.mulf %352, %356 : vector<32x8xf32>
    %c14_i32 = arith.constant 14 : i32
    %358 = arith.index_cast %c14_i32 : i32 to index
    %c0_52 = arith.constant 0 : index
    %359 = vector.load %arg2[%358, %c0_52] : memref<16x8xf32, #tpu.memory_space<vmem>>, vector<1x8xf32>
    %360 = arith.truncf %357 : vector<32x8xf32> to vector<32x8xbf16>
    %cst_53 = arith.constant dense<0.000000e+00> : vector<128x8xf32>
    %361 = tpu.matmul %5, %360, %cst_53 {dimension_numbers = #tpu.dot_dimension_numbers<[1], [0], [0], [1], [0, 0, 1, 1], [], []>} : vector<128x32xbf16>, vector<32x8xbf16>, vector<128x8xf32> -> vector<128x8xf32>
    %362 = vector.broadcast %3 : vector<128x1xf32> to vector<128x8xf32>
    %363 = vector.broadcast %359 : vector<1x8xf32> to vector<128x8xf32>
    %364 = arith.mulf %362, %363 : vector<128x8xf32>
    %365 = arith.addf %361, %364 : vector<128x8xf32>
    %366 = vector.broadcast %4 : vector<128x1xf32> to vector<128x8xf32>
    %367 = arith.addf %365, %366 : vector<128x8xf32>
    %368 = arith.negf %367 : vector<128x8xf32>
    %369 = math.exp %368 : vector<128x8xf32>
    %cst_54 = arith.constant 1.000000e+00 : f32
    %370 = vector.broadcast %cst_54 : f32 to vector<128x8xf32>
    %371 = arith.addf %370, %369 : vector<128x8xf32>
    %372 = arith.divf %370, %371 : vector<128x8xf32>
    %373 = math.tanh %367 : vector<128x8xf32>
    %374 = vector.extract_strided_slice %372 {offsets = [0, 0], sizes = [32, 8], strides = [1, 1]} : vector<128x8xf32> to vector<32x8xf32>
    %375 = vector.extract_strided_slice %372 {offsets = [32, 0], sizes = [32, 8], strides = [1, 1]} : vector<128x8xf32> to vector<32x8xf32>
    %376 = vector.extract_strided_slice %373 {offsets = [64, 0], sizes = [32, 8], strides = [1, 1]} : vector<128x8xf32> to vector<32x8xf32>
    %377 = vector.extract_strided_slice %372 {offsets = [96, 0], sizes = [32, 8], strides = [1, 1]} : vector<128x8xf32> to vector<32x8xf32>
    %378 = arith.mulf %375, %355 : vector<32x8xf32>
    %379 = arith.mulf %374, %376 : vector<32x8xf32>
    %380 = arith.addf %378, %379 : vector<32x8xf32>
    %381 = math.tanh %380 : vector<32x8xf32>
    %382 = arith.mulf %377, %381 : vector<32x8xf32>
    %c15_i32 = arith.constant 15 : i32
    %383 = arith.index_cast %c15_i32 : i32 to index
    %c0_55 = arith.constant 0 : index
    %384 = vector.load %arg2[%383, %c0_55] : memref<16x8xf32, #tpu.memory_space<vmem>>, vector<1x8xf32>
    %385 = arith.truncf %382 : vector<32x8xf32> to vector<32x8xbf16>
    %cst_56 = arith.constant dense<0.000000e+00> : vector<128x8xf32>
    %386 = tpu.matmul %5, %385, %cst_56 {dimension_numbers = #tpu.dot_dimension_numbers<[1], [0], [0], [1], [0, 0, 1, 1], [], []>} : vector<128x32xbf16>, vector<32x8xbf16>, vector<128x8xf32> -> vector<128x8xf32>
    %387 = vector.broadcast %3 : vector<128x1xf32> to vector<128x8xf32>
    %388 = vector.broadcast %384 : vector<1x8xf32> to vector<128x8xf32>
    %389 = arith.mulf %387, %388 : vector<128x8xf32>
    %390 = arith.addf %386, %389 : vector<128x8xf32>
    %391 = vector.broadcast %4 : vector<128x1xf32> to vector<128x8xf32>
    %392 = arith.addf %390, %391 : vector<128x8xf32>
    %393 = arith.negf %392 : vector<128x8xf32>
    %394 = math.exp %393 : vector<128x8xf32>
    %cst_57 = arith.constant 1.000000e+00 : f32
    %395 = vector.broadcast %cst_57 : f32 to vector<128x8xf32>
    %396 = arith.addf %395, %394 : vector<128x8xf32>
    %397 = arith.divf %395, %396 : vector<128x8xf32>
    %398 = math.tanh %392 : vector<128x8xf32>
    %399 = vector.extract_strided_slice %397 {offsets = [0, 0], sizes = [32, 8], strides = [1, 1]} : vector<128x8xf32> to vector<32x8xf32>
    %400 = vector.extract_strided_slice %397 {offsets = [32, 0], sizes = [32, 8], strides = [1, 1]} : vector<128x8xf32> to vector<32x8xf32>
    %401 = vector.extract_strided_slice %398 {offsets = [64, 0], sizes = [32, 8], strides = [1, 1]} : vector<128x8xf32> to vector<32x8xf32>
    %402 = vector.extract_strided_slice %397 {offsets = [96, 0], sizes = [32, 8], strides = [1, 1]} : vector<128x8xf32> to vector<32x8xf32>
    %403 = arith.mulf %400, %380 : vector<32x8xf32>
    %404 = arith.mulf %399, %401 : vector<32x8xf32>
    %405 = arith.addf %403, %404 : vector<32x8xf32>
    %406 = math.tanh %405 : vector<32x8xf32>
    %407 = arith.mulf %402, %406 : vector<32x8xf32>
    %c16_i32 = arith.constant 16 : i32
    %c0_58 = arith.constant 0 : index
    %c0_59 = arith.constant 0 : index
    %408 = vector.load %arg7[%c0_58, %c0_59] : memref<32x8xf32, #tpu.memory_space<vmem>>, vector<32x8xf32>
    tpu.vector_store %arg7[%c0_58, %c0_59], %407 {strides = array<i32>} : memref<32x8xf32, #tpu.memory_space<vmem>>, vector<32x8xf32>,
    %c0_60 = arith.constant 0 : index
    %c0_61 = arith.constant 0 : index
    %409 = vector.load %arg8[%c0_60, %c0_61] : memref<32x8xf32, #tpu.memory_space<vmem>>, vector<32x8xf32>
    tpu.vector_store %arg8[%c0_60, %c0_61], %405 {strides = array<i32>} : memref<32x8xf32, #tpu.memory_space<vmem>>, vector<32x8xf32>,
    %c0_62 = arith.constant 0 : index
    %c0_63 = arith.constant 0 : index
    %410 = vector.load %arg6[%c0_62, %c0_63] : memref<32x8xf32, #tpu.memory_space<vmem>>, vector<32x8xf32>
    tpu.vector_store %arg6[%c0_62, %c0_63], %407 {strides = array<i32>} : memref<32x8xf32, #tpu.memory_space<vmem>>, vector<32x8xf32>,
    return
  }
  func.func @transform_0(%arg0: i32, %arg1: i32) -> (i32, i32) {
    %c0_i32 = arith.constant 0 : i32
    return %arg1, %arg0 : i32, i32
  }
  func.func @transform_1(%arg0: i32, %arg1: i32) -> (i32, i32) {
    %c0_i32 = arith.constant 0 : i32
    %c0_i32_0 = arith.constant 0 : i32
    %c0_i32_1 = arith.constant 0 : i32
    return %c0_i32, %c0_i32_0 : i32, i32
  }
  func.func @transform_2(%arg0: i32, %arg1: i32) -> (i32, i32) {
    %c0_i32 = arith.constant 0 : i32
    %c0_i32_0 = arith.constant 0 : i32
    %c0_i32_1 = arith.constant 0 : i32
    return %c0_i32, %c0_i32_0 : i32, i32
  }
  func.func @transform_3(%arg0: i32, %arg1: i32) -> (i32, i32) {
    %c0_i32 = arith.constant 0 : i32
    %c0_i32_0 = arith.constant 0 : i32
    %c0_i32_1 = arith.constant 0 : i32
    return %c0_i32, %c0_i32_0 : i32, i32
  }
  func.func @transform_4(%arg0: i32, %arg1: i32) -> (i32, i32) {
    %c0_i32 = arith.constant 0 : i32
    %c0_i32_0 = arith.constant 0 : i32
    return %c0_i32, %arg0 : i32, i32
  }
}

</mosaic_0001>

<bundles_post_ra>
// kernel: tpu_custom_call.1
= control target key start
LH: loop header
LB: loop body
LE: loop exit
PB: predicated region body
PF: predicated region fallthrough
CT: control target
= control target key end

     0   :  { %vm22_vm0 = vcmask 64512   ;;  %v5933_v0 = vmov 0.0   ;;  %v5934_v1 = vmov 0   ;;  %vm230_vm1 = vcmask 261120   ;;  %s8401_s1 = inlined_call_operand.vmem [shape: f32[128,1], index: 1, kind: input, shape index: {}]   ;;  %s8402_s3 = inlined_call_operand.vmem [shape: bf16[128,32], index: 3, kind: input, shape index: {}]   ;;  %s8403_s2 = inlined_call_operand.vmem [shape: f32[128,1], index: 2, kind: input, shape index: {}]   ;;  %s8404_s0 = inlined_call_operand.vmem [shape: f32[16,8], index: 0, kind: input, shape index: {}]   ;;  %s8405_s4 = inlined_call_operand.vmem [shape: f32[32,8], index: 4, kind: output, shape index: {}]  }
   0x1   :  { %23 = vst.msk [vmem:[#allocation2] sm:$0xff] %vm22_vm0, %v5933_v0  ;;  %24 = vst.msk [vmem:[#allocation2 + $0x8] sm:$0xff] %vm22_vm0, %v5933_v0  ;;  %4868 = vset.pattern.permute.xlu1 %v5934_v1  ;;  %4867 = vset.pattern.permute.xlu0 %v5934_v1  ;;  %v35_v2 = vld [vmem:[%s8401_s1 + $0x20] sm:$0xff]  ;;  %v36_v5 = vld [vmem:[%s8401_s1 + $0x28] sm:$0xff] }
   0x2   :  { %25 = vst.msk [vmem:[#allocation2 + $0x10] sm:$0xff] %vm22_vm0, %v5933_v0  ;;  %26 = vst.msk [vmem:[#allocation2 + $0x18] sm:$0xff] %vm22_vm0, %v5933_v0  ;;  %v31_v3 = vld [vmem:[%s8401_s1] sm:$0xff]  ;;  %112 = vperm.xlu1 %4868, %v35_v2   ;;  %v32_v6 = vld [vmem:[%s8401_s1 + $0x8] sm:$0xff] }
   0x3   :  { %27 = vst.msk [vmem:[#allocation3] sm:$0xff] %vm22_vm0, %v5933_v0  ;;  %28 = vst.msk [vmem:[#allocation3 + $0x8] sm:$0xff] %vm22_vm0, %v5933_v0  ;;  %92 = vperm.xlu0 %4867, %v31_v3   ;;  %v5977_v4 = vld [vmem:[%s8402_s3] sm:$0xff]   ;;  %v34_v7 = vld [vmem:[%s8401_s1 + $0x18] sm:$0xff] }
   0x4   :  { %29 = vst.msk [vmem:[#allocation3 + $0x10] sm:$0xff] %vm22_vm0, %v5933_v0  ;;  %30 = vst.msk [vmem:[#allocation3 + $0x18] sm:$0xff] %vm22_vm0, %v5933_v0  ;;  %4549 = vmatprep.mubr.msk.bf16.mxu0 %vm230_vm1, %v5977_v4  ;;  %4569 = vmatprep.mubr.msk.bf16.mxu1 %vm230_vm1, %v5977_v4  ;;  %v33_v8 = vld [vmem:[%s8401_s1 + $0x10] sm:$0xff]  ;;  %v38_v15 = vld [vmem:[%s8401_s1 + $0x38] sm:$0xff] }
   0x5   :  { %v37_v16 = vld [vmem:[%s8401_s1 + $0x30] sm:$0xff]  ;;  %v4870_v17 = vld [vmem:[%s8402_s3 + $0x8] sm:$0xff]   ;;  %v47_v19 = vld [vmem:[%s8403_s2] sm:$0xff] }
   0x6   :  { %117 = vperm.xlu1 %4868, %v36_v5   ;;  %v48_v18 = vld [vmem:[%s8403_s2 + $0x8] sm:$0xff]  ;;  %v4871_v20 = vld [vmem:[%s8402_s3 + $0x10] sm:$0xff]   ;;  %v51_v22 = vld [vmem:[%s8403_s2 + $0x20] sm:$0xff] }
   0x7   :  { %97 = vperm.xlu0 %4867, %v32_v6   ;;  %v52_v21 = vld [vmem:[%s8403_s2 + $0x28] sm:$0xff]  ;;  %v4872_v23 = vld [vmem:[%s8402_s3 + $0x18] sm:$0xff]   ;;  %v49_v25 = vld [vmem:[%s8403_s2 + $0x10] sm:$0xff] }
   0x8   :  { %v79_v9 = vld [vmem:[#allocation2] sm:$0xff]  ;;  %v80_v10 = vld [vmem:[#allocation2 + $0x8] sm:$0xff]  ;;  %v50_v24 = vld [vmem:[%s8403_s2 + $0x18] sm:$0xff] }
   0x9   :  { %v81_v11 = vld [vmem:[#allocation2 + $0x10] sm:$0xff]  ;;  %v88_v12 = vpack.c.bf16 %v80_v10, %v79_v9  ;;  %v82_v13 = vld [vmem:[#allocation2 + $0x18] sm:$0xff]  ;;  %v4873_v26 = vld [vmem:[%s8402_s3 + $0x20] sm:$0xff]  }
   0xa   :  { %v89_v14 = vpack.c.bf16 %v82_v13, %v81_v11  ;;  %107 = vperm.xlu1 %4868, %v34_v7   ;;  %v54_v27 = vld [vmem:[%s8403_s2 + $0x38] sm:$0xff]  ;;  %v53_v28 = vld [vmem:[%s8403_s2 + $0x30] sm:$0xff]  ;;  %v6044_v29 = vld [vmem:[%s8402_s3 + $0x28] sm:$0xff]  }
   0xb   :  { %102 = vperm.xlu0 %4867, %v33_v8   ;;  %4545 = vmatprep.subr.bf16.mxu0 %v88_v12  ;;  %v40_v30 = vld [vmem:[%s8401_s1 + $0x48] sm:$0xff]  ;;  %v39_v31 = vld [vmem:[%s8401_s1 + $0x40] sm:$0xff]  ;;  %v6055_v32 = vld [vmem:[%s8402_s3 + $0x30] sm:$0xff]  }
   0xc   :  { %4546 = vmatpush3.bf16.msra.mxu0 %v88_v12  ;;  %v44_v33 = vld [vmem:[%s8401_s1 + $0x68] sm:$0xff]  ;;  %v43_v34 = vld [vmem:[%s8401_s1 + $0x60] sm:$0xff]  ;;  %v6070_v35 = vld [vmem:[%s8402_s3 + $0x38] sm:$0xff]  }
   0xd   :  { %4547 = vmatprep.subr.bf16.mxu0 %v89_v14  ;;  %v42_v36 = vld [vmem:[%s8401_s1 + $0x58] sm:$0xff]  ;;  %v41_v37 = vld [vmem:[%s8401_s1 + $0x50] sm:$0xff]  ;;  %v56_v40 = vld [vmem:[%s8403_s2 + $0x48] sm:$0xff] }
   0xe   :  { %127 = vperm.xlu1 %4868, %v38_v15   ;;  %v46_v38 = vld [vmem:[%s8401_s1 + $0x78] sm:$0xff]  ;;  %v45_v39 = vld [vmem:[%s8401_s1 + $0x70] sm:$0xff]  ;;  %v55_v41 = vld [vmem:[%s8403_s2 + $0x40] sm:$0xff] }
   0xf   :  { %122 = vperm.xlu0 %4867, %v37_v16   ;;  %v60_v42 = vld [vmem:[%s8403_s2 + $0x68] sm:$0xff]  ;;  %v59_v43 = vld [vmem:[%s8403_s2 + $0x60] sm:$0xff]  ;;  %v58_v44 = vld [vmem:[%s8403_s2 + $0x58] sm:$0xff] }
  0x10   :  { %4548 = vmatpush3.bf16.msra.mxu0 %v89_v14  ;;  %v57_v45 = vld [vmem:[%s8403_s2 + $0x50] sm:$0xff]  ;;  %v62_v46 = vld [vmem:[%s8403_s2 + $0x78] sm:$0xff]  ;;  %v6115_v48 = vld [vmem:[%s8404_s0 + $0x1] ss:$0 sm:$0xff] }
  0x11   :  { %v61_v47 = vld [vmem:[%s8403_s2 + $0x70] sm:$0xff]  ;;  %v6120_v49 = vld [vmem:[%s8404_s0 + $0x2] ss:$0 sm:$0xff]  ;;  %v6125_v50 = vld [vmem:[%s8404_s0 + $0x3] ss:$0 sm:$0xff] }
  0x12   :  { %359 = vperm.xlu1 %4868, %v48_v18   ;;  %v6134_v53 = vld [vmem:[%s8404_s0 + $0x4] ss:$0 sm:$0xff]  ;;  %v6139_v54 = vld [vmem:[%s8404_s0 + $0x5] ss:$0 sm:$0xff]  ;;  %v6152_v57 = vld [vmem:[%s8404_s0 + $0x6] ss:$0 sm:$0xff] }
  0x13   :  { %354 = vperm.xlu0 %4867, %v47_v19   ;;  %4550 = vmatmul.mubr.msk.bf16.vlgmr.msra.gmra.mrb[0].mxu0 %vm230_vm1, %v4870_v17  ;;  %v6157_v58 = vld [vmem:[%s8404_s0 + $0x7] ss:$0 sm:$0xff] }
  0x14   :  { %4553 = vmatprep.mubr.msk.bf16.mxu0 %vm230_vm1, %v4871_v20 }
  0x16   :  { %379 = vperm.xlu1 %4868, %v52_v21  }
  0x17   :  { %374 = vperm.xlu0 %4867, %v51_v22  }
  0x1a   :  { %369 = vperm.xlu1 %4868, %v50_v24  }
  0x1b   :  { %364 = vperm.xlu0 %4867, %v49_v25   ;;  %4554 = vmatmul.mubr.msk.bf16.gmra.mrb[4].mxu0 %vm230_vm1, %v4872_v23 }
  0x1c   :  { %4557 = vmatprep.mubr.msk.bf16.mxu0 %vm230_vm1, %v4873_v26 }
  0x1e   :  { %389 = vperm.xlu1 %4868, %v54_v27  }
  0x1f   :  { %384 = vperm.xlu0 %4867, %v53_v28  }
  0x22   :  { %137 = vperm.xlu1 %4868, %v40_v30  }
  0x23   :  { %132 = vperm.xlu0 %4867, %v39_v31   ;;  %4558 = vmatmul.mubr.msk.bf16.gmra.mrb[8].mxu0 %vm230_vm1, %v6044_v29 }
  0x24   :  { %4561 = vmatprep.mubr.msk.bf16.mxu0 %vm230_vm1, %v6055_v32 }
  0x26   :  { %157 = vperm.xlu1 %4868, %v44_v33  }
  0x27   :  { %152 = vperm.xlu0 %4867, %v43_v34  }
  0x2a   :  { %147 = vperm.xlu1 %4868, %v42_v36  }
  0x2b   :  { %142 = vperm.xlu0 %4867, %v41_v37   ;;  %4562 = vmatmul.mubr.msk.bf16.gmra.mrb[12].mxu0 %vm230_vm1, %v6070_v35 }
  0x2c   :  { %4589 = vmatprep.mubr.msk.bf16.mxu0 %vm230_vm1, %v5977_v4 }
  0x2e   :  { %167 = vperm.xlu1 %4868, %v46_v38  }
  0x2f   :  { %162 = vperm.xlu0 %4867, %v45_v39  }
  0x32   :  { %399 = vperm.xlu1 %4868, %v56_v40  }
  0x33   :  { %394 = vperm.xlu0 %4867, %v55_v41  }
  0x36   :  { %419 = vperm.xlu1 %4868, %v60_v42  }
  0x37   :  { %414 = vperm.xlu0 %4867, %v59_v43  }
  0x3a   :  { %409 = vperm.xlu1 %4868, %v58_v44  }
  0x3b   :  { %404 = vperm.xlu0 %4867, %v57_v45  }
  0x3e   :  { %429 = vperm.xlu1 %4868, %v62_v46  }
  0x3f   :  { %424 = vperm.xlu0 %4867, %v61_v47  }
  0x81   :  { %v6127_v51 = vpop.permute.xlu1 %112 }
  0x82   :  { %v6129_v52 = vpop.permute.xlu0 %92  ;;  %v6147_v56 = vmul.f32 %v6115_v48, %v6127_v51  ;;  %v6165_v60 = vmul.f32 %v6120_v49, %v6127_v51  ;;  %v6173_v62 = vmul.f32 %v6125_v50, %v6127_v51  ;;  %v6181_v0 = vmul.f32 %v6134_v53, %v6127_v51 }
  0x83   :  { %v6143_v55 = vmul.f32 %v6115_v48, %v6129_v52  ;;  %v6161_v59 = vmul.f32 %v6120_v49, %v6129_v52  ;;  %v6169_v61 = vmul.f32 %v6125_v50, %v6129_v52  ;;  %v6177_v63 = vmul.f32 %v6134_v53, %v6129_v52 }
  0x84   :  { %8407 = vst [vmem:[#allocation5_spill] sm:$0xff] %v6165_v60  ;;  %8409 = vst [vmem:[#allocation7_spill] sm:$0xff] %v6173_v62  ;;  %v6185_v1 = vmul.f32 %v6139_v54, %v6129_v52  ;;  %v6189_v2 = vmul.f32 %v6139_v54, %v6127_v51  ;;  %v6197_v5 = vmul.f32 %v6152_v57, %v6129_v52 }
  0x85   :  { %8406 = vst [vmem:[#allocation4_spill] sm:$0xff] %v6161_v59  ;;  %8408 = vst [vmem:[#allocation6_spill] sm:$0xff] %v6169_v61  ;;  %v6191_v3 = vpop.permute.xlu1 %117  ;;  %v6201_v6 = vmul.f32 %v6152_v57, %v6127_v51  ;;  %v6205_v7 = vmul.f32 %v6157_v58, %v6129_v52  ;;  %v6209_v8 = vmul.f32 %v6157_v58, %v6127_v51 }
  0x86   :  { %8410 = vst [vmem:[#allocation8_spill] sm:$0xff] %v6177_v63  ;;  %8411 = vst [vmem:[#allocation9_spill] sm:$0xff] %v6181_v0  ;;  %v6193_v4 = vpop.permute.xlu0 %97  ;;  %v6217_v10 = vmul.f32 %v6115_v48, %v6191_v3  ;;  %v6225_v12 = vmul.f32 %v6120_v49, %v6191_v3  ;;  %v6233_v14 = vmul.f32 %v6125_v50, %v6191_v3 }
  0x87   :  { %8412 = vst [vmem:[#allocation10_spill] sm:$0xff] %v6185_v1  ;;  %8413 = vst [vmem:[#allocation11_spill] sm:$0xff] %v6189_v2  ;;  %v6213_v9 = vmul.f32 %v6115_v48, %v6193_v4  ;;  %v6221_v11 = vmul.f32 %v6120_v49, %v6193_v4  ;;  %v6229_v13 = vmul.f32 %v6125_v50, %v6193_v4 }
  0x88   :  { %8414 = vst [vmem:[#allocation12_spill] sm:$0xff] %v6197_v5  ;;  %8415 = vst [vmem:[#allocation13_spill] sm:$0xff] %v6201_v6  ;;  %v6237_v15 = vmul.f32 %v6134_v53, %v6193_v4  ;;  %v6241_v16 = vmul.f32 %v6134_v53, %v6191_v3  ;;  %v6245_v17 = vmul.f32 %v6139_v54, %v6193_v4 }
  0x89   :  { %8416 = vst [vmem:[#allocation14_spill] sm:$0xff] %v6205_v7  ;;  %8417 = vst [vmem:[#allocation15_spill] sm:$0xff] %v6209_v8  ;;  %v6249_v18 = vmul.f32 %v6139_v54, %v6191_v3  ;;  %v6251_v19 = vpop.permute.xlu1 %107  ;;  %v6257_v21 = vmul.f32 %v6152_v57, %v6193_v4  ;;  %v6261_v22 = vmul.f32 %v6152_v57, %v6191_v3 }
  0x8a   :  { %8418 = vst [vmem:[#allocation16_spill] sm:$0xff] %v6221_v11  ;;  %8419 = vst [vmem:[#allocation17_spill] sm:$0xff] %v6225_v12  ;;  %v6253_v20 = vpop.permute.xlu0 %102  ;;  %v6265_v23 = vmul.f32 %v6157_v58, %v6193_v4  ;;  %v6269_v24 = vmul.f32 %v6157_v58, %v6191_v3  ;;  %v6277_v26 = vmul.f32 %v6115_v48, %v6251_v19 }
  0x8b   :  { %8420 = vst [vmem:[#allocation18_spill] sm:$0xff] %v6229_v13  ;;  %8421 = vst [vmem:[#allocation19_spill] sm:$0xff] %v6233_v14  ;;  %v6273_v25 = vmul.f32 %v6115_v48, %v6253_v20  ;;  %v6281_v27 = vmul.f32 %v6120_v49, %v6253_v20  ;;  %v6285_v28 = vmul.f32 %v6120_v49, %v6251_v19 }
  0x8c   :  { %8422 = vst [vmem:[#allocation20_spill] sm:$0xff] %v6237_v15  ;;  %8423 = vst [vmem:[#allocation21_spill] sm:$0xff] %v6241_v16  ;;  %v6289_v30 = vmul.f32 %v6125_v50, %v6253_v20  ;;  %v6293_v31 = vmul.f32 %v6125_v50, %v6251_v19  ;;  %v6297_v33 = vmul.f32 %v6134_v53, %v6253_v20 }
  0x8d   :  { %8424 = vst [vmem:[#allocation22_spill] sm:$0xff] %v6245_v17  ;;  %8425 = vst [vmem:[#allocation23_spill] sm:$0xff] %v6249_v18  ;;  %v6301_v34 = vmul.f32 %v6134_v53, %v6251_v19  ;;  %v6305_v36 = vmul.f32 %v6139_v54, %v6253_v20  ;;  %v6309_v37 = vmul.f32 %v6139_v54, %v6251_v19  ;;  %v6311_v38 = vpop.permute.xlu1 %127 }
  0x8e   :  { %8426 = vst [vmem:[#allocation24_spill] sm:$0xff] %v6257_v21  ;;  %8427 = vst [vmem:[#allocation25_spill] sm:$0xff] %v6261_v22  ;;  %v6313_v39 = vpop.permute.xlu0 %122  ;;  %v6317_v40 = vmul.f32 %v6152_v57, %v6253_v20  ;;  %v6321_v41 = vmul.f32 %v6152_v57, %v6251_v19  ;;  %v6325_v42 = vmul.f32 %v6157_v58, %v6253_v20 }
  0x8f   :  { %8428 = vst [vmem:[#allocation26_spill] sm:$0xff] %v6265_v23  ;;  %8429 = vst [vmem:[#allocation27_spill] sm:$0xff] %v6269_v24  ;;  %v6329_v43 = vmul.f32 %v6157_v58, %v6251_v19  ;;  %v6333_v44 = vmul.f32 %v6115_v48, %v6313_v39  ;;  %v6337_v45 = vmul.f32 %v6115_v48, %v6311_v38  ;;  %v6358_v23 = vld [vmem:[%s8404_s0 + $0x8] ss:$0 sm:$0xff] }
  0x90   :  { %8430 = vst [vmem:[#allocation28_spill] sm:$0xff] %v6285_v28  ;;  %8431 = vst [vmem:[#allocation29_spill] sm:$0xff] %v6289_v30  ;;  %v6341_v46 = vmul.f32 %v6120_v49, %v6313_v39  ;;  %v6345_v47 = vmul.f32 %v6120_v49, %v6311_v38  ;;  %v6349_v24 = vmul.f32 %v6125_v50, %v6313_v39 }
  0x91   :  { %8432 = vst [vmem:[#allocation30_spill] sm:$0xff] %v6293_v31  ;;  %8433 = vst [vmem:[#allocation31_spill] sm:$0xff] %v6297_v33  ;;  %v6353_v8 = vmul.f32 %v6125_v50, %v6311_v38  ;;  %v6366_v7 = vmul.f32 %v6134_v53, %v6311_v38  ;;  %v6374_v22 = vmul.f32 %v6139_v54, %v6311_v38  ;;  %v6376_v6 = vpop.permute.xlu1 %359 }
  0x92   :  { %8434 = vst [vmem:[#allocation32_spill] sm:$0xff] %v6301_v34  ;;  %8435 = vst [vmem:[#allocation33_spill] sm:$0xff] %v6305_v36  ;;  %v6378_v21 = vpop.permute.xlu0 %354  ;;  %v6386_v5 = vmul.f32 %v6152_v57, %v6311_v38  ;;  %v6394_v18 = vmul.f32 %v6157_v58, %v6311_v38  ;;  %v6419_v2 = vmul.f32 %v6358_v23, %v6313_v39 }
  0x93   :  { %8436 = vst [vmem:[#allocation34_spill] sm:$0xff] %v6309_v37  ;;  %8437 = vst [vmem:[#allocation35_spill] sm:$0xff] %v6317_v40  ;;  %v6390_v40 = vmul.f32 %v6157_v58, %v6313_v39 }
  0x94   :  { %8438 = vst [vmem:[#allocation36_spill] sm:$0xff] %v6321_v41  ;;  %8439 = vst [vmem:[#allocation37_spill] sm:$0xff] %v6325_v42  ;;  %v6370_v42 = vmul.f32 %v6139_v54, %v6313_v39  ;;  %v6382_v41 = vmul.f32 %v6152_v57, %v6313_v39 }
  0x95   :  { %8440 = vst [vmem:[#allocation38_spill] sm:$0xff] %v6329_v43  ;;  %8441 = vst [vmem:[#allocation39_spill] sm:$0xff] %v6341_v46  ;;  %v6362_v43 = vmul.f32 %v6134_v53, %v6313_v39 }
  0x96   :  { %8442 = vst [vmem:[#allocation40_spill] sm:$0xff] %v6345_v47  ;;  %8443 = vst [vmem:[#allocation41_spill] sm:$0xff] %v6349_v24  ;;  %v6456_v17 = vpop.permute.xlu0 %374 }
  0x97   :  { %8444 = vst [vmem:[#allocation42_spill] sm:$0xff] %v6353_v8  ;;  %8445 = vst [vmem:[#allocation43_spill] sm:$0xff] %v6362_v43 }
  0x98   :  { %8446 = vst [vmem:[#allocation44_spill] sm:$0xff] %v6366_v7  ;;  %8447 = vst [vmem:[#allocation45_spill] sm:$0xff] %v6370_v42  ;;  %v6423_v42 = vmul.f32 %v6358_v23, %v6127_v51 }
  0x99   :  { %8448 = vst [vmem:[#allocation46_spill] sm:$0xff] %v6374_v22  ;;  %8449 = vst [vmem:[#allocation47_spill] sm:$0xff] %v6382_v41  ;;  %v6399_v22 = vld [vmem:[%s8404_s0 + $0x9] ss:$0 sm:$0xff]  ;;  %v6403_v41 = vmul.f32 %v6358_v23, %v6253_v20 }
  0x9a   :  { %8450 = vst [vmem:[#allocation48_spill] sm:$0xff] %v6386_v5  ;;  %8451 = vst [vmem:[#allocation49_spill] sm:$0xff] %v6390_v40  ;;  %v6407_v5 = vmul.f32 %v6358_v23, %v6129_v52  ;;  %v6411_v40 = vmul.f32 %v6358_v23, %v6251_v19  ;;  %v6460_v37 = vmul.f32 %v6399_v22, %v6313_v39  ;;  %v6534_v16 = vpop.permute.xlu0 %364 }
  0x9b   :  { %8452 = vst [vmem:[#allocation50_spill] sm:$0xff] %v6394_v18  ;;  %8453 = vst [vmem:[#allocation51_spill] sm:$0xff] %v6403_v41  ;;  %v6415_v18 = vmul.f32 %v6358_v23, %v6193_v4  ;;  %v6427_v41 = vmul.f32 %v6358_v23, %v6311_v38 }
  0x9c   :  { %8454 = vst [vmem:[#allocation52_spill] sm:$0xff] %v6407_v5  ;;  %8455 = vst [vmem:[#allocation53_spill] sm:$0xff] %v6411_v40  ;;  %v6431_v5 = vmul.f32 %v6358_v23, %v6191_v3  ;;  %v6454_v40 = vpop.permute.xlu1 %379 }
  0x9d   :  { %8456 = vst [vmem:[#allocation54_spill] sm:$0xff] %v6415_v18  ;;  %8457 = vst [vmem:[#allocation55_spill] sm:$0xff] %v6419_v2  ;;  %v6436_v18 = vld [vmem:[%s8404_s0 + $0xa] ss:$0 sm:$0xff]  ;;  %v6440_v2 = vmul.f32 %v6399_v22, %v6253_v20 }
  0x9e   :  { %8458 = vst [vmem:[#allocation56_spill] sm:$0xff] %v6423_v42  ;;  %8459 = vst [vmem:[#allocation57_spill] sm:$0xff] %v6427_v41  ;;  %v6444_v42 = vmul.f32 %v6399_v22, %v6129_v52  ;;  %v6448_v41 = vmul.f32 %v6399_v22, %v6251_v19  ;;  %v6497_v1 = vmul.f32 %v6436_v18, %v6313_v39  ;;  %v6612_v15 = vpop.permute.xlu0 %384 }
  0x9f   :  { %8460 = vst [vmem:[#allocation58_spill] sm:$0xff] %v6431_v5  ;;  %8461 = vst [vmem:[#allocation59_spill] sm:$0xff] %v6440_v2  ;;  %v6452_v5 = vmul.f32 %v6399_v22, %v6193_v4  ;;  %v6464_v2 = vmul.f32 %v6399_v22, %v6127_v51  ;;  %v6501_v36 = vmul.f32 %v6436_v18, %v6127_v51 }
  0xa0   :  { %8462 = vst [vmem:[#allocation60_spill] sm:$0xff] %v6444_v42  ;;  %8463 = vst [vmem:[#allocation61_spill] sm:$0xff] %v6448_v41  ;;  %v6468_v42 = vmul.f32 %v6399_v22, %v6311_v38  ;;  %v6472_v41 = vmul.f32 %v6399_v22, %v6191_v3 }
  0xa1   :  { %8464 = vst [vmem:[#allocation62_spill] sm:$0xff] %v6452_v5  ;;  %8465 = vst [vmem:[#allocation63_spill] sm:$0xff] %v6460_v37  ;;  %v6477_v5 = vld [vmem:[%s8404_s0 + $0xb] ss:$0 sm:$0xff]  ;;  %v6481_v37 = vmul.f32 %v6436_v18, %v6253_v20 }
  0xa2   :  { %8466 = vst [vmem:[#allocation64_spill] sm:$0xff] %v6464_v2  ;;  %8467 = vst [vmem:[#allocation65_spill] sm:$0xff] %v6468_v42  ;;  %v6485_v2 = vmul.f32 %v6436_v18, %v6129_v52  ;;  %v6489_v42 = vmul.f32 %v6436_v18, %v6251_v19  ;;  %v6538_v7 = vmul.f32 %v6477_v5, %v6313_v39  ;;  %v6685_v14 = vpop.permute.xlu0 %132 }
  0xa3   :  { %8468 = vst [vmem:[#allocation66_spill] sm:$0xff] %v6472_v41  ;;  %8469 = vst [vmem:[#allocation67_spill] sm:$0xff] %v6481_v37  ;;  %v6493_v41 = vmul.f32 %v6436_v18, %v6193_v4  ;;  %v6505_v37 = vmul.f32 %v6436_v18, %v6311_v38  ;;  %v6729_v62 = vmul.f32 %v6134_v53, %v6685_v14 }
  0xa4   :  { %8470 = vst [vmem:[#allocation68_spill] sm:$0xff] %v6485_v2  ;;  %8471 = vst [vmem:[#allocation69_spill] sm:$0xff] %v6489_v42  ;;  %v6509_v2 = vmul.f32 %v6436_v18, %v6191_v3  ;;  %v6532_v42 = vpop.permute.xlu1 %369  ;;  %v6737_v13 = vmul.f32 %v6139_v54, %v6685_v14 }
  0xa5   :  { %8472 = vst [vmem:[#allocation70_spill] sm:$0xff] %v6493_v41  ;;  %8473 = vst [vmem:[#allocation71_spill] sm:$0xff] %v6497_v1  ;;  %v6514_v41 = vld [vmem:[%s8404_s0 + $0xc] ss:$0 sm:$0xff]  ;;  %v6518_v1 = vmul.f32 %v6477_v5, %v6253_v20 }
  0xa6   :  { %8474 = vst [vmem:[#allocation72_spill] sm:$0xff] %v6501_v36  ;;  %8475 = vst [vmem:[#allocation73_spill] sm:$0xff] %v6505_v37  ;;  %v6522_v36 = vmul.f32 %v6477_v5, %v6129_v52  ;;  %v6526_v37 = vmul.f32 %v6477_v5, %v6251_v19  ;;  %v6575_v0 = vmul.f32 %v6514_v41, %v6313_v39  ;;  %v6745_v61 = vpop.permute.xlu0 %152 }
  0xa7   :  { %8476 = vst [vmem:[#allocation74_spill] sm:$0xff] %v6509_v2  ;;  %8477 = vst [vmem:[#allocation75_spill] sm:$0xff] %v6518_v1  ;;  %v6530_v2 = vmul.f32 %v6477_v5, %v6193_v4  ;;  %v6542_v1 = vmul.f32 %v6477_v5, %v6127_v51  ;;  %v6579_v43 = vmul.f32 %v6514_v41, %v6127_v51 }
  0xa8   :  { %8478 = vst [vmem:[#allocation76_spill] sm:$0xff] %v6522_v36  ;;  %8479 = vst [vmem:[#allocation77_spill] sm:$0xff] %v6526_v37  ;;  %v6546_v36 = vmul.f32 %v6477_v5, %v6311_v38  ;;  %v6550_v37 = vmul.f32 %v6477_v5, %v6191_v3 }
  0xa9   :  { %8480 = vst [vmem:[#allocation78_spill] sm:$0xff] %v6530_v2  ;;  %8481 = vst [vmem:[#allocation79_spill] sm:$0xff] %v6538_v7  ;;  %v6555_v2 = vld [vmem:[%s8404_s0 + $0xd] ss:$0 sm:$0xff]  ;;  %v6559_v7 = vmul.f32 %v6514_v41, %v6253_v20 }
  0xaa   :  { %8482 = vst [vmem:[#allocation80_spill] sm:$0xff] %v6542_v1  ;;  %8483 = vst [vmem:[#allocation81_spill] sm:$0xff] %v6546_v36  ;;  %v6563_v1 = vmul.f32 %v6514_v41, %v6129_v52  ;;  %v6567_v36 = vmul.f32 %v6514_v41, %v6251_v19  ;;  %v6616_v34 = vmul.f32 %v6555_v2, %v6313_v39  ;;  %v6805_v12 = vpop.permute.xlu0 %142 }
  0xab   :  { %8484 = vst [vmem:[#allocation82_spill] sm:$0xff] %v6550_v37  ;;  %8485 = vst [vmem:[#allocation83_spill] sm:$0xff] %v6559_v7  ;;  %v6571_v37 = vmul.f32 %v6514_v41, %v6193_v4  ;;  %v6583_v7 = vmul.f32 %v6514_v41, %v6311_v38  ;;  %v6849_v60 = vmul.f32 %v6134_v53, %v6805_v12 }
  0xac   :  { %8486 = vst [vmem:[#allocation84_spill] sm:$0xff] %v6563_v1  ;;  %8487 = vst [vmem:[#allocation85_spill] sm:$0xff] %v6567_v36  ;;  %v6587_v1 = vmul.f32 %v6514_v41, %v6191_v3  ;;  %v6610_v36 = vpop.permute.xlu1 %389 }
  0xad   :  { %8488 = vst [vmem:[#allocation86_spill] sm:$0xff] %v6571_v37  ;;  %8489 = vst [vmem:[#allocation87_spill] sm:$0xff] %v6575_v0  ;;  %v6592_v37 = vld [vmem:[%s8404_s0 + $0xe] ss:$0 sm:$0xff]  ;;  %v6596_v0 = vmul.f32 %v6555_v2, %v6253_v20 }
  0xae   :  { %8490 = vst [vmem:[#allocation88_spill] sm:$0xff] %v6579_v43  ;;  %8491 = vst [vmem:[#allocation89_spill] sm:$0xff] %v6583_v7  ;;  %v6600_v43 = vmul.f32 %v6555_v2, %v6129_v52  ;;  %v6604_v7 = vmul.f32 %v6555_v2, %v6251_v19  ;;  %v6653_v63 = vmul.f32 %v6592_v37, %v6313_v39  ;;  %v6865_v11 = vpop.permute.xlu0 %162 }
  0xaf   :  { %8492 = vst [vmem:[#allocation90_spill] sm:$0xff] %v6587_v1  ;;  %8493 = vst [vmem:[#allocation91_spill] sm:$0xff] %v6596_v0  ;;  %v6608_v1 = vmul.f32 %v6555_v2, %v6193_v4  ;;  %v6620_v0 = vmul.f32 %v6555_v2, %v6127_v51  ;;  %v6657_v33 = vmul.f32 %v6592_v37, %v6127_v51 }
  0xb0   :  { %8494 = vst [vmem:[#allocation92_spill] sm:$0xff] %v6600_v43  ;;  %8495 = vst [vmem:[#allocation93_spill] sm:$0xff] %v6604_v7  ;;  %v6624_v43 = vmul.f32 %v6555_v2, %v6311_v38  ;;  %v6628_v7 = vmul.f32 %v6555_v2, %v6191_v3 }
  0xb1   :  { %8496 = vst [vmem:[#allocation94_spill] sm:$0xff] %v6608_v1  ;;  %8497 = vst [vmem:[#allocation95_spill] sm:$0xff] %v6616_v34  ;;  %v6633_v1 = vld [vmem:[%s8404_s0 + $0xf] ss:$0 sm:$0xff]  ;;  %v6637_v34 = vmul.f32 %v6592_v37, %v6253_v20 }
  0xb2   :  { %8498 = vst [vmem:[#allocation96_spill] sm:$0xff] %v6620_v0  ;;  %8499 = vst [vmem:[#allocation97_spill] sm:$0xff] %v6624_v43  ;;  %v6641_v0 = vmul.f32 %v6592_v37, %v6129_v52  ;;  %v6645_v43 = vmul.f32 %v6592_v37, %v6251_v19 }
  0xb3   :  { %8500 = vst [vmem:[#allocation98_spill] sm:$0xff] %v6628_v7  ;;  %8501 = vst [vmem:[#allocation99_spill] sm:$0xff] %v6637_v34  ;;  %v6649_v7 = vmul.f32 %v6592_v37, %v6193_v4  ;;  %v6661_v34 = vmul.f32 %v6592_v37, %v6311_v38 }
  0xb4   :  { %8502 = vst [vmem:[#allocation100_spill] sm:$0xff] %v6641_v0  ;;  %8503 = vst [vmem:[#allocation101_spill] sm:$0xff] %v6645_v43  ;;  %v6665_v0 = vmul.f32 %v6592_v37, %v6191_v3  ;;  %v6669_v43 = vmul.f32 %v6633_v1, %v6253_v20 }
  0xb5   :  { %8504 = vst [vmem:[#allocation102_spill] sm:$0xff] %v6649_v7  ;;  %8505 = vst [vmem:[#allocation103_spill] sm:$0xff] %v6653_v63  ;;  %v6673_v7 = vmul.f32 %v6633_v1, %v6129_v52  ;;  %v6677_v63 = vmul.f32 %v6633_v1, %v6251_v19 }
  0xb6   :  { %8506 = vst [vmem:[#allocation104_spill] sm:$0xff] %v6657_v33  ;;  %8507 = vst [vmem:[#allocation105_spill] sm:$0xff] %v6661_v34  ;;  %v6681_v33 = vmul.f32 %v6633_v1, %v6193_v4  ;;  %v6683_v34 = vpop.permute.xlu1 %137 }
  0xb7   :  { %8508 = vst [vmem:[#allocation106_spill] sm:$0xff] %v6665_v0  ;;  %8509 = vst [vmem:[#allocation107_spill] sm:$0xff] %v6669_v43  ;;  %v6689_v0 = vmul.f32 %v6633_v1, %v6313_v39  ;;  %v6693_v43 = vmul.f32 %v6633_v1, %v6127_v51  ;;  %v6709_v8 = vmul.f32 %v6115_v48, %v6683_v34 }
  0xb8   :  { %8510 = vst [vmem:[#allocation108_spill] sm:$0xff] %v6673_v7  ;;  %8511 = vst [vmem:[#allocation109_spill] sm:$0xff] %v6677_v63  ;;  %v6697_v7 = vmul.f32 %v6633_v1, %v6311_v38  ;;  %v6701_v63 = vmul.f32 %v6633_v1, %v6191_v3  ;;  %v6733_v24 = vmul.f32 %v6134_v53, %v6683_v34 }
  0xb9   :  { %8512 = vst [vmem:[#allocation110_spill] sm:$0xff] %v6681_v33  ;;  %8513 = vst [vmem:[#allocation111_spill] sm:$0xff] %v6689_v0  ;;  %v6705_v33 = vmul.f32 %v6115_v48, %v6685_v14  ;;  %v6713_v0 = vmul.f32 %v6120_v49, %v6685_v14  ;;  %v6741_v31 = vmul.f32 %v6139_v54, %v6683_v34 }
  0xba   :  { %8514 = vst [vmem:[#allocation112_spill] sm:$0xff] %v6693_v43  ;;  %8515 = vst [vmem:[#allocation113_spill] sm:$0xff] %v6697_v7  ;;  %v6717_v43 = vmul.f32 %v6120_v49, %v6683_v34  ;;  %v6721_v7 = vmul.f32 %v6125_v50, %v6685_v14 }
  0xbb   :  { %8516 = vst [vmem:[#allocation114_spill] sm:$0xff] %v6701_v63  ;;  %8517 = vst [vmem:[#allocation115_spill] sm:$0xff] %v6713_v0  ;;  %v6725_v63 = vmul.f32 %v6125_v50, %v6683_v34 }
  0xbc   :  { %8518 = vst [vmem:[#allocation116_spill] sm:$0xff] %v6717_v43  ;;  %8519 = vst [vmem:[#allocation117_spill] sm:$0xff] %v6721_v7  ;;  %v6743_v7 = vpop.permute.xlu1 %157  ;;  %v6789_v43 = vmul.f32 %v6134_v53, %v6745_v61 }
  0xbd   :  { %8520 = vst [vmem:[#allocation118_spill] sm:$0xff] %v6725_v63  ;;  %8521 = vst [vmem:[#allocation119_spill] sm:$0xff] %v6729_v62  ;;  %v6749_v63 = vmul.f32 %v6152_v57, %v6685_v14  ;;  %v6753_v62 = vmul.f32 %v6152_v57, %v6683_v34  ;;  %v6769_v30 = vmul.f32 %v6115_v48, %v6743_v7 }
  0xbe   :  { %8522 = vst [vmem:[#allocation120_spill] sm:$0xff] %v6733_v24  ;;  %8523 = vst [vmem:[#allocation121_spill] sm:$0xff] %v6737_v13  ;;  %v6757_v24 = vmul.f32 %v6157_v58, %v6685_v14  ;;  %v6761_v13 = vmul.f32 %v6157_v58, %v6683_v34  ;;  %v6793_v0 = vmul.f32 %v6134_v53, %v6743_v7 }
  0xbf   :  { %8524 = vst [vmem:[#allocation122_spill] sm:$0xff] %v6741_v31  ;;  %8525 = vst [vmem:[#allocation123_spill] sm:$0xff] %v6749_v63  ;;  %v6765_v31 = vmul.f32 %v6115_v48, %v6745_v61  ;;  %v6773_v63 = vmul.f32 %v6120_v49, %v6745_v61 }
  0xc0   :  { %8526 = vst [vmem:[#allocation124_spill] sm:$0xff] %v6753_v62  ;;  %8527 = vst [vmem:[#allocation125_spill] sm:$0xff] %v6757_v24  ;;  %v6777_v62 = vmul.f32 %v6120_v49, %v6743_v7  ;;  %v6781_v24 = vmul.f32 %v6125_v50, %v6745_v61 }
  0xc1   :  { %8528 = vst [vmem:[#allocation126_spill] sm:$0xff] %v6761_v13  ;;  %8529 = vst [vmem:[#allocation127_spill] sm:$0xff] %v6773_v63  ;;  %v6785_v13 = vmul.f32 %v6125_v50, %v6743_v7  ;;  %v6797_v63 = vmul.f32 %v6139_v54, %v6745_v61 }
  0xc2   :  { %8530 = vst [vmem:[#allocation128_spill] sm:$0xff] %v6777_v62  ;;  %8531 = vst [vmem:[#allocation129_spill] sm:$0xff] %v6781_v24  ;;  %v6801_v62 = vmul.f32 %v6139_v54, %v6743_v7  ;;  %v6803_v24 = vpop.permute.xlu1 %147 }
  0xc3   :  { %8532 = vst [vmem:[#allocation130_spill] sm:$0xff] %v6785_v13  ;;  %8533 = vst [vmem:[#allocation131_spill] sm:$0xff] %v6789_v43  ;;  %v6809_v13 = vmul.f32 %v6152_v57, %v6745_v61  ;;  %v6813_v43 = vmul.f32 %v6152_v57, %v6743_v7  ;;  %v6829_v47 = vmul.f32 %v6115_v48, %v6803_v24 }
  0xc4   :  { %8534 = vst [vmem:[#allocation132_spill] sm:$0xff] %v6793_v0  ;;  %8535 = vst [vmem:[#allocation133_spill] sm:$0xff] %v6797_v63  ;;  %v6817_v0 = vmul.f32 %v6157_v58, %v6745_v61  ;;  %v6821_v63 = vmul.f32 %v6157_v58, %v6743_v7  ;;  %v6853_v46 = vmul.f32 %v6134_v53, %v6803_v24 }
  0xc5   :  { %8536 = vst [vmem:[#allocation134_spill] sm:$0xff] %v6801_v62  ;;  %8537 = vst [vmem:[#allocation135_spill] sm:$0xff] %v6809_v13  ;;  %v6825_v62 = vmul.f32 %v6115_v48, %v6805_v12  ;;  %v6833_v13 = vmul.f32 %v6120_v49, %v6805_v12 }
  0xc6   :  { %8538 = vst [vmem:[#allocation136_spill] sm:$0xff] %v6813_v43  ;;  %8539 = vst [vmem:[#allocation137_spill] sm:$0xff] %v6817_v0  ;;  %v6837_v43 = vmul.f32 %v6120_v49, %v6803_v24  ;;  %v6841_v0 = vmul.f32 %v6125_v50, %v6805_v12 }
  0xc7   :  { %8540 = vst [vmem:[#allocation138_spill] sm:$0xff] %v6821_v63  ;;  %8541 = vst [vmem:[#allocation139_spill] sm:$0xff] %v6833_v13  ;;  %v6845_v63 = vmul.f32 %v6125_v50, %v6803_v24  ;;  %v6857_v13 = vmul.f32 %v6139_v54, %v6805_v12 }
  0xc8   :  { %8542 = vst [vmem:[#allocation140_spill] sm:$0xff] %v6837_v43  ;;  %8543 = vst [vmem:[#allocation141_spill] sm:$0xff] %v6841_v0  ;;  %v6861_v43 = vmul.f32 %v6139_v54, %v6803_v24  ;;  %v6863_v0 = vpop.permute.xlu1 %167 }
  0xc9   :  { %8544 = vst [vmem:[#allocation142_spill] sm:$0xff] %v6845_v63  ;;  %8545 = vst [vmem:[#allocation143_spill] sm:$0xff] %v6849_v60  ;;  %v6869_v63 = vmul.f32 %v6152_v57, %v6805_v12  ;;  %v6873_v60 = vmul.f32 %v6152_v57, %v6803_v24  ;;  %v6889_v28 = vmul.f32 %v6115_v48, %v6863_v0 }
  0xca   :  { %8546 = vst [vmem:[#allocation144_spill] sm:$0xff] %v6853_v46  ;;  %8547 = vst [vmem:[#allocation145_spill] sm:$0xff] %v6857_v13  ;;  %v6877_v46 = vmul.f32 %v6157_v58, %v6805_v12  ;;  %v6881_v13 = vmul.f32 %v6157_v58, %v6803_v24  ;;  %v6913_v59 = vmul.f32 %v6134_v53, %v6863_v0 }
  0xcb   :  { %8548 = vst [vmem:[#allocation146_spill] sm:$0xff] %v6861_v43  ;;  %8549 = vst [vmem:[#allocation147_spill] sm:$0xff] %v6869_v63  ;;  %v6885_v43 = vmul.f32 %v6115_v48, %v6865_v11  ;;  %v6893_v63 = vmul.f32 %v6120_v49, %v6865_v11  ;;  %v6909_v48 = vmul.f32 %v6134_v53, %v6865_v11 }
  0xcc   :  { %8550 = vst [vmem:[#allocation148_spill] sm:$0xff] %v6873_v60  ;;  %8551 = vst [vmem:[#allocation149_spill] sm:$0xff] %v6877_v46  ;;  %v6897_v60 = vmul.f32 %v6120_v49, %v6863_v0  ;;  %v6901_v46 = vmul.f32 %v6125_v50, %v6865_v11  ;;  %v6917_v49 = vmul.f32 %v6139_v54, %v6865_v11 }
  0xcd   :  { %8552 = vst [vmem:[#allocation150_spill] sm:$0xff] %v6881_v13  ;;  %v6905_v13 = vmul.f32 %v6125_v50, %v6863_v0  ;;  %8555 = vst [vmem:[#allocation153_spill] sm:$0xff] %v6913_v59  ;;  %v6925_v50 = vmul.f32 %v6152_v57, %v6865_v11  ;;  %v6933_v53 = vmul.f32 %v6157_v58, %v6865_v11 }
  0xce   :  { %8553 = vst [vmem:[#allocation151_spill] sm:$0xff] %v6897_v60  ;;  %8556 = vst [vmem:[#allocation154_spill] sm:$0xff] %v6917_v49  ;;  %v6921_v60 = vmul.f32 %v6139_v54, %v6863_v0  ;;  %v6937_v59 = vmul.f32 %v6157_v58, %v6863_v0  ;;  %v6941_v54 = vmul.f32 %v6358_v23, %v6805_v12 }
  0xcf   :  { %8554 = vst [vmem:[#allocation152_spill] sm:$0xff] %v6905_v13  ;;  %8558 = vst [vmem:[#allocation156_spill] sm:$0xff] %v6925_v50  ;;  %v6929_v13 = vmul.f32 %v6152_v57, %v6863_v0  ;;  %v6949_v57 = vmul.f32 %v6358_v23, %v6803_v24  ;;  %v6957_v58 = vmul.f32 %v6358_v23, %v6865_v11  ;;  %v7212_v50 = vpop.permute.xlu0 %394 }
  0xd0   :  { %8557 = vst [vmem:[#allocation155_spill] sm:$0xff] %v6921_v60  ;;  %8560 = vst [vmem:[#allocation158_spill] sm:$0xff] %v6933_v53  ;;  %v6945_v60 = vmul.f32 %v6358_v23, %v6685_v14 }
  0xd1   :  { %8559 = vst [vmem:[#allocation157_spill] sm:$0xff] %v6929_v13  ;;  %8561 = vst [vmem:[#allocation159_spill] sm:$0xff] %v6937_v59  ;;  %v6953_v13 = vmul.f32 %v6358_v23, %v6683_v34  ;;  %v6961_v59 = vmul.f32 %v6358_v23, %v6745_v61 }
  0xd2   :  { %8562 = vst [vmem:[#allocation160_spill] sm:$0xff] %v6941_v54  ;;  %8563 = vst [vmem:[#allocation161_spill] sm:$0xff] %v6945_v60  ;;  %v6965_v54 = vmul.f32 %v6358_v23, %v6863_v0  ;;  %v6969_v60 = vmul.f32 %v6358_v23, %v6743_v7  ;;  %v6989_v23 = vmul.f32 %v6399_v22, %v6865_v11 }
  0xd3   :  { %8564 = vst [vmem:[#allocation162_spill] sm:$0xff] %v6949_v57  ;;  %8565 = vst [vmem:[#allocation163_spill] sm:$0xff] %v6953_v13  ;;  %v6973_v57 = vmul.f32 %v6399_v22, %v6805_v12  ;;  %v6977_v13 = vmul.f32 %v6399_v22, %v6685_v14 }
  0xd4   :  { %8566 = vst [vmem:[#allocation164_spill] sm:$0xff] %v6957_v58  ;;  %8567 = vst [vmem:[#allocation165_spill] sm:$0xff] %v6961_v59  ;;  %v6981_v58 = vmul.f32 %v6399_v22, %v6803_v24  ;;  %v6985_v59 = vmul.f32 %v6399_v22, %v6683_v34 }
  0xd5   :  { %8568 = vst [vmem:[#allocation166_spill] sm:$0xff] %v6965_v54  ;;  %8569 = vst [vmem:[#allocation167_spill] sm:$0xff] %v6969_v60  ;;  %v6993_v60 = vmul.f32 %v6399_v22, %v6745_v61 }
  0xd6   :  { %8570 = vst [vmem:[#allocation168_spill] sm:$0xff] %v6973_v57  ;;  %8571 = vst [vmem:[#allocation169_spill] sm:$0xff] %v6977_v13  ;;  %v6997_v57 = vmul.f32 %v6399_v22, %v6863_v0  ;;  %v7001_v13 = vmul.f32 %v6399_v22, %v6743_v7  ;;  %v7021_v22 = vmul.f32 %v6436_v18, %v6865_v11 }
  0xd7   :  { %8572 = vst [vmem:[#allocation170_spill] sm:$0xff] %v6981_v58  ;;  %8573 = vst [vmem:[#allocation171_spill] sm:$0xff] %v6985_v59  ;;  %v7005_v58 = vmul.f32 %v6436_v18, %v6805_v12  ;;  %v7009_v59 = vmul.f32 %v6436_v18, %v6685_v14 }
  0xd8   :  { %8574 = vst [vmem:[#allocation172_spill] sm:$0xff] %v6989_v23  ;;  %8575 = vst [vmem:[#allocation173_spill] sm:$0xff] %v6993_v60  ;;  %v7013_v23 = vmul.f32 %v6436_v18, %v6803_v24  ;;  %v7017_v60 = vmul.f32 %v6436_v18, %v6683_v34 }
  0xd9   :  { %8576 = vst [vmem:[#allocation174_spill] sm:$0xff] %v6997_v57  ;;  %8577 = vst [vmem:[#allocation175_spill] sm:$0xff] %v7001_v13  ;;  %v7025_v13 = vmul.f32 %v6436_v18, %v6745_v61 }
  0xda   :  { %8578 = vst [vmem:[#allocation176_spill] sm:$0xff] %v7005_v58  ;;  %8579 = vst [vmem:[#allocation177_spill] sm:$0xff] %v7009_v59  ;;  %v7029_v58 = vmul.f32 %v6436_v18, %v6863_v0  ;;  %v7033_v59 = vmul.f32 %v6436_v18, %v6743_v7  ;;  %v7053_v18 = vmul.f32 %v6477_v5, %v6865_v11 }
  0xdb   :  { %8580 = vst [vmem:[#allocation178_spill] sm:$0xff] %v7013_v23  ;;  %8581 = vst [vmem:[#allocation179_spill] sm:$0xff] %v7017_v60  ;;  %v7037_v23 = vmul.f32 %v6477_v5, %v6805_v12  ;;  %v7041_v60 = vmul.f32 %v6477_v5, %v6685_v14 }
  0xdc   :  { %8582 = vst [vmem:[#allocation180_spill] sm:$0xff] %v7021_v22  ;;  %8583 = vst [vmem:[#allocation181_spill] sm:$0xff] %v7025_v13  ;;  %v7045_v22 = vmul.f32 %v6477_v5, %v6803_v24  ;;  %v7049_v13 = vmul.f32 %v6477_v5, %v6683_v34 }
  0xdd   :  { %8584 = vst [vmem:[#allocation182_spill] sm:$0xff] %v7029_v58  ;;  %8585 = vst [vmem:[#allocation183_spill] sm:$0xff] %v7033_v59  ;;  %v7057_v59 = vmul.f32 %v6477_v5, %v6745_v61 }
  0xde   :  { %8586 = vst [vmem:[#allocation184_spill] sm:$0xff] %v7037_v23  ;;  %8587 = vst [vmem:[#allocation185_spill] sm:$0xff] %v7041_v60  ;;  %v7061_v23 = vmul.f32 %v6477_v5, %v6863_v0  ;;  %v7065_v60 = vmul.f32 %v6477_v5, %v6743_v7  ;;  %v7085_v5 = vmul.f32 %v6514_v41, %v6865_v11 }
  0xdf   :  { %8588 = vst [vmem:[#allocation186_spill] sm:$0xff] %v7045_v22  ;;  %8589 = vst [vmem:[#allocation187_spill] sm:$0xff] %v7049_v13  ;;  %v7069_v22 = vmul.f32 %v6514_v41, %v6805_v12  ;;  %v7073_v13 = vmul.f32 %v6514_v41, %v6685_v14 }
  0xe0   :  { %8590 = vst [vmem:[#allocation188_spill] sm:$0xff] %v7053_v18  ;;  %8591 = vst [vmem:[#allocation189_spill] sm:$0xff] %v7057_v59  ;;  %v7077_v18 = vmul.f32 %v6514_v41, %v6803_v24  ;;  %v7081_v59 = vmul.f32 %v6514_v41, %v6683_v34 }
  0xe1   :  { %8592 = vst [vmem:[#allocation190_spill] sm:$0xff] %v7061_v23  ;;  %8593 = vst [vmem:[#allocation191_spill] sm:$0xff] %v7065_v60  ;;  %v7089_v60 = vmul.f32 %v6514_v41, %v6745_v61 }
  0xe2   :  { %8594 = vst [vmem:[#allocation192_spill] sm:$0xff] %v7069_v22  ;;  %8595 = vst [vmem:[#allocation193_spill] sm:$0xff] %v7073_v13  ;;  %v7093_v22 = vmul.f32 %v6514_v41, %v6863_v0  ;;  %v7097_v13 = vmul.f32 %v6514_v41, %v6743_v7  ;;  %v7117_v41 = vmul.f32 %v6555_v2, %v6865_v11 }
  0xe3   :  { %8596 = vst [vmem:[#allocation194_spill] sm:$0xff] %v7077_v18  ;;  %8597 = vst [vmem:[#allocation195_spill] sm:$0xff] %v7081_v59  ;;  %v7101_v18 = vmul.f32 %v6555_v2, %v6805_v12  ;;  %v7105_v59 = vmul.f32 %v6555_v2, %v6685_v14 }
  0xe4   :  { %8598 = vst [vmem:[#allocation196_spill] sm:$0xff] %v7085_v5  ;;  %8599 = vst [vmem:[#allocation197_spill] sm:$0xff] %v7089_v60  ;;  %v7109_v5 = vmul.f32 %v6555_v2, %v6803_v24  ;;  %v7113_v60 = vmul.f32 %v6555_v2, %v6683_v34 }
  0xe5   :  { %8600 = vst [vmem:[#allocation198_spill] sm:$0xff] %v7093_v22  ;;  %8601 = vst [vmem:[#allocation199_spill] sm:$0xff] %v7097_v13  ;;  %v7121_v13 = vmul.f32 %v6555_v2, %v6745_v61 }
  0xe6   :  { %8602 = vst [vmem:[#allocation200_spill] sm:$0xff] %v7101_v18  ;;  %8603 = vst [vmem:[#allocation201_spill] sm:$0xff] %v7105_v59  ;;  %v7125_v18 = vmul.f32 %v6555_v2, %v6863_v0  ;;  %v7129_v59 = vmul.f32 %v6555_v2, %v6743_v7  ;;  %v7149_v2 = vmul.f32 %v6592_v37, %v6865_v11 }
  0xe7   :  { %8604 = vst [vmem:[#allocation202_spill] sm:$0xff] %v7109_v5  ;;  %8605 = vst [vmem:[#allocation203_spill] sm:$0xff] %v7113_v60  ;;  %v7133_v5 = vmul.f32 %v6592_v37, %v6805_v12  ;;  %v7137_v60 = vmul.f32 %v6592_v37, %v6685_v14 }
  0xe8   :  { %8606 = vst [vmem:[#allocation204_spill] sm:$0xff] %v7117_v41  ;;  %8607 = vst [vmem:[#allocation205_spill] sm:$0xff] %v7121_v13  ;;  %v7141_v41 = vmul.f32 %v6592_v37, %v6803_v24  ;;  %v7145_v13 = vmul.f32 %v6592_v37, %v6683_v34 }
  0xe9   :  { %8608 = vst [vmem:[#allocation206_spill] sm:$0xff] %v7125_v18  ;;  %8609 = vst [vmem:[#allocation207_spill] sm:$0xff] %v7129_v59  ;;  %v7153_v59 = vmul.f32 %v6592_v37, %v6745_v61 }
  0xea   :  { %8610 = vst [vmem:[#allocation208_spill] sm:$0xff] %v7133_v5  ;;  %8611 = vst [vmem:[#allocation209_spill] sm:$0xff] %v7137_v60  ;;  %v7157_v5 = vmul.f32 %v6592_v37, %v6863_v0  ;;  %v7161_v60 = vmul.f32 %v6592_v37, %v6743_v7  ;;  %v7181_v37 = vmul.f32 %v6633_v1, %v6865_v11 }
  0xeb   :  { %8612 = vst [vmem:[#allocation210_spill] sm:$0xff] %v7141_v41  ;;  %8613 = vst [vmem:[#allocation211_spill] sm:$0xff] %v7145_v13  ;;  %v7165_v41 = vmul.f32 %v6633_v1, %v6805_v12  ;;  %v7169_v13 = vmul.f32 %v6633_v1, %v6685_v14 }
  0xec   :  { %8614 = vst [vmem:[#allocation212_spill] sm:$0xff] %v7149_v2  ;;  %8615 = vst [vmem:[#allocation213_spill] sm:$0xff] %v7153_v59  ;;  %v7173_v2 = vmul.f32 %v6633_v1, %v6803_v24  ;;  %v7177_v59 = vmul.f32 %v6633_v1, %v6683_v34 }
  0xed   :  { %8616 = vst [vmem:[#allocation214_spill] sm:$0xff] %v7157_v5  ;;  %8617 = vst [vmem:[#allocation215_spill] sm:$0xff] %v7161_v60  ;;  %v7185_v60 = vmul.f32 %v6633_v1, %v6745_v61 }
  0xee   :  { %8618 = vst [vmem:[#allocation216_spill] sm:$0xff] %v7165_v41  ;;  %8619 = vst [vmem:[#allocation217_spill] sm:$0xff] %v7169_v13  ;;  %v7189_v41 = vmul.f32 %v6633_v1, %v6863_v0  ;;  %v7193_v13 = vmul.f32 %v6633_v1, %v6743_v7 }
  0xef   :  { %8620 = vst [vmem:[#allocation218_spill] sm:$0xff] %v7173_v2  ;;  %8621 = vst [vmem:[#allocation219_spill] sm:$0xff] %v7177_v59  ;;  %v7198_v59 = vld [vmem:[%s8404_s0] ss:$0 sm:$0xff]  ;;  %v4551_v2 = vpop.f32.mrb[0].mxu0 }
  0xf0   :  { %8622 = vst [vmem:[#allocation220_spill] sm:$0xff] %v7181_v37  ;;  %8623 = vst [vmem:[#allocation221_spill] sm:$0xff] %v7185_v60  ;;  %v176_v37 = vmul.f32 %v7198_v59, %v6253_v20  ;;  %v174_v60 = vmul.f32 %v7198_v59, %v6129_v52  ;;  %v289_v18 = vpop.f32.mrb[1].mxu0 }
  0xf1   :  { %8624 = vst [vmem:[#allocation222_spill] sm:$0xff] %v7189_v41  ;;  %8625 = vst [vmem:[#allocation223_spill] sm:$0xff] %v7193_v13  ;;  %v177_v41 = vmul.f32 %v7198_v59, %v6251_v19  ;;  %v4552_v1 = vpop.f32.mrb[2].mxu0  ;;  %v175_v13 = vmul.f32 %v7198_v59, %v6193_v4  ;;  %v180_v4 = vmul.f32 %v7198_v59, %v6313_v39 }
  0xf2   :  { %v298_v5 = vadd.f32 %v4551_v2, %v176_v37  ;;  %v290_v22 = vadd.f32 %v289_v18, %v174_v60  ;;  %v292_v57 = vpop.f32.mrb[3].mxu0  ;;  %v179_v39 = vmul.f32 %v7198_v59, %v6191_v3  ;;  %v184_v3 = vmul.f32 %v7198_v59, %v6805_v12 }
  0xf3   :  { %v301_v58 = vadd.f32 %v4552_v1, %v177_v41  ;;  %v293_v54 = vadd.f32 %v292_v57, %v175_v13  ;;  %v4555_v18 = vpop.f32.mrb[4].mxu0  ;;  %v7218_v13 = vpop.permute.xlu1 %399  ;;  %v183_v12 = vmul.f32 %v7198_v59, %v6683_v34 }
  0xf4   :  { %v434_v23 = vadd.f32 %v6534_v16, %v298_v5  ;;  %v432_v20 = vadd.f32 %v6378_v21, %v290_v22  ;;  %v178_v22 = vmul.f32 %v7198_v59, %v6127_v51  ;;  %v314_v57 = vadd.f32 %v4555_v18, %v180_v4 }
  0xf5   :  { %v435_v52 = vadd.f32 %v6532_v42, %v301_v58  ;;  %v433_v37 = vadd.f32 %v6376_v6, %v293_v54  ;;  %v305_v58 = vpop.f32.mrb[5].mxu0  ;;  %v181_v54 = vmul.f32 %v7198_v59, %v6311_v38 }
  0xf6   :  { %v4060_v53 = vmul.f32 -1.442695, %v434_v23  ;;  %v4058_v2 = vmul.f32 -1.442695, %v432_v20  ;;  %v4556_v23 = vpop.f32.mrb[6].mxu0  ;;  %v438_v5 = vadd.f32 %v6612_v15, %v314_v57  ;;  %v182_v57 = vmul.f32 %v7198_v59, %v6685_v14 }
  0xf7   :  { %v4061_v60 = vmul.f32 -1.442695, %v435_v52  ;;  %v4059_v19 = vmul.f32 -1.442695, %v433_v37  ;;  %v317_v41 = vadd.f32 %v4556_v23, %v181_v54  ;;  %v308_v1 = vpop.f32.mrb[7].mxu0  ;;  %v7226_v52 = vpop.permute.xlu0 %414  ;;  %v185_v23 = vmul.f32 %v7198_v59, %v6803_v24 }
  0xf8   :  { %4877 = vpow2.f32 %v4060_v53  ;;  %v306_v53 = vadd.f32 %v305_v58, %v178_v22  ;;  %v309_v20 = vadd.f32 %v308_v1, %v179_v39  ;;  %v7230_v4 = vpop.permute.xlu1 %419  ;;  %v4559_v22 = vpop.f32.mrb[8].mxu0 }
  0xf9   :  { %4879 = vpow2.f32 %v4058_v2  ;;  %v4064_v2 = vmul.f32 -1.442695, %v438_v5  ;;  %v439_v37 = vadd.f32 %v6610_v36, %v317_v41  ;;  %v330_v54 = vadd.f32 %v4559_v22, %v184_v3 }
  0xfa   :  { %4881 = vpow2.f32 %v4061_v60  ;;  %v436_v51 = vadd.f32 %v6456_v17, %v306_v53  ;;  %v437_v38 = vadd.f32 %v6454_v40, %v309_v20  ;;  %v321_v53 = vpop.f32.mrb[9].mxu0 }
  0xfb   :  { %4883 = vpow2.f32 %v4059_v19  ;;  %v4065_v19 = vmul.f32 -1.442695, %v439_v37  ;;  %v322_v41 = vadd.f32 %v321_v53, %v182_v57  ;;  %v4560_v1 = vpop.f32.mrb[10].mxu0  ;;  %v7240_v20 = vpop.permute.xlu0 %404 }
  0xfc   :  { %v4062_v60 = vmul.f32 -1.442695, %v436_v51  ;;  %4885 = vpow2.f32 %v4064_v2  ;;  %v4063_v18 = vmul.f32 -1.442695, %v437_v38  ;;  %v333_v14 = vadd.f32 %v4560_v1, %v185_v23  ;;  %v324_v37 = vpop.f32.mrb[11].mxu0  ;;  %v7243_v3 = vpop.permute.xlu1 %409 }
  0xfd   :  { %v325_v24 = vadd.f32 %v324_v37, %v183_v12  ;;  %v440_v22 = vadd.f32 %v7212_v50, %v322_v41  ;;  %v189_v41 = vmul.f32 %v7198_v59, %v6863_v0 }
  0xfe   :  { %4887 = vpow2.f32 %v4062_v60  ;;  %v443_v34 = vadd.f32 %v7243_v3, %v333_v14  ;;  %v4563_v53 = vpop.f32.mrb[12].mxu0 }
  0xff   :  { %4889 = vpow2.f32 %v4065_v19  ;;  %v442_v19 = vadd.f32 %v7240_v20, %v330_v54  ;;  %v441_v57 = vadd.f32 %v7218_v13, %v325_v24  ;;  %v186_v54 = vmul.f32 %v7198_v59, %v6745_v61  ;;  %v7254_v12 = vpop.permute.xlu0 %424 }
 0x100   :  { %4891 = vpow2.f32 %v4063_v18 }
 0x102   :  { %v4878_v58 = vpop.eup %4877 }
 0x103   :  { %v4880_v39 = vpop.eup %4879  ;;  %v486_v5 = vadd.f32 1.0, %v4878_v58  ;;  %v188_v58 = vmul.f32 %v7198_v59, %v6865_v11  ;;  %v187_v11 = vmul.f32 %v7198_v59, %v6743_v7 }
 0x104   :  { %v4882_v51 = vpop.eup %4881  ;;  %v484_v2 = vadd.f32 1.0, %v4880_v39 }
 0x105   :  { %v4884_v60 = vpop.eup %4883  ;;  %4893 = vrcp.f32 %v486_v5  ;;  %v487_v38 = vadd.f32 1.0, %v4882_v51  ;;  %v346_v39 = vadd.f32 %v4563_v53, %v188_v58  ;;  %v337_v5 = vpop.f32.mrb[13].mxu0 }
 0x106   :  { %4895 = vrcp.f32 %v484_v2  ;;  %v485_v18 = vadd.f32 1.0, %v4884_v60  ;;  %v4886_v23 = vpop.eup %4885  ;;  %v338_v2 = vadd.f32 %v337_v5, %v186_v54  ;;  %v4564_v14 = vpop.f32.mrb[14].mxu0 }
 0x107   :  { %4897 = vrcp.f32 %v487_v38  ;;  %v490_v51 = vadd.f32 1.0, %v4886_v23  ;;  %v446_v61 = vadd.f32 %v7254_v12, %v346_v39  ;;  %v349_v38 = vadd.f32 %v4564_v14, %v189_v41 }
 0x108   :  { %4899 = vrcp.f32 %v485_v18  ;;  %v4888_v1 = vpop.eup %4887  ;;  %v7259_v18 = vpop.permute.xlu1 %429 }
 0x109   :  { %4901 = vtanh.f32 %v442_v19  ;;  %v4890_v37 = vpop.eup %4889  ;;  %v488_v60 = vadd.f32 1.0, %v4888_v1  ;;  %v340_v19 = vpop.f32.mrb[15].mxu0  ;;  %v4068_v53 = vmul.f32 -1.442695, %v446_v61  ;;  %v447_v59 = vadd.f32 %v7259_v18, %v349_v38  ;;  %v83_v38 = vld [vmem:[#allocation3] sm:$0xff] }
 0x10a   :  { %4903 = vtanh.f32 %v440_v22  ;;  %v4892_v24 = vpop.eup %4891  ;;  %v491_v0 = vadd.f32 1.0, %v4890_v37  ;;  %v444_v22 = vadd.f32 %v7226_v52, %v338_v2  ;;  %v85_v37 = vld [vmem:[#allocation3 + $0x10] sm:$0xff] }
 0x10b   :  { %4905 = vtanh.f32 %v443_v34  ;;  %v341_v34 = vadd.f32 %v340_v19, %v187_v11  ;;  %v489_v58 = vadd.f32 1.0, %v4892_v24  ;;  %v4069_v39 = vmul.f32 -1.442695, %v447_v59 }
 0x10c   :  { %4907 = vtanh.f32 %v441_v57  ;;  %v4066_v57 = vmul.f32 -1.442695, %v444_v22 }
 0x10d   :  { %4909 = vrcp.f32 %v490_v51  ;;  %v445_v54 = vadd.f32 %v7230_v4, %v341_v34 }
 0x10e   :  { %4911 = vrcp.f32 %v488_v60 }
 0x10f   :  { %v4894_v7 = vpop.eup %4893  ;;  %4913 = vrcp.f32 %v491_v0  ;;  %v4067_v41 = vmul.f32 -1.442695, %v445_v54  ;;  %v86_v0 = vld [vmem:[#allocation3 + $0x18] sm:$0xff] }
 0x110   :  { %v4896_v23 = vpop.eup %4895  ;;  %4915 = vrcp.f32 %v489_v58 }
 0x111   :  { %v4898_v5 = vpop.eup %4897  ;;  %4917 = vpow2.f32 %v4068_v53  ;;  %v84_v53 = vld [vmem:[#allocation3 + $0x8] sm:$0xff] }
 0x112   :  { %v4900_v1 = vpop.eup %4899  ;;  %4919 = vpow2.f32 %v4066_v57 }
 0x113   :  { %v4902_v51 = vpop.eup %4901  ;;  %4921 = vpow2.f32 %v4069_v39 }
 0x114   :  { %v4904_v2 = vpop.eup %4903  ;;  %v530_v14 = vmul.f32 %v4902_v51, %v4894_v7  ;;  %4923 = vpow2.f32 %v4067_v41 }
 0x115   :  { %v4906_v11 = vpop.eup %4905  ;;  %v528_v60 = vmul.f32 %v4904_v2, %v4896_v23 }
 0x116   :  { %v4908_v61 = vpop.eup %4907  ;;  %v531_v19 = vmul.f32 %v4906_v11, %v4898_v5 }
 0x117   :  { %v4910_v24 = vpop.eup %4909  ;;  %v529_v22 = vmul.f32 %v4908_v61, %v4900_v1 }
 0x118   :  { %v4912_v34 = vpop.eup %4911  ;;  %v526_v58 = vmul.f32 %v4910_v24, %v85_v37 }
 0x119   :  { %v4914_v59 = vpop.eup %4913  ;;  %v524_v54 = vmul.f32 %v4912_v34, %v83_v38 }
 0x11a   :  { %v4916_v57 = vpop.eup %4915  ;;  %v527_v49 = vmul.f32 %v4914_v59, %v86_v0  ;;  %v7264_v39 = vadd.f32 %v530_v14, %v526_v58 }
 0x11b   :  { %v4918_v7 = vpop.eup %4917  ;;  %v525_v41 = vmul.f32 %v4916_v57, %v84_v53  ;;  %v7266_v51 = vadd.f32 %v528_v60, %v524_v54 }
 0x11c   :  { %v4920_v23 = vpop.eup %4919  ;;  %v7268_v2 = vadd.f32 %v531_v19, %v527_v49  ;;  %v494_v5 = vadd.f32 1.0, %v4918_v7  ;;  %4925 = vtanh.f32 %v7264_v39 }
 0x11d   :  { %v4922_v1 = vpop.eup %4921  ;;  %v7271_v11 = vadd.f32 %v529_v22, %v525_v41  ;;  %v492_v37 = vadd.f32 1.0, %v4920_v23  ;;  %4927 = vtanh.f32 %v7266_v51  ;;  %v7279_v23 = vld [vmem:[%s8402_s3 + $0x8] sm:$0xff]  }
 0x11e   :  { %v4924_v61 = vpop.eup %4923  ;;  %4929 = vrcp.f32 %v494_v5  ;;  %v495_v14 = vadd.f32 1.0, %v4922_v1  ;;  %v7286_v5 = vld [vmem:[%s8402_s3 + $0x10] sm:$0xff]   ;;  %v7293_v1 = vld [vmem:[%s8402_s3 + $0x18] sm:$0xff]  }
 0x11f   :  { %4931 = vrcp.f32 %v492_v37  ;;  %v493_v38 = vadd.f32 1.0, %v4924_v61  ;;  %v7300_v37 = vld [vmem:[%s8402_s3 + $0x20] sm:$0xff]  }
 0x120   :  { %4933 = vrcp.f32 %v495_v14  ;;  %v7313_v61 = vld [vmem:[%s8402_s3] sm:$0xff]  }
 0x121   :  { %4935 = vrcp.f32 %v493_v38 }
 0x122   :  { %4937 = vtanh.f32 %v7271_v11 }
 0x123   :  { %4939 = vtanh.f32 %v7268_v2 }
 0x126   :  { %v4926_v49 = vpop.eup %4925 }
 0x127   :  { %v4928_v60 = vpop.eup %4927 }
 0x128   :  { %v4930_v19 = vpop.eup %4929 }
 0x129   :  { %v4932_v24 = vpop.eup %4931  ;;  %v542_v54 = vmul.f32 %v4930_v19, %v4926_v49 }
 0x12a   :  { %v4934_v0 = vpop.eup %4933  ;;  %v540_v53 = vmul.f32 %v4932_v24, %v4928_v60 }
 0x12b   :  { %v4936_v22 = vpop.eup %4935 }
 0x12c   :  { %v4938_v34 = vpop.eup %4937 }
 0x12d   :  { %v4940_v58 = vpop.eup %4939  ;;  %v541_v59 = vmul.f32 %v4938_v34, %v4936_v22 }
 0x12e   :  { %v543_v57 = vmul.f32 %v4940_v58, %v4934_v0 }
 0x12f   :  { %v545_v7 = vpack.c.bf16 %v541_v59, %v540_v53 }
 0x130   :  { %v546_v41 = vpack.c.bf16 %v543_v57, %v542_v54 }
 0x131   :  { %4565 = vmatprep.subr.bf16.mxu1 %v545_v7 }
 0x132   :  { %4566 = vmatpush3.bf16.msra.mxu1 %v545_v7 }
 0x133   :  { %4567 = vmatprep.subr.bf16.mxu1 %v546_v41 }
 0x136   :  { %4568 = vmatpush3.bf16.msra.mxu1 %v546_v41 }
 0x139   :  { %4570 = vmatmul.mubr.msk.bf16.vlgmr.msra.gmra.mrb[0].mxu1 %vm230_vm1, %v7279_v23 }
 0x13a   :  { %4573 = vmatprep.mubr.msk.bf16.mxu1 %vm230_vm1, %v7286_v5 }
 0x141   :  { %4574 = vmatmul.mubr.msk.bf16.gmra.mrb[4].mxu1 %vm230_vm1, %v7293_v1 }
 0x142   :  { %4577 = vmatprep.mubr.msk.bf16.mxu1 %vm230_vm1, %v7300_v37 }
 0x149   :  { %4578 = vmatmul.mubr.msk.bf16.gmra.mrb[8].mxu1 %vm230_vm1, %v6044_v29 }
 0x14a   :  { %4581 = vmatprep.mubr.msk.bf16.mxu1 %vm230_vm1, %v6055_v32 }
 0x151   :  { %4582 = vmatmul.mubr.msk.bf16.gmra.mrb[12].mxu1 %vm230_vm1, %v6070_v35 }
 0x152   :  { %4609 = vmatprep.mubr.msk.bf16.mxu1 %vm230_vm1, %v7313_v61 }
 0x20c   :  { %v4571_v14 = vpop.f32.mrb[0].mxu1 }
 0x20d   :  { %v610_v38 = vadd.f32 %v4571_v14, %v6273_v25  ;;  %v601_v49 = vpop.f32.mrb[1].mxu1 }
 0x20e   :  { %v602_v29 = vadd.f32 %v601_v49, %v6143_v55  ;;  %v4572_v60 = vpop.f32.mrb[2].mxu1 }
 0x20f   :  { %v666_v32 = vadd.f32 %v610_v38, %v6534_v16  ;;  %v613_v19 = vadd.f32 %v4572_v60, %v6277_v26  ;;  %v604_v35 = vpop.f32.mrb[3].mxu1 }
 0x210   :  { %v664_v24 = vadd.f32 %v602_v29, %v6378_v21  ;;  %v605_v0 = vadd.f32 %v604_v35, %v6213_v9 }
 0x211   :  { %v4081_v22 = vmul.f32 -1.442695, %v666_v32  ;;  %v667_v34 = vadd.f32 %v613_v19, %v6532_v42 }
 0x212   :  { %v4079_v58 = vmul.f32 -1.442695, %v664_v24  ;;  %v665_v53 = vadd.f32 %v605_v0, %v6376_v6 }
 0x213   :  { %4941 = vpow2.f32 %v4081_v22  ;;  %v4082_v25 = vmul.f32 -1.442695, %v667_v34 }
 0x214   :  { %4943 = vpow2.f32 %v4079_v58  ;;  %v4080_v55 = vmul.f32 -1.442695, %v665_v53  ;;  %v4575_v59 = vpop.f32.mrb[4].mxu1 }
 0x215   :  { %4945 = vpow2.f32 %v4082_v25  ;;  %v626_v54 = vadd.f32 %v4575_v59, %v6333_v44  ;;  %v617_v26 = vpop.f32.mrb[5].mxu1 }
 0x216   :  { %4947 = vpow2.f32 %v4080_v55  ;;  %v618_v57 = vadd.f32 %v617_v26, %v6147_v56  ;;  %v4576_v7 = vpop.f32.mrb[6].mxu1 }
 0x217   :  { %v670_v9 = vadd.f32 %v626_v54, %v6612_v15  ;;  %v629_v41 = vadd.f32 %v4576_v7, %v6337_v45  ;;  %v620_v14 = vpop.f32.mrb[7].mxu1 }
 0x218   :  { %v668_v38 = vadd.f32 %v618_v57, %v6456_v17  ;;  %v621_v49 = vadd.f32 %v620_v14, %v6217_v10 }
 0x219   :  { %v4085_v29 = vmul.f32 -1.442695, %v670_v9  ;;  %v671_v60 = vadd.f32 %v629_v41, %v6610_v36 }
 0x21a   :  { %v4083_v32 = vmul.f32 -1.442695, %v668_v38  ;;  %v669_v44 = vadd.f32 %v621_v49, %v6454_v40 }
 0x21b   :  { %4949 = vpow2.f32 %v4085_v29  ;;  %v4086_v19 = vmul.f32 -1.442695, %v671_v60 }
 0x21c   :  { %4951 = vpow2.f32 %v4083_v32  ;;  %v4084_v56 = vmul.f32 -1.442695, %v669_v44  ;;  %v4579_v35 = vpop.f32.mrb[8].mxu1 }
 0x21d   :  { %v4942_v24 = vpop.eup %4941  ;;  %4953 = vpow2.f32 %v4086_v19  ;;  %v642_v45 = vadd.f32 %v4579_v35, %v6825_v62  ;;  %v633_v0 = vpop.f32.mrb[9].mxu1 }
 0x21e   :  { %v4944_v22 = vpop.eup %4943  ;;  %v718_v34 = vadd.f32 1.0, %v4942_v24  ;;  %4955 = vpow2.f32 %v4084_v56  ;;  %v634_v10 = vadd.f32 %v633_v0, %v6705_v33  ;;  %v4580_v58 = vpop.f32.mrb[10].mxu1 }
 0x21f   :  { %v4946_v53 = vpop.eup %4945  ;;  %v716_v25 = vadd.f32 1.0, %v4944_v22  ;;  %v645_v55 = vadd.f32 %v4580_v58, %v6829_v47  ;;  %v636_v59 = vpop.f32.mrb[11].mxu1  ;;  %v674_v57 = vadd.f32 %v642_v45, %v7240_v20 }
 0x220   :  { %v4948_v54 = vpop.eup %4947  ;;  %4957 = vrcp.f32 %v718_v34  ;;  %v719_v26 = vadd.f32 1.0, %v4946_v53  ;;  %v637_v7 = vadd.f32 %v636_v59, %v6709_v8  ;;  %v672_v9 = vadd.f32 %v634_v10, %v7212_v50 }
 0x221   :  { %4959 = vrcp.f32 %v716_v25  ;;  %v717_v62 = vadd.f32 1.0, %v4948_v54  ;;  %v675_v33 = vadd.f32 %v645_v55, %v7243_v3 }
 0x222   :  { %4961 = vrcp.f32 %v719_v26  ;;  %v673_v41 = vadd.f32 %v637_v7, %v7218_v13 }
 0x223   :  { %4963 = vrcp.f32 %v717_v62 }
 0x224   :  { %4965 = vtanh.f32 %v674_v57  ;;  %v4583_v47 = vpop.f32.mrb[12].mxu1 }
 0x225   :  { %v4950_v14 = vpop.eup %4949  ;;  %4967 = vtanh.f32 %v672_v9  ;;  %v658_v38 = vadd.f32 %v4583_v47, %v6885_v43  ;;  %v649_v49 = vpop.f32.mrb[13].mxu1 }
 0x226   :  { %v4952_v29 = vpop.eup %4951  ;;  %v722_v60 = vadd.f32 1.0, %v4950_v14  ;;  %4969 = vtanh.f32 %v675_v33  ;;  %v650_v8 = vadd.f32 %v649_v49, %v6765_v31  ;;  %v4584_v32 = vpop.f32.mrb[14].mxu1 }
 0x227   :  { %v4954_v44 = vpop.eup %4953  ;;  %v720_v19 = vadd.f32 1.0, %v4952_v29  ;;  %4971 = vtanh.f32 %v673_v41  ;;  %v678_v56 = vadd.f32 %v658_v38, %v7254_v12  ;;  %v661_v35 = vadd.f32 %v4584_v32, %v6889_v28  ;;  %v652_v24 = vpop.f32.mrb[15].mxu1 }
 0x228   :  { %v4956_v45 = vpop.eup %4955  ;;  %4973 = vrcp.f32 %v722_v60  ;;  %v723_v0 = vadd.f32 1.0, %v4954_v44  ;;  %v676_v43 = vadd.f32 %v650_v8, %v7226_v52  ;;  %v653_v22 = vadd.f32 %v652_v24, %v6769_v30 }
 0x229   :  { %4975 = vrcp.f32 %v720_v19  ;;  %v721_v34 = vadd.f32 1.0, %v4956_v45  ;;  %v4089_v10 = vmul.f32 -1.442695, %v678_v56  ;;  %v679_v31 = vadd.f32 %v661_v35, %v7259_v18 }
 0x22a   :  { %v4958_v58 = vpop.eup %4957  ;;  %4977 = vrcp.f32 %v723_v0  ;;  %v4087_v53 = vmul.f32 -1.442695, %v676_v43  ;;  %v677_v25 = vadd.f32 %v653_v22, %v7230_v4 }
 0x22b   :  { %v4960_v55 = vpop.eup %4959  ;;  %4979 = vrcp.f32 %v721_v34  ;;  %v4090_v28 = vmul.f32 -1.442695, %v679_v31 }
 0x22c   :  { %v4962_v59 = vpop.eup %4961  ;;  %4981 = vpow2.f32 %v4089_v10  ;;  %v4088_v54 = vmul.f32 -1.442695, %v677_v25 }
 0x22d   :  { %v4964_v26 = vpop.eup %4963  ;;  %4983 = vpow2.f32 %v4087_v53 }
 0x22e   :  { %v4966_v57 = vpop.eup %4965  ;;  %4985 = vpow2.f32 %v4090_v28 }
 0x22f   :  { %v4968_v30 = vpop.eup %4967  ;;  %v762_v7 = vmul.f32 %v4966_v57, %v4958_v58  ;;  %4987 = vpow2.f32 %v4088_v54 }
 0x230   :  { %v4970_v62 = vpop.eup %4969  ;;  %v760_v9 = vmul.f32 %v4968_v30, %v4960_v55 }
 0x231   :  { %v4972_v33 = vpop.eup %4971  ;;  %v763_v41 = vmul.f32 %v4970_v62, %v4962_v59  ;;  %v7376_v62 = vld [vmem:[%s8402_s3 + $0x28] sm:$0xff]  }
 0x232   :  { %v4974_v47 = vpop.eup %4973  ;;  %v761_v14 = vmul.f32 %v4972_v33, %v4964_v26  ;;  %v7390_v33 = vld [vmem:[%s8402_s3 + $0x38] sm:$0xff]  }
 0x233   :  { %v4976_v38 = vpop.eup %4975  ;;  %v758_v49 = vmul.f32 %v4974_v47, %v7264_v39 }
 0x234   :  { %v4978_v29 = vpop.eup %4977  ;;  %v756_v60 = vmul.f32 %v4976_v38, %v7266_v51  ;;  %v8626_v38 = vld [vmem:[#allocation4_spill] sm:$0xff] }
 0x235   :  { %v4980_v8 = vpop.eup %4979  ;;  %v759_v32 = vmul.f32 %v4978_v29, %v7268_v2  ;;  %v7352_v44 = vadd.f32 %v762_v7, %v758_v49 }
 0x236   :  { %v4982_v19 = vpop.eup %4981  ;;  %v757_v56 = vmul.f32 %v4980_v8, %v7271_v11  ;;  %v7355_v35 = vadd.f32 %v760_v9, %v756_v60  ;;  %v7383_v9 = vld [vmem:[%s8402_s3 + $0x30] sm:$0xff]   ;;  %v8627_v8 = vld [vmem:[#allocation28_spill] sm:$0xff] }
 0x237   :  { %v4984_v24 = vpop.eup %4983  ;;  %v7357_v45 = vadd.f32 %v763_v41, %v759_v32  ;;  %v726_v0 = vadd.f32 1.0, %v4982_v19  ;;  %4989 = vtanh.f32 %v7352_v44 }
 0x238   :  { %v4986_v39 = vpop.eup %4985  ;;  %v7360_v43 = vadd.f32 %v761_v14, %v757_v56  ;;  %v724_v51 = vadd.f32 1.0, %v4984_v24  ;;  %4991 = vtanh.f32 %v7355_v35  ;;  %v8628_v24 = vld [vmem:[#allocation16_spill] sm:$0xff] }
 0x239   :  { %v4988_v2 = vpop.eup %4987  ;;  %4993 = vrcp.f32 %v726_v0  ;;  %v727_v22 = vadd.f32 1.0, %v4986_v39 }
 0x23a   :  { %4995 = vrcp.f32 %v724_v51  ;;  %v725_v34 = vadd.f32 1.0, %v4988_v2 }
 0x23b   :  { %4997 = vrcp.f32 %v727_v22 }
 0x23c   :  { %4999 = vrcp.f32 %v725_v34 }
 0x23d   :  { %5001 = vtanh.f32 %v7360_v43 }
 0x23e   :  { %5003 = vtanh.f32 %v7357_v45 }
 0x241   :  { %v4990_v11 = vpop.eup %4989 }
 0x242   :  { %v4992_v10 = vpop.eup %4991 }
 0x243   :  { %v4994_v31 = vpop.eup %4993 }
 0x244   :  { %v4996_v58 = vpop.eup %4995  ;;  %v774_v26 = vmul.f32 %v4994_v31, %v4990_v11 }
 0x245   :  { %v4998_v53 = vpop.eup %4997  ;;  %v772_v59 = vmul.f32 %v4996_v58, %v4992_v10  ;;  %v8629_v10 = vld [vmem:[#allocation39_spill] sm:$0xff] }
 0x246   :  { %v5000_v25 = vpop.eup %4999 }
 0x247   :  { %v5002_v55 = vpop.eup %5001 }
 0x248   :  { %v5004_v28 = vpop.eup %5003  ;;  %v773_v54 = vmul.f32 %v5002_v55, %v5000_v25 }
 0x249   :  { %v775_v57 = vmul.f32 %v5004_v28, %v4998_v53  ;;  %v8630_v53 = vld [vmem:[#allocation5_spill] sm:$0xff] }
 0x24a   :  { %v777_v30 = vpack.c.bf16 %v773_v54, %v772_v59  ;;  %v8631_v59 = vld [vmem:[#allocation40_spill] sm:$0xff] }
 0x24b   :  { %v778_v7 = vpack.c.bf16 %v775_v57, %v774_v26 }
 0x24c   :  { %4585 = vmatprep.subr.bf16.mxu0 %v777_v30 }
 0x24d   :  { %4586 = vmatpush3.bf16.msra.mxu0 %v777_v30  ;;  %v8632_v30 = vld [vmem:[#allocation17_spill] sm:$0xff] }
 0x24e   :  { %4587 = vmatprep.subr.bf16.mxu0 %v778_v7 }
 0x251   :  { %4588 = vmatpush3.bf16.msra.mxu0 %v778_v7 }
 0x254   :  { %4590 = vmatmul.mubr.msk.bf16.vlgmr.msra.gmra.mrb[16].mxu0 %vm230_vm1, %v7279_v23 }
 0x255   :  { %4593 = vmatprep.mubr.msk.bf16.mxu0 %vm230_vm1, %v7286_v5 }
 0x25c   :  { %4594 = vmatmul.mubr.msk.bf16.gmra.mrb[20].mxu0 %vm230_vm1, %v7293_v1 }
 0x25d   :  { %4597 = vmatprep.mubr.msk.bf16.mxu0 %vm230_vm1, %v7300_v37 }
 0x264   :  { %4598 = vmatmul.mubr.msk.bf16.gmra.mrb[24].mxu0 %vm230_vm1, %v7376_v62 }
 0x265   :  { %4601 = vmatprep.mubr.msk.bf16.mxu0 %vm230_vm1, %v7383_v9 }
 0x26c   :  { %4602 = vmatmul.mubr.msk.bf16.gmra.mrb[28].mxu0 %vm230_vm1, %v7390_v33 }
 0x26d   :  { %4629 = vmatprep.mubr.msk.bf16.mxu0 %vm230_vm1, %v7313_v61 }
 0x327   :  { %v4591_v41 = vpop.f32.mrb[16].mxu0 }
 0x328   :  { %v842_v47 = vadd.f32 %v4591_v41, %v6281_v27  ;;  %v833_v14 = vpop.f32.mrb[17].mxu0 }
 0x329   :  { %v834_v49 = vadd.f32 %v833_v14, %v8626_v38  ;;  %v4592_v29 = vpop.f32.mrb[18].mxu0 }
 0x32a   :  { %v898_v60 = vadd.f32 %v842_v47, %v6534_v16  ;;  %v845_v32 = vadd.f32 %v4592_v29, %v8627_v8  ;;  %v836_v19 = vpop.f32.mrb[19].mxu0 }
 0x32b   :  { %v896_v56 = vadd.f32 %v834_v49, %v6378_v21  ;;  %v837_v0 = vadd.f32 %v836_v19, %v8628_v24 }
 0x32c   :  { %v4102_v39 = vmul.f32 -1.442695, %v898_v60  ;;  %v899_v51 = vadd.f32 %v845_v32, %v6532_v42  ;;  %v8633_v32 = vld [vmem:[#allocation139_spill] sm:$0xff] }
 0x32d   :  { %v4100_v2 = vmul.f32 -1.442695, %v896_v56  ;;  %v897_v22 = vadd.f32 %v837_v0, %v6376_v6 }
 0x32e   :  { %5005 = vpow2.f32 %v4102_v39  ;;  %v4103_v27 = vmul.f32 -1.442695, %v899_v51  ;;  %v8634_v39 = vld [vmem:[#allocation115_spill] sm:$0xff] }
 0x32f   :  { %5007 = vpow2.f32 %v4100_v2  ;;  %v4101_v34 = vmul.f32 -1.442695, %v897_v22  ;;  %v4595_v11 = vpop.f32.mrb[20].mxu0 }
 0x330   :  { %5009 = vpow2.f32 %v4103_v27  ;;  %v858_v31 = vadd.f32 %v4595_v11, %v8629_v10  ;;  %v849_v58 = vpop.f32.mrb[21].mxu0 }
 0x331   :  { %5011 = vpow2.f32 %v4101_v34  ;;  %v850_v25 = vadd.f32 %v849_v58, %v8630_v53  ;;  %v4596_v55 = vpop.f32.mrb[22].mxu0  ;;  %v8635_v34 = vld [vmem:[#allocation140_spill] sm:$0xff] }
 0x332   :  { %v902_v28 = vadd.f32 %v858_v31, %v6612_v15  ;;  %v861_v54 = vadd.f32 %v4596_v55, %v8631_v59  ;;  %v852_v26 = vpop.f32.mrb[23].mxu0 }
 0x333   :  { %v900_v57 = vadd.f32 %v850_v25, %v6456_v17  ;;  %v853_v7 = vadd.f32 %v852_v26, %v8632_v30  ;;  %v8636_v25 = vld [vmem:[#allocation116_spill] sm:$0xff] }
 0x334   :  { %v4106_v41 = vmul.f32 -1.442695, %v902_v28  ;;  %v903_v47 = vadd.f32 %v861_v54, %v6610_v36 }
 0x335   :  { %v4104_v14 = vmul.f32 -1.442695, %v900_v57  ;;  %v901_v38 = vadd.f32 %v853_v7, %v6454_v40 }
 0x336   :  { %5013 = vpow2.f32 %v4106_v41  ;;  %v4107_v49 = vmul.f32 -1.442695, %v903_v47 }
 0x337   :  { %5015 = vpow2.f32 %v4104_v14  ;;  %v4105_v29 = vmul.f32 -1.442695, %v901_v38  ;;  %v4599_v60 = vpop.f32.mrb[24].mxu0  ;;  %v8637_v38 = vld [vmem:[#allocation127_spill] sm:$0xff] }
 0x338   :  { %v5006_v8 = vpop.eup %5005  ;;  %5017 = vpow2.f32 %v4107_v49  ;;  %v874_v19 = vadd.f32 %v4599_v60, %v8633_v32  ;;  %v865_v56 = vpop.f32.mrb[25].mxu0 }
 0x339   :  { %v5008_v24 = vpop.eup %5007  ;;  %v950_v0 = vadd.f32 1.0, %v5006_v8  ;;  %5019 = vpow2.f32 %v4105_v29  ;;  %v866_v51 = vadd.f32 %v865_v56, %v8634_v39  ;;  %v4600_v2 = vpop.f32.mrb[26].mxu0 }
 0x33a   :  { %v5010_v22 = vpop.eup %5009  ;;  %v948_v27 = vadd.f32 1.0, %v5008_v24  ;;  %v877_v11 = vadd.f32 %v4600_v2, %v8635_v34  ;;  %v868_v10 = vpop.f32.mrb[27].mxu0  ;;  %v906_v53 = vadd.f32 %v874_v19, %v7240_v20  ;;  %v8638_v19 = vld [vmem:[#allocation151_spill] sm:$0xff] }
 0x33b   :  { %v5012_v31 = vpop.eup %5011  ;;  %5021 = vrcp.f32 %v950_v0  ;;  %v951_v58 = vadd.f32 1.0, %v5010_v22  ;;  %v869_v55 = vadd.f32 %v868_v10, %v8636_v25  ;;  %v904_v59 = vadd.f32 %v866_v51, %v7212_v50  ;;  %v8639_v51 = vld [vmem:[#allocation128_spill] sm:$0xff] }
 0x33c   :  { %5023 = vrcp.f32 %v948_v27  ;;  %v949_v28 = vadd.f32 1.0, %v5012_v31  ;;  %v907_v54 = vadd.f32 %v877_v11, %v7243_v3 }
 0x33d   :  { %5025 = vrcp.f32 %v951_v58  ;;  %v905_v26 = vadd.f32 %v869_v55, %v7218_v13 }
 0x33e   :  { %5027 = vrcp.f32 %v949_v28 }
 0x33f   :  { %5029 = vtanh.f32 %v906_v53  ;;  %v4603_v57 = vpop.f32.mrb[28].mxu0 }
 0x340   :  { %v5014_v30 = vpop.eup %5013  ;;  %5031 = vtanh.f32 %v904_v59  ;;  %v890_v7 = vadd.f32 %v4603_v57, %v6893_v63  ;;  %v881_v41 = vpop.f32.mrb[29].mxu0 }
 0x341   :  { %v5016_v47 = vpop.eup %5015  ;;  %v954_v14 = vadd.f32 1.0, %v5014_v30  ;;  %5033 = vtanh.f32 %v907_v54  ;;  %v882_v49 = vadd.f32 %v881_v41, %v8637_v38  ;;  %v4604_v29 = vpop.f32.mrb[30].mxu0 }
 0x342   :  { %v5018_v60 = vpop.eup %5017  ;;  %v952_v8 = vadd.f32 1.0, %v5016_v47  ;;  %5035 = vtanh.f32 %v905_v26  ;;  %v910_v32 = vadd.f32 %v890_v7, %v7254_v12  ;;  %v893_v56 = vadd.f32 %v4604_v29, %v8638_v19  ;;  %v884_v24 = vpop.f32.mrb[31].mxu0 }
 0x343   :  { %v5020_v0 = vpop.eup %5019  ;;  %5037 = vrcp.f32 %v954_v14  ;;  %v955_v39 = vadd.f32 1.0, %v5018_v60  ;;  %v908_v63 = vadd.f32 %v882_v49, %v7226_v52  ;;  %v885_v2 = vadd.f32 %v884_v24, %v8639_v51 }
 0x344   :  { %5039 = vrcp.f32 %v952_v8  ;;  %v953_v22 = vadd.f32 1.0, %v5020_v0  ;;  %v4110_v27 = vmul.f32 -1.442695, %v910_v32  ;;  %v911_v34 = vadd.f32 %v893_v56, %v7259_v18 }
 0x345   :  { %v5022_v11 = vpop.eup %5021  ;;  %5041 = vrcp.f32 %v955_v39  ;;  %v4108_v10 = vmul.f32 -1.442695, %v908_v63  ;;  %v909_v31 = vadd.f32 %v885_v2, %v7230_v4 }
 0x346   :  { %v5024_v58 = vpop.eup %5023  ;;  %5043 = vrcp.f32 %v953_v22  ;;  %v4111_v53 = vmul.f32 -1.442695, %v911_v34 }
 0x347   :  { %v5026_v25 = vpop.eup %5025  ;;  %5045 = vpow2.f32 %v4110_v27  ;;  %v4109_v55 = vmul.f32 -1.442695, %v909_v31 }
 0x348   :  { %v5028_v28 = vpop.eup %5027  ;;  %5047 = vpow2.f32 %v4108_v10 }
 0x349   :  { %v5030_v59 = vpop.eup %5029  ;;  %5049 = vpow2.f32 %v4111_v53 }
 0x34a   :  { %v5032_v54 = vpop.eup %5031  ;;  %v994_v26 = vmul.f32 %v5030_v59, %v5022_v11  ;;  %5051 = vpow2.f32 %v4109_v55 }
 0x34b   :  { %v5034_v57 = vpop.eup %5033  ;;  %v992_v30 = vmul.f32 %v5032_v54, %v5024_v58 }
 0x34c   :  { %v5036_v7 = vpop.eup %5035  ;;  %v995_v41 = vmul.f32 %v5034_v57, %v5026_v25 }
 0x34d   :  { %v5038_v47 = vpop.eup %5037  ;;  %v993_v14 = vmul.f32 %v5036_v7, %v5028_v28  ;;  %v8640_v7 = vld [vmem:[#allocation29_spill] sm:$0xff] }
 0x34e   :  { %v5040_v38 = vpop.eup %5039  ;;  %v990_v49 = vmul.f32 %v5038_v47, %v7352_v44 }
 0x34f   :  { %v5042_v29 = vpop.eup %5041  ;;  %v988_v60 = vmul.f32 %v5040_v38, %v7355_v35 }
 0x350   :  { %v5044_v8 = vpop.eup %5043  ;;  %v991_v32 = vmul.f32 %v5042_v29, %v7357_v45  ;;  %v7431_v19 = vadd.f32 %v994_v26, %v990_v49 }
 0x351   :  { %v5046_v56 = vpop.eup %5045  ;;  %v989_v24 = vmul.f32 %v5044_v8, %v7360_v43  ;;  %v7434_v0 = vadd.f32 %v992_v30, %v988_v60  ;;  %v8642_v60 = vld [vmem:[#allocation30_spill] sm:$0xff] }
 0x352   :  { %v5048_v39 = vpop.eup %5047  ;;  %v7436_v63 = vadd.f32 %v995_v41, %v991_v32  ;;  %v958_v51 = vadd.f32 1.0, %v5046_v56  ;;  %5053 = vtanh.f32 %v7431_v19 }
 0x353   :  { %v5050_v44 = vpop.eup %5049  ;;  %v7439_v2 = vadd.f32 %v993_v14, %v989_v24  ;;  %v956_v35 = vadd.f32 1.0, %v5048_v39  ;;  %5055 = vtanh.f32 %v7434_v0  ;;  %v8641_v14 = vld [vmem:[#allocation6_spill] sm:$0xff] }
 0x354   :  { %v5052_v45 = vpop.eup %5051  ;;  %5057 = vrcp.f32 %v958_v51  ;;  %v959_v22 = vadd.f32 1.0, %v5050_v44  ;;  %v8643_v24 = vld [vmem:[#allocation18_spill] sm:$0xff] }
 0x355   :  { %5059 = vrcp.f32 %v956_v35  ;;  %v957_v27 = vadd.f32 1.0, %v5052_v45 }
 0x356   :  { %5061 = vrcp.f32 %v959_v22 }
 0x357   :  { %5063 = vrcp.f32 %v957_v27 }
 0x358   :  { %5065 = vtanh.f32 %v7439_v2 }
 0x359   :  { %5067 = vtanh.f32 %v7436_v63 }
 0x35c   :  { %v5054_v43 = vpop.eup %5053 }
 0x35d   :  { %v5056_v34 = vpop.eup %5055 }
 0x35e   :  { %v5058_v11 = vpop.eup %5057 }
 0x35f   :  { %v5060_v10 = vpop.eup %5059  ;;  %v1006_v59 = vmul.f32 %v5058_v11, %v5054_v43 }
 0x360   :  { %v5062_v31 = vpop.eup %5061  ;;  %v1004_v55 = vmul.f32 %v5060_v10, %v5056_v34  ;;  %v8644_v34 = vld [vmem:[#allocation41_spill] sm:$0xff] }
 0x361   :  { %v5064_v58 = vpop.eup %5063 }
 0x362   :  { %v5066_v53 = vpop.eup %5065 }
 0x363   :  { %v5068_v25 = vpop.eup %5067  ;;  %v1005_v28 = vmul.f32 %v5066_v53, %v5064_v58 }
 0x364   :  { %v1007_v54 = vmul.f32 %v5068_v25, %v5062_v31  ;;  %v8645_v31 = vld [vmem:[#allocation7_spill] sm:$0xff] }
 0x365   :  { %v1009_v26 = vpack.c.bf16 %v1005_v28, %v1004_v55  ;;  %v8646_v55 = vld [vmem:[#allocation42_spill] sm:$0xff] }
 0x366   :  { %v1010_v57 = vpack.c.bf16 %v1007_v54, %v1006_v59 }
 0x367   :  { %4605 = vmatprep.subr.bf16.mxu1 %v1009_v26 }
 0x368   :  { %4606 = vmatpush3.bf16.msra.mxu1 %v1009_v26  ;;  %v8647_v26 = vld [vmem:[#allocation19_spill] sm:$0xff] }
 0x369   :  { %4607 = vmatprep.subr.bf16.mxu1 %v1010_v57 }
 0x36c   :  { %4608 = vmatpush3.bf16.msra.mxu1 %v1010_v57 }
 0x36f   :  { %4610 = vmatmul.mubr.msk.bf16.vlgmr.msra.gmra.mrb[16].mxu1 %vm230_vm1, %v7279_v23 }
 0x370   :  { %4613 = vmatprep.mubr.msk.bf16.mxu1 %vm230_vm1, %v7286_v5 }
 0x377   :  { %4614 = vmatmul.mubr.msk.bf16.gmra.mrb[20].mxu1 %vm230_vm1, %v7293_v1 }
 0x378   :  { %4617 = vmatprep.mubr.msk.bf16.mxu1 %vm230_vm1, %v7300_v37 }
 0x37f   :  { %4618 = vmatmul.mubr.msk.bf16.gmra.mrb[24].mxu1 %vm230_vm1, %v7376_v62 }
 0x380   :  { %4621 = vmatprep.mubr.msk.bf16.mxu1 %vm230_vm1, %v7383_v9 }
 0x387   :  { %4622 = vmatmul.mubr.msk.bf16.gmra.mrb[28].mxu1 %vm230_vm1, %v7390_v33 }
 0x388   :  { %4649 = vmatprep.mubr.msk.bf16.mxu1 %vm230_vm1, %v7313_v61 }
 0x442   :  { %v4611_v30 = vpop.f32.mrb[16].mxu1 }
 0x443   :  { %v1074_v41 = vadd.f32 %v4611_v30, %v8640_v7  ;;  %v1065_v47 = vpop.f32.mrb[17].mxu1 }
 0x444   :  { %v1066_v38 = vadd.f32 %v1065_v47, %v8641_v14  ;;  %v4612_v49 = vpop.f32.mrb[18].mxu1 }
 0x445   :  { %v1130_v29 = vadd.f32 %v1074_v41, %v6534_v16  ;;  %v1077_v8 = vadd.f32 %v4612_v49, %v8642_v60  ;;  %v1068_v32 = vpop.f32.mrb[19].mxu1  ;;  %v8648_v60 = vld [vmem:[#allocation141_spill] sm:$0xff] }
 0x446   :  { %v1128_v56 = vadd.f32 %v1066_v38, %v6378_v21  ;;  %v1069_v39 = vadd.f32 %v1068_v32, %v8643_v24 }
 0x447   :  { %v4123_v51 = vmul.f32 -1.442695, %v1130_v29  ;;  %v1131_v44 = vadd.f32 %v1077_v8, %v6532_v42 }
 0x448   :  { %v4121_v35 = vmul.f32 -1.442695, %v1128_v56  ;;  %v1129_v45 = vadd.f32 %v1069_v39, %v6376_v6  ;;  %v8649_v39 = vld [vmem:[#allocation117_spill] sm:$0xff] }
 0x449   :  { %5069 = vpow2.f32 %v4123_v51  ;;  %v4124_v22 = vmul.f32 -1.442695, %v1131_v44 }
 0x44a   :  { %5071 = vpow2.f32 %v4121_v35  ;;  %v4122_v27 = vmul.f32 -1.442695, %v1129_v45  ;;  %v4615_v43 = vpop.f32.mrb[20].mxu1 }
 0x44b   :  { %5073 = vpow2.f32 %v4124_v22  ;;  %v1090_v11 = vadd.f32 %v4615_v43, %v8644_v34  ;;  %v1081_v10 = vpop.f32.mrb[21].mxu1  ;;  %v8650_v22 = vld [vmem:[#allocation142_spill] sm:$0xff] }
 0x44c   :  { %5075 = vpow2.f32 %v4122_v27  ;;  %v1082_v58 = vadd.f32 %v1081_v10, %v8645_v31  ;;  %v4616_v53 = vpop.f32.mrb[22].mxu1  ;;  %v8651_v31 = vld [vmem:[#allocation118_spill] sm:$0xff] }
 0x44d   :  { %v1134_v25 = vadd.f32 %v1090_v11, %v6612_v15  ;;  %v1093_v28 = vadd.f32 %v4616_v53, %v8646_v55  ;;  %v1084_v59 = vpop.f32.mrb[23].mxu1 }
 0x44e   :  { %v1132_v54 = vadd.f32 %v1082_v58, %v6456_v17  ;;  %v1085_v57 = vadd.f32 %v1084_v59, %v8647_v26 }
 0x44f   :  { %v4127_v30 = vmul.f32 -1.442695, %v1134_v25  ;;  %v1135_v7 = vadd.f32 %v1093_v28, %v6610_v36 }
 0x450   :  { %v4125_v41 = vmul.f32 -1.442695, %v1132_v54  ;;  %v1133_v47 = vadd.f32 %v1085_v57, %v6454_v40 }
 0x451   :  { %5077 = vpow2.f32 %v4127_v30  ;;  %v4128_v14 = vmul.f32 -1.442695, %v1135_v7 }
 0x452   :  { %5079 = vpow2.f32 %v4125_v41  ;;  %v4126_v38 = vmul.f32 -1.442695, %v1133_v47  ;;  %v4619_v49 = vpop.f32.mrb[24].mxu1  ;;  %v8652_v41 = vld [vmem:[#allocation129_spill] sm:$0xff] }
 0x453   :  { %v5070_v29 = vpop.eup %5069  ;;  %5081 = vpow2.f32 %v4128_v14  ;;  %v1106_v8 = vadd.f32 %v4619_v49, %v8648_v60  ;;  %v1097_v32 = vpop.f32.mrb[25].mxu1  ;;  %v8653_v60 = vld [vmem:[#allocation152_spill] sm:$0xff] }
 0x454   :  { %v5072_v56 = vpop.eup %5071  ;;  %v1182_v24 = vadd.f32 1.0, %v5070_v29  ;;  %5083 = vpow2.f32 %v4126_v38  ;;  %v1098_v51 = vadd.f32 %v1097_v32, %v8649_v39  ;;  %v4620_v44 = vpop.f32.mrb[26].mxu1  ;;  %v8654_v39 = vld [vmem:[#allocation130_spill] sm:$0xff] }
 0x455   :  { %v5074_v35 = vpop.eup %5073  ;;  %v1180_v45 = vadd.f32 1.0, %v5072_v56  ;;  %v1109_v27 = vadd.f32 %v4620_v44, %v8650_v22  ;;  %v1100_v43 = vpop.f32.mrb[27].mxu1  ;;  %v1138_v10 = vadd.f32 %v1106_v8, %v7240_v20 }
 0x456   :  { %v5076_v34 = vpop.eup %5075  ;;  %5085 = vrcp.f32 %v1182_v24  ;;  %v1183_v11 = vadd.f32 1.0, %v5074_v35  ;;  %v1101_v58 = vadd.f32 %v1100_v43, %v8651_v31  ;;  %v1136_v25 = vadd.f32 %v1098_v51, %v7212_v50 }
 0x457   :  { %5087 = vrcp.f32 %v1180_v45  ;;  %v1181_v53 = vadd.f32 1.0, %v5076_v34  ;;  %v1139_v55 = vadd.f32 %v1109_v27, %v7243_v3 }
 0x458   :  { %5089 = vrcp.f32 %v1183_v11  ;;  %v1137_v28 = vadd.f32 %v1101_v58, %v7218_v13 }
 0x459   :  { %5091 = vrcp.f32 %v1181_v53 }
 0x45a   :  { %5093 = vtanh.f32 %v1138_v10  ;;  %v4623_v59 = vpop.f32.mrb[28].mxu1 }
 0x45b   :  { %v5078_v54 = vpop.eup %5077  ;;  %5095 = vtanh.f32 %v1136_v25  ;;  %v1122_v26 = vadd.f32 %v4623_v59, %v6901_v46  ;;  %v1113_v57 = vpop.f32.mrb[29].mxu1 }
 0x45c   :  { %v5080_v30 = vpop.eup %5079  ;;  %v1186_v7 = vadd.f32 1.0, %v5078_v54  ;;  %5097 = vtanh.f32 %v1139_v55  ;;  %v1114_v47 = vadd.f32 %v1113_v57, %v8652_v41  ;;  %v4624_v14 = vpop.f32.mrb[30].mxu1 }
 0x45d   :  { %v5082_v38 = vpop.eup %5081  ;;  %v1184_v49 = vadd.f32 1.0, %v5080_v30  ;;  %5099 = vtanh.f32 %v1137_v28  ;;  %v1142_v29 = vadd.f32 %v1122_v26, %v7254_v12  ;;  %v1125_v8 = vadd.f32 %v4624_v14, %v8653_v60  ;;  %v1116_v32 = vpop.f32.mrb[31].mxu1 }
 0x45e   :  { %v5084_v56 = vpop.eup %5083  ;;  %5101 = vrcp.f32 %v1186_v7  ;;  %v1187_v24 = vadd.f32 1.0, %v5082_v38  ;;  %v1140_v46 = vadd.f32 %v1114_v47, %v7226_v52  ;;  %v1117_v51 = vadd.f32 %v1116_v32, %v8654_v39 }
 0x45f   :  { %5103 = vrcp.f32 %v1184_v49  ;;  %v1185_v44 = vadd.f32 1.0, %v5084_v56  ;;  %v4131_v35 = vmul.f32 -1.442695, %v1142_v29  ;;  %v1143_v45 = vadd.f32 %v1125_v8, %v7259_v18 }
 0x460   :  { %v5086_v22 = vpop.eup %5085  ;;  %5105 = vrcp.f32 %v1187_v24  ;;  %v4129_v27 = vmul.f32 -1.442695, %v1140_v46  ;;  %v1141_v43 = vadd.f32 %v1117_v51, %v7230_v4 }
 0x461   :  { %v5088_v34 = vpop.eup %5087  ;;  %5107 = vrcp.f32 %v1185_v44  ;;  %v4132_v11 = vmul.f32 -1.442695, %v1143_v45 }
 0x462   :  { %v5090_v10 = vpop.eup %5089  ;;  %5109 = vpow2.f32 %v4131_v35  ;;  %v4130_v31 = vmul.f32 -1.442695, %v1141_v43 }
 0x463   :  { %v5092_v58 = vpop.eup %5091  ;;  %5111 = vpow2.f32 %v4129_v27 }
 0x464   :  { %v5094_v53 = vpop.eup %5093  ;;  %5113 = vpow2.f32 %v4132_v11 }
 0x465   :  { %v5096_v25 = vpop.eup %5095  ;;  %v1226_v55 = vmul.f32 %v5094_v53, %v5086_v22  ;;  %5115 = vpow2.f32 %v4130_v31 }
 0x466   :  { %v5098_v28 = vpop.eup %5097  ;;  %v1224_v59 = vmul.f32 %v5096_v25, %v5088_v34 }
 0x467   :  { %v5100_v54 = vpop.eup %5099  ;;  %v1227_v26 = vmul.f32 %v5098_v28, %v5090_v10 }
 0x468   :  { %v5102_v57 = vpop.eup %5101  ;;  %v1225_v30 = vmul.f32 %v5100_v54, %v5092_v58 }
 0x469   :  { %v5104_v7 = vpop.eup %5103  ;;  %v1222_v41 = vmul.f32 %v5102_v57, %v7431_v19  ;;  %v8657_v57 = vld [vmem:[#allocation32_spill] sm:$0xff] }
 0x46a   :  { %v5106_v47 = vpop.eup %5105  ;;  %v1220_v14 = vmul.f32 %v5104_v7, %v7434_v0 }
 0x46b   :  { %v5108_v38 = vpop.eup %5107  ;;  %v1223_v49 = vmul.f32 %v5106_v47, %v7436_v63  ;;  %v7495_v29 = vadd.f32 %v1226_v55, %v1222_v41  ;;  %v8658_v47 = vld [vmem:[#allocation20_spill] sm:$0xff] }
 0x46c   :  { %v5110_v60 = vpop.eup %5109  ;;  %v1221_v8 = vmul.f32 %v5108_v38, %v7439_v2  ;;  %v7498_v32 = vadd.f32 %v1224_v59, %v1220_v14 }
 0x46d   :  { %v5112_v56 = vpop.eup %5111  ;;  %v7500_v24 = vadd.f32 %v1227_v26, %v1223_v49  ;;  %v1190_v46 = vadd.f32 1.0, %v5110_v60  ;;  %5117 = vtanh.f32 %v7495_v29 }
 0x46e   :  { %v5114_v19 = vpop.eup %5113  ;;  %v7503_v39 = vadd.f32 %v1225_v30, %v1221_v8  ;;  %v1188_v0 = vadd.f32 1.0, %v5112_v56  ;;  %5119 = vtanh.f32 %v7498_v32 }
 0x46f   :  { %v5116_v63 = vpop.eup %5115  ;;  %5121 = vrcp.f32 %v1190_v46  ;;  %v1191_v51 = vadd.f32 1.0, %v5114_v19  ;;  %v8659_v19 = vld [vmem:[#allocation43_spill] sm:$0xff] }
 0x470   :  { %5123 = vrcp.f32 %v1188_v0  ;;  %v1189_v44 = vadd.f32 1.0, %v5116_v63 }
 0x471   :  { %5125 = vrcp.f32 %v1191_v51  ;;  %v8660_v51 = vld [vmem:[#allocation9_spill] sm:$0xff] }
 0x472   :  { %5127 = vrcp.f32 %v1189_v44 }
 0x473   :  { %5129 = vtanh.f32 %v7503_v39 }
 0x474   :  { %5131 = vtanh.f32 %v7500_v24 }
 0x477   :  { %v5118_v2 = vpop.eup %5117 }
 0x478   :  { %v5120_v35 = vpop.eup %5119 }
 0x479   :  { %v5122_v45 = vpop.eup %5121 }
 0x47a   :  { %v5124_v22 = vpop.eup %5123  ;;  %v1238_v58 = vmul.f32 %v5122_v45, %v5118_v2  ;;  %v8661_v45 = vld [vmem:[#allocation44_spill] sm:$0xff] }
 0x47b   :  { %v5126_v27 = vpop.eup %5125  ;;  %v1236_v10 = vmul.f32 %v5124_v22, %v5120_v35 }
 0x47c   :  { %v5128_v43 = vpop.eup %5127 }
 0x47d   :  { %v5130_v34 = vpop.eup %5129 }
 0x47e   :  { %v5132_v11 = vpop.eup %5131  ;;  %v1237_v31 = vmul.f32 %v5130_v34, %v5128_v43  ;;  %v8662_v34 = vld [vmem:[#allocation21_spill] sm:$0xff] }
 0x47f   :  { %v1239_v53 = vmul.f32 %v5132_v11, %v5126_v27 }
 0x480   :  { %v1241_v25 = vpack.c.bf16 %v1237_v31, %v1236_v10 }
 0x481   :  { %v1242_v55 = vpack.c.bf16 %v1239_v53, %v1238_v58 }
 0x482   :  { %4625 = vmatprep.subr.bf16.mxu0 %v1241_v25 }
 0x483   :  { %4626 = vmatpush3.bf16.msra.mxu0 %v1241_v25 }
 0x484   :  { %4627 = vmatprep.subr.bf16.mxu0 %v1242_v55 }
 0x487   :  { %4628 = vmatpush3.bf16.msra.mxu0 %v1242_v55 }
 0x48a   :  { %4630 = vmatmul.mubr.msk.bf16.vlgmr.msra.gmra.mrb[32].mxu0 %vm230_vm1, %v7279_v23 }
 0x48b   :  { %4633 = vmatprep.mubr.msk.bf16.mxu0 %vm230_vm1, %v7286_v5  ;;  %v8655_v5 = vld [vmem:[#allocation31_spill] sm:$0xff] }
 0x492   :  { %4634 = vmatmul.mubr.msk.bf16.gmra.mrb[36].mxu0 %vm230_vm1, %v7293_v1  ;;  %v8656_v1 = vld [vmem:[#allocation8_spill] sm:$0xff] }
 0x493   :  { %4637 = vmatprep.mubr.msk.bf16.mxu0 %vm230_vm1, %v7300_v37 }
 0x49a   :  { %4638 = vmatmul.mubr.msk.bf16.gmra.mrb[40].mxu0 %vm230_vm1, %v7376_v62 }
 0x49b   :  { %4641 = vmatprep.mubr.msk.bf16.mxu0 %vm230_vm1, %v7383_v9 }
 0x4a2   :  { %4642 = vmatmul.mubr.msk.bf16.gmra.mrb[44].mxu0 %vm230_vm1, %v7390_v33 }
 0x4a3   :  { %4669 = vmatprep.mubr.msk.bf16.mxu0 %vm230_vm1, %v7313_v61 }
 0x55d   :  { %v4631_v23 = vpop.f32.mrb[32].mxu0 }
 0x55e   :  { %v1306_v28 = vadd.f32 %v4631_v23, %v8655_v5  ;;  %v1297_v59 = vpop.f32.mrb[33].mxu0 }
 0x55f   :  { %v1298_v54 = vadd.f32 %v1297_v59, %v8656_v1  ;;  %v4632_v26 = vpop.f32.mrb[34].mxu0 }
 0x560   :  { %v1362_v37 = vadd.f32 %v1306_v28, %v6534_v16  ;;  %v1309_v30 = vadd.f32 %v4632_v26, %v8657_v57  ;;  %v1300_v7 = vpop.f32.mrb[35].mxu0  ;;  %v8663_v28 = vld [vmem:[#allocation143_spill] sm:$0xff] }
 0x561   :  { %v1360_v41 = vadd.f32 %v1298_v54, %v6378_v21  ;;  %v1301_v14 = vadd.f32 %v1300_v7, %v8658_v47  ;;  %v8665_v47 = vld [vmem:[#allocation144_spill] sm:$0xff] }
 0x562   :  { %v4144_v38 = vmul.f32 -1.442695, %v1362_v37  ;;  %v1363_v49 = vadd.f32 %v1309_v30, %v6532_v42  ;;  %v8664_v37 = vld [vmem:[#allocation119_spill] sm:$0xff] }
 0x563   :  { %v4142_v61 = vmul.f32 -1.442695, %v1360_v41  ;;  %v1361_v60 = vadd.f32 %v1301_v14, %v6376_v6 }
 0x564   :  { %5133 = vpow2.f32 %v4144_v38  ;;  %v4145_v8 = vmul.f32 -1.442695, %v1363_v49 }
 0x565   :  { %5135 = vpow2.f32 %v4142_v61  ;;  %v4143_v56 = vmul.f32 -1.442695, %v1361_v60  ;;  %v4635_v46 = vpop.f32.mrb[36].mxu0 }
 0x566   :  { %5137 = vpow2.f32 %v4145_v8  ;;  %v1322_v0 = vadd.f32 %v4635_v46, %v8659_v19  ;;  %v1313_v63 = vpop.f32.mrb[37].mxu0  ;;  %v8666_v8 = vld [vmem:[#allocation120_spill] sm:$0xff] }
 0x567   :  { %5139 = vpow2.f32 %v4143_v56  ;;  %v1314_v44 = vadd.f32 %v1313_v63, %v8660_v51  ;;  %v4636_v2 = vpop.f32.mrb[38].mxu0 }
 0x568   :  { %v1366_v35 = vadd.f32 %v1322_v0, %v6612_v15  ;;  %v1325_v22 = vadd.f32 %v4636_v2, %v8661_v45  ;;  %v1316_v27 = vpop.f32.mrb[39].mxu0 }
 0x569   :  { %v1364_v43 = vadd.f32 %v1314_v44, %v6456_v17  ;;  %v1317_v11 = vadd.f32 %v1316_v27, %v8662_v34  ;;  %v8667_v27 = vld [vmem:[#allocation131_spill] sm:$0xff] }
 0x56a   :  { %v4148_v10 = vmul.f32 -1.442695, %v1366_v35  ;;  %v1367_v31 = vadd.f32 %v1325_v22, %v6610_v36 }
 0x56b   :  { %v4146_v58 = vmul.f32 -1.442695, %v1364_v43  ;;  %v1365_v53 = vadd.f32 %v1317_v11, %v6454_v40 }
 0x56c   :  { %5141 = vpow2.f32 %v4148_v10  ;;  %v4149_v25 = vmul.f32 -1.442695, %v1367_v31 }
 0x56d   :  { %5143 = vpow2.f32 %v4146_v58  ;;  %v4147_v55 = vmul.f32 -1.442695, %v1365_v53  ;;  %v4639_v23 = vpop.f32.mrb[40].mxu0  ;;  %v8668_v58 = vld [vmem:[#allocation153_spill] sm:$0xff] }
 0x56e   :  { %v5134_v5 = vpop.eup %5133  ;;  %5145 = vpow2.f32 %v4149_v25  ;;  %v1338_v59 = vadd.f32 %v4639_v23, %v8663_v28  ;;  %v1329_v1 = vpop.f32.mrb[41].mxu0 }
 0x56f   :  { %v5136_v54 = vpop.eup %5135  ;;  %v1414_v26 = vadd.f32 1.0, %v5134_v5  ;;  %5147 = vpow2.f32 %v4147_v55  ;;  %v1330_v57 = vadd.f32 %v1329_v1, %v8664_v37  ;;  %v4640_v30 = vpop.f32.mrb[42].mxu0  ;;  %v8669_v5 = vld [vmem:[#allocation132_spill] sm:$0xff] }
 0x570   :  { %v5138_v7 = vpop.eup %5137  ;;  %v1412_v41 = vadd.f32 1.0, %v5136_v54  ;;  %v1341_v14 = vadd.f32 %v4640_v30, %v8665_v47  ;;  %v1332_v38 = vpop.f32.mrb[43].mxu0  ;;  %v1370_v60 = vadd.f32 %v1338_v59, %v7240_v20 }
 0x571   :  { %v5140_v49 = vpop.eup %5139  ;;  %5149 = vrcp.f32 %v1414_v26  ;;  %v1415_v61 = vadd.f32 1.0, %v5138_v7  ;;  %v1333_v56 = vadd.f32 %v1332_v38, %v8666_v8  ;;  %v1368_v19 = vadd.f32 %v1330_v57, %v7212_v50 }
 0x572   :  { %5151 = vrcp.f32 %v1412_v41  ;;  %v1413_v46 = vadd.f32 1.0, %v5140_v49  ;;  %v1371_v0 = vadd.f32 %v1341_v14, %v7243_v3 }
 0x573   :  { %5153 = vrcp.f32 %v1415_v61  ;;  %v1369_v63 = vadd.f32 %v1333_v56, %v7218_v13 }
 0x574   :  { %5155 = vrcp.f32 %v1413_v46 }
 0x575   :  { %5157 = vtanh.f32 %v1370_v60  ;;  %v4643_v51 = vpop.f32.mrb[44].mxu0 }
 0x576   :  { %v5142_v44 = vpop.eup %5141  ;;  %5159 = vtanh.f32 %v1368_v19  ;;  %v1354_v2 = vadd.f32 %v4643_v51, %v6909_v48  ;;  %v1345_v35 = vpop.f32.mrb[45].mxu0 }
 0x577   :  { %v5144_v45 = vpop.eup %5143  ;;  %v1418_v22 = vadd.f32 1.0, %v5142_v44  ;;  %5161 = vtanh.f32 %v1371_v0  ;;  %v1346_v43 = vadd.f32 %v1345_v35, %v8667_v27  ;;  %v4644_v34 = vpop.f32.mrb[46].mxu0 }
 0x578   :  { %v5146_v11 = vpop.eup %5145  ;;  %v1416_v10 = vadd.f32 1.0, %v5144_v45  ;;  %5163 = vtanh.f32 %v1369_v63  ;;  %v1374_v31 = vadd.f32 %v1354_v2, %v7254_v12  ;;  %v1357_v53 = vadd.f32 %v4644_v34, %v8668_v58  ;;  %v1348_v25 = vpop.f32.mrb[47].mxu0 }
 0x579   :  { %v5148_v55 = vpop.eup %5147  ;;  %5165 = vrcp.f32 %v1418_v22  ;;  %v1419_v23 = vadd.f32 1.0, %v5146_v11  ;;  %v1372_v48 = vadd.f32 %v1346_v43, %v7226_v52  ;;  %v1349_v28 = vadd.f32 %v1348_v25, %v8669_v5 }
 0x57a   :  { %5167 = vrcp.f32 %v1416_v10  ;;  %v1417_v59 = vadd.f32 1.0, %v5148_v55  ;;  %v4152_v1 = vmul.f32 -1.442695, %v1374_v31  ;;  %v1375_v54 = vadd.f32 %v1357_v53, %v7259_v18 }
 0x57b   :  { %v5150_v26 = vpop.eup %5149  ;;  %5169 = vrcp.f32 %v1419_v23  ;;  %v4150_v37 = vmul.f32 -1.442695, %v1372_v48  ;;  %v1373_v57 = vadd.f32 %v1349_v28, %v7230_v4 }
 0x57c   :  { %v5152_v30 = vpop.eup %5151  ;;  %5171 = vrcp.f32 %v1417_v59  ;;  %v4153_v7 = vmul.f32 -1.442695, %v1375_v54 }
 0x57d   :  { %v5154_v41 = vpop.eup %5153  ;;  %5173 = vpow2.f32 %v4152_v1  ;;  %v4151_v47 = vmul.f32 -1.442695, %v1373_v57 }
 0x57e   :  { %v5156_v14 = vpop.eup %5155  ;;  %5175 = vpow2.f32 %v4150_v37 }
 0x57f   :  { %v5158_v38 = vpop.eup %5157  ;;  %5177 = vpow2.f32 %v4153_v7 }
 0x580   :  { %v5160_v49 = vpop.eup %5159  ;;  %v1458_v61 = vmul.f32 %v5158_v38, %v5150_v26  ;;  %5179 = vpow2.f32 %v4151_v47  ;;  %v7582_v47 = vld [vmem:[%s8402_s3 + $0x10] sm:$0xff]   ;;  %v7596_v38 = vld [vmem:[%s8402_s3 + $0x20] sm:$0xff]  }
 0x581   :  { %v5162_v60 = vpop.eup %5161  ;;  %v1456_v8 = vmul.f32 %v5160_v49, %v5152_v30  ;;  %v7609_v49 = vld [vmem:[%s8402_s3] sm:$0xff]  }
 0x582   :  { %v5164_v56 = vpop.eup %5163  ;;  %v1459_v46 = vmul.f32 %v5162_v60, %v5154_v41  ;;  %v7575_v41 = vld [vmem:[%s8402_s3 + $0x8] sm:$0xff]  }
 0x583   :  { %v5166_v19 = vpop.eup %5165  ;;  %v1457_v0 = vmul.f32 %v5164_v56, %v5156_v14  ;;  %v7589_v14 = vld [vmem:[%s8402_s3 + $0x18] sm:$0xff]   ;;  %v8670_v60 = vld [vmem:[#allocation33_spill] sm:$0xff] }
 0x584   :  { %v5168_v63 = vpop.eup %5167  ;;  %v1454_v51 = vmul.f32 %v5166_v19, %v7495_v29 }
 0x585   :  { %v5170_v44 = vpop.eup %5169  ;;  %v1452_v2 = vmul.f32 %v5168_v63, %v7498_v32 }
 0x586   :  { %v5172_v35 = vpop.eup %5171  ;;  %v1455_v45 = vmul.f32 %v5170_v44, %v7500_v24  ;;  %v7559_v22 = vadd.f32 %v1458_v61, %v1454_v51  ;;  %v8673_v44 = vld [vmem:[#allocation22_spill] sm:$0xff] }
 0x587   :  { %v5174_v27 = vpop.eup %5173  ;;  %v1453_v43 = vmul.f32 %v5172_v35, %v7503_v39  ;;  %v7562_v34 = vadd.f32 %v1456_v8, %v1452_v2 }
 0x588   :  { %v5176_v11 = vpop.eup %5175  ;;  %v7564_v10 = vadd.f32 %v1459_v46, %v1455_v45  ;;  %v1422_v31 = vadd.f32 1.0, %v5174_v27  ;;  %5181 = vtanh.f32 %v7559_v22  ;;  %v8671_v46 = vld [vmem:[#allocation10_spill] sm:$0xff] }
 0x589   :  { %v5178_v29 = vpop.eup %5177  ;;  %v7567_v58 = vadd.f32 %v1457_v0, %v1453_v43  ;;  %v1420_v32 = vadd.f32 1.0, %v5176_v11  ;;  %5183 = vtanh.f32 %v7562_v34  ;;  %v8672_v0 = vld [vmem:[#allocation34_spill] sm:$0xff] }
 0x58a   :  { %v5180_v24 = vpop.eup %5179  ;;  %5185 = vrcp.f32 %v1422_v31  ;;  %v1423_v53 = vadd.f32 1.0, %v5178_v29 }
 0x58b   :  { %5187 = vrcp.f32 %v1420_v32  ;;  %v1421_v25 = vadd.f32 1.0, %v5180_v24  ;;  %v8674_v32 = vld [vmem:[#allocation45_spill] sm:$0xff] }
 0x58c   :  { %5189 = vrcp.f32 %v1423_v53 }
 0x58d   :  { %5191 = vrcp.f32 %v1421_v25  ;;  %v8675_v25 = vld [vmem:[#allocation11_spill] sm:$0xff] }
 0x58e   :  { %5193 = vtanh.f32 %v7567_v58 }
 0x58f   :  { %5195 = vtanh.f32 %v7564_v10 }
 0x592   :  { %v5182_v39 = vpop.eup %5181 }
 0x593   :  { %v5184_v55 = vpop.eup %5183 }
 0x594   :  { %v5186_v23 = vpop.eup %5185 }
 0x595   :  { %v5188_v48 = vpop.eup %5187  ;;  %v1470_v37 = vmul.f32 %v5186_v23, %v5182_v39 }
 0x596   :  { %v5190_v5 = vpop.eup %5189  ;;  %v1468_v54 = vmul.f32 %v5188_v48, %v5184_v55  ;;  %v8676_v48 = vld [vmem:[#allocation46_spill] sm:$0xff] }
 0x597   :  { %v5192_v28 = vpop.eup %5191 }
 0x598   :  { %v5194_v59 = vpop.eup %5193 }
 0x599   :  { %v5196_v1 = vpop.eup %5195  ;;  %v1469_v26 = vmul.f32 %v5194_v59, %v5192_v28 }
 0x59a   :  { %v1471_v57 = vmul.f32 %v5196_v1, %v5190_v5  ;;  %v8677_v1 = vld [vmem:[#allocation23_spill] sm:$0xff] }
 0x59b   :  { %v1473_v30 = vpack.c.bf16 %v1469_v26, %v1468_v54 }
 0x59c   :  { %v1474_v7 = vpack.c.bf16 %v1471_v57, %v1470_v37 }
 0x59d   :  { %4645 = vmatprep.subr.bf16.mxu1 %v1473_v30 }
 0x59e   :  { %4646 = vmatpush3.bf16.msra.mxu1 %v1473_v30 }
 0x59f   :  { %4647 = vmatprep.subr.bf16.mxu1 %v1474_v7 }
 0x5a2   :  { %4648 = vmatpush3.bf16.msra.mxu1 %v1474_v7 }
 0x5a5   :  { %4650 = vmatmul.mubr.msk.bf16.vlgmr.msra.gmra.mrb[32].mxu1 %vm230_vm1, %v7575_v41 }
 0x5a6   :  { %4653 = vmatprep.mubr.msk.bf16.mxu1 %vm230_vm1, %v7582_v47 }
 0x5ad   :  { %4654 = vmatmul.mubr.msk.bf16.gmra.mrb[36].mxu1 %vm230_vm1, %v7589_v14 }
 0x5ae   :  { %4657 = vmatprep.mubr.msk.bf16.mxu1 %vm230_vm1, %v7596_v38 }
 0x5b5   :  { %4658 = vmatmul.mubr.msk.bf16.gmra.mrb[40].mxu1 %vm230_vm1, %v7376_v62 }
 0x5b6   :  { %4661 = vmatprep.mubr.msk.bf16.mxu1 %vm230_vm1, %v7383_v9 }
 0x5bd   :  { %4662 = vmatmul.mubr.msk.bf16.gmra.mrb[44].mxu1 %vm230_vm1, %v7390_v33 }
 0x5be   :  { %4689 = vmatprep.mubr.msk.bf16.mxu1 %vm230_vm1, %v7609_v49 }
 0x678   :  { %v4651_v61 = vpop.f32.mrb[32].mxu1 }
 0x679   :  { %v1538_v8 = vadd.f32 %v4651_v61, %v8670_v60  ;;  %v1529_v56 = vpop.f32.mrb[33].mxu1 }
 0x67a   :  { %v1530_v62 = vadd.f32 %v1529_v56, %v8671_v46  ;;  %v4652_v19 = vpop.f32.mrb[34].mxu1  ;;  %v8678_v56 = vld [vmem:[#allocation145_spill] sm:$0xff] }
 0x67b   :  { %v1594_v9 = vadd.f32 %v1538_v8, %v6534_v16  ;;  %v1541_v63 = vadd.f32 %v4652_v19, %v8672_v0  ;;  %v1532_v33 = vpop.f32.mrb[35].mxu1  ;;  %v8679_v0 = vld [vmem:[#allocation121_spill] sm:$0xff] }
 0x67c   :  { %v1592_v51 = vadd.f32 %v1530_v62, %v6378_v21  ;;  %v1533_v2 = vadd.f32 %v1532_v33, %v8673_v44 }
 0x67d   :  { %v4165_v35 = vmul.f32 -1.442695, %v1594_v9  ;;  %v1595_v45 = vadd.f32 %v1541_v63, %v6532_v42 }
 0x67e   :  { %v4163_v27 = vmul.f32 -1.442695, %v1592_v51  ;;  %v1593_v43 = vadd.f32 %v1533_v2, %v6376_v6  ;;  %v8680_v2 = vld [vmem:[#allocation146_spill] sm:$0xff] }
 0x67f   :  { %5197 = vpow2.f32 %v4165_v35  ;;  %v4166_v11 = vmul.f32 -1.442695, %v1595_v45 }
 0x680   :  { %5199 = vpow2.f32 %v4163_v27  ;;  %v4164_v31 = vmul.f32 -1.442695, %v1593_v43  ;;  %v4655_v29 = vpop.f32.mrb[36].mxu1 }
 0x681   :  { %5201 = vpow2.f32 %v4166_v11  ;;  %v1554_v24 = vadd.f32 %v4655_v29, %v8674_v32  ;;  %v1545_v53 = vpop.f32.mrb[37].mxu1 }
 0x682   :  { %5203 = vpow2.f32 %v4164_v31  ;;  %v1546_v39 = vadd.f32 %v1545_v53, %v8675_v25  ;;  %v4656_v55 = vpop.f32.mrb[38].mxu1  ;;  %v8681_v31 = vld [vmem:[#allocation122_spill] sm:$0xff] }
 0x683   :  { %v1598_v23 = vadd.f32 %v1554_v24, %v6612_v15  ;;  %v1557_v5 = vadd.f32 %v4656_v55, %v8676_v48  ;;  %v1548_v28 = vpop.f32.mrb[39].mxu1 }
 0x684   :  { %v1596_v59 = vadd.f32 %v1546_v39, %v6456_v17  ;;  %v1549_v54 = vadd.f32 %v1548_v28, %v8677_v1  ;;  %v8683_v1 = vld [vmem:[#allocation133_spill] sm:$0xff] }
 0x685   :  { %v4169_v26 = vmul.f32 -1.442695, %v1598_v23  ;;  %v1599_v37 = vadd.f32 %v1557_v5, %v6610_v36  ;;  %v8682_v23 = vld [vmem:[#allocation154_spill] sm:$0xff] }
 0x686   :  { %v4167_v57 = vmul.f32 -1.442695, %v1596_v59  ;;  %v1597_v30 = vadd.f32 %v1549_v54, %v6454_v40 }
 0x687   :  { %5205 = vpow2.f32 %v4169_v26  ;;  %v4170_v7 = vmul.f32 -1.442695, %v1599_v37 }
 0x688   :  { %5207 = vpow2.f32 %v4167_v57  ;;  %v4168_v61 = vmul.f32 -1.442695, %v1597_v30  ;;  %v4659_v60 = vpop.f32.mrb[40].mxu1 }
 0x689   :  { %v5198_v8 = vpop.eup %5197  ;;  %5209 = vpow2.f32 %v4170_v7  ;;  %v1570_v46 = vadd.f32 %v4659_v60, %v8678_v56  ;;  %v1561_v62 = vpop.f32.mrb[41].mxu1  ;;  %v8684_v7 = vld [vmem:[#allocation155_spill] sm:$0xff] }
 0x68a   :  { %v5200_v19 = vpop.eup %5199  ;;  %v1646_v9 = vadd.f32 1.0, %v5198_v8  ;;  %5211 = vpow2.f32 %v4168_v61  ;;  %v1562_v63 = vadd.f32 %v1561_v62, %v8679_v0  ;;  %v4660_v33 = vpop.f32.mrb[42].mxu1  ;;  %v8685_v62 = vld [vmem:[#allocation134_spill] sm:$0xff] }
 0x68b   :  { %v5202_v51 = vpop.eup %5201  ;;  %v1644_v44 = vadd.f32 1.0, %v5200_v19  ;;  %v1573_v35 = vadd.f32 %v4660_v33, %v8680_v2  ;;  %v1564_v45 = vpop.f32.mrb[43].mxu1  ;;  %v1602_v11 = vadd.f32 %v1570_v46, %v7240_v20 }
 0x68c   :  { %v5204_v27 = vpop.eup %5203  ;;  %5213 = vrcp.f32 %v1646_v9  ;;  %v1647_v43 = vadd.f32 1.0, %v5202_v51  ;;  %v1565_v29 = vadd.f32 %v1564_v45, %v8681_v31  ;;  %v1600_v24 = vadd.f32 %v1562_v63, %v7212_v50 }
 0x68d   :  { %5215 = vrcp.f32 %v1644_v44  ;;  %v1645_v32 = vadd.f32 1.0, %v5204_v27  ;;  %v1603_v53 = vadd.f32 %v1573_v35, %v7243_v3 }
 0x68e   :  { %5217 = vrcp.f32 %v1647_v43  ;;  %v1601_v25 = vadd.f32 %v1565_v29, %v7218_v13 }
 0x68f   :  { %5219 = vrcp.f32 %v1645_v32 }
 0x690   :  { %5221 = vtanh.f32 %v1602_v11  ;;  %v4663_v39 = vpop.f32.mrb[44].mxu1 }
 0x691   :  { %v5206_v55 = vpop.eup %5205  ;;  %5223 = vtanh.f32 %v1600_v24  ;;  %v1586_v48 = vadd.f32 %v4663_v39, %v8682_v23  ;;  %v1577_v5 = vpop.f32.mrb[45].mxu1 }
 0x692   :  { %v5208_v28 = vpop.eup %5207  ;;  %v1650_v59 = vadd.f32 1.0, %v5206_v55  ;;  %5225 = vtanh.f32 %v1603_v53  ;;  %v1578_v54 = vadd.f32 %v1577_v5, %v8683_v1  ;;  %v4664_v26 = vpop.f32.mrb[46].mxu1 }
 0x693   :  { %v5210_v37 = vpop.eup %5209  ;;  %v1648_v57 = vadd.f32 1.0, %v5208_v28  ;;  %5227 = vtanh.f32 %v1601_v25  ;;  %v1606_v30 = vadd.f32 %v1586_v48, %v7254_v12  ;;  %v1589_v61 = vadd.f32 %v4664_v26, %v8684_v7  ;;  %v1580_v60 = vpop.f32.mrb[47].mxu1 }
 0x694   :  { %v5212_v8 = vpop.eup %5211  ;;  %5229 = vrcp.f32 %v1650_v59  ;;  %v1651_v56 = vadd.f32 1.0, %v5210_v37  ;;  %v1604_v46 = vadd.f32 %v1578_v54, %v7226_v52  ;;  %v1581_v19 = vadd.f32 %v1580_v60, %v8685_v62 }
 0x695   :  { %5231 = vrcp.f32 %v1648_v57  ;;  %v1649_v9 = vadd.f32 1.0, %v5212_v8  ;;  %v4173_v0 = vmul.f32 -1.442695, %v1606_v30  ;;  %v1607_v63 = vadd.f32 %v1589_v61, %v7259_v18 }
 0x696   :  { %v5214_v33 = vpop.eup %5213  ;;  %5233 = vrcp.f32 %v1651_v56  ;;  %v4171_v51 = vmul.f32 -1.442695, %v1604_v46  ;;  %v1605_v44 = vadd.f32 %v1581_v19, %v7230_v4 }
 0x697   :  { %v5216_v2 = vpop.eup %5215  ;;  %5235 = vrcp.f32 %v1649_v9  ;;  %v4174_v35 = vmul.f32 -1.442695, %v1607_v63 }
 0x698   :  { %v5218_v45 = vpop.eup %5217  ;;  %5237 = vpow2.f32 %v4173_v0  ;;  %v4172_v27 = vmul.f32 -1.442695, %v1605_v44 }
 0x699   :  { %v5220_v43 = vpop.eup %5219  ;;  %5239 = vpow2.f32 %v4171_v51 }
 0x69a   :  { %v5222_v11 = vpop.eup %5221  ;;  %5241 = vpow2.f32 %v4174_v35 }
 0x69b   :  { %v5224_v31 = vpop.eup %5223  ;;  %v1690_v29 = vmul.f32 %v5222_v11, %v5214_v33  ;;  %5243 = vpow2.f32 %v4172_v27  ;;  %v7679_v11 = vld [vmem:[%s8402_s3 + $0x30] sm:$0xff]  }
 0x69c   :  { %v5226_v32 = vpop.eup %5225  ;;  %v1688_v24 = vmul.f32 %v5224_v31, %v5216_v2  ;;  %v7686_v31 = vld [vmem:[%s8402_s3 + $0x38] sm:$0xff]  }
 0x69d   :  { %v5228_v53 = vpop.eup %5227  ;;  %v1691_v25 = vmul.f32 %v5226_v32, %v5218_v45  ;;  %v8686_v32 = vld [vmem:[#allocation35_spill] sm:$0xff] }
 0x69e   :  { %v5230_v39 = vpop.eup %5229  ;;  %v1689_v55 = vmul.f32 %v5228_v53, %v5220_v43  ;;  %v7672_v43 = vld [vmem:[%s8402_s3 + $0x28] sm:$0xff]  }
 0x69f   :  { %v5232_v23 = vpop.eup %5231  ;;  %v1686_v48 = vmul.f32 %v5230_v39, %v7559_v22 }
 0x6a0   :  { %v5234_v5 = vpop.eup %5233  ;;  %v1684_v28 = vmul.f32 %v5232_v23, %v7562_v34 }
 0x6a1   :  { %v5236_v59 = vpop.eup %5235  ;;  %v1687_v1 = vmul.f32 %v5234_v5, %v7564_v10  ;;  %v7648_v54 = vadd.f32 %v1690_v29, %v1686_v48  ;;  %v8688_v48 = vld [vmem:[#allocation36_spill] sm:$0xff] }
 0x6a2   :  { %v5238_v26 = vpop.eup %5237  ;;  %v1685_v37 = vmul.f32 %v5236_v59, %v7567_v58  ;;  %v7651_v57 = vadd.f32 %v1688_v24, %v1684_v28 }
 0x6a3   :  { %v5240_v30 = vpop.eup %5239  ;;  %v7653_v7 = vadd.f32 %v1691_v25, %v1687_v1  ;;  %v1654_v61 = vadd.f32 1.0, %v5238_v26  ;;  %5245 = vtanh.f32 %v7648_v54  ;;  %v8687_v25 = vld [vmem:[#allocation12_spill] sm:$0xff] }
 0x6a4   :  { %v5242_v22 = vpop.eup %5241  ;;  %v7656_v60 = vadd.f32 %v1689_v55, %v1685_v37  ;;  %v1652_v34 = vadd.f32 1.0, %v5240_v30  ;;  %5247 = vtanh.f32 %v7651_v57  ;;  %v8689_v1 = vld [vmem:[#allocation24_spill] sm:$0xff] }
 0x6a5   :  { %v5244_v10 = vpop.eup %5243  ;;  %5249 = vrcp.f32 %v1654_v61  ;;  %v1655_v8 = vadd.f32 1.0, %v5242_v22 }
 0x6a6   :  { %5251 = vrcp.f32 %v1652_v34  ;;  %v1653_v56 = vadd.f32 1.0, %v5244_v10 }
 0x6a7   :  { %5253 = vrcp.f32 %v1655_v8 }
 0x6a8   :  { %5255 = vrcp.f32 %v1653_v56  ;;  %v8690_v56 = vld [vmem:[#allocation47_spill] sm:$0xff] }
 0x6a9   :  { %5257 = vtanh.f32 %v7656_v60 }
 0x6aa   :  { %5259 = vtanh.f32 %v7653_v7 }
 0x6ad   :  { %v5246_v58 = vpop.eup %5245 }
 0x6ae   :  { %v5248_v46 = vpop.eup %5247 }
 0x6af   :  { %v5250_v62 = vpop.eup %5249 }
 0x6b0   :  { %v5252_v19 = vpop.eup %5251  ;;  %v1702_v2 = vmul.f32 %v5250_v62, %v5246_v58  ;;  %v8691_v62 = vld [vmem:[#allocation13_spill] sm:$0xff] }
 0x6b1   :  { %v5254_v9 = vpop.eup %5253  ;;  %v1700_v51 = vmul.f32 %v5252_v19, %v5248_v46 }
 0x6b2   :  { %v5256_v0 = vpop.eup %5255 }
 0x6b3   :  { %v5258_v63 = vpop.eup %5257 }
 0x6b4   :  { %v5260_v33 = vpop.eup %5259  ;;  %v1701_v44 = vmul.f32 %v5258_v63, %v5256_v0  ;;  %v8692_v63 = vld [vmem:[#allocation48_spill] sm:$0xff] }
 0x6b5   :  { %v1703_v35 = vmul.f32 %v5260_v33, %v5254_v9 }
 0x6b6   :  { %v1705_v45 = vpack.c.bf16 %v1701_v44, %v1700_v51 }
 0x6b7   :  { %v1706_v27 = vpack.c.bf16 %v1703_v35, %v1702_v2  ;;  %v8693_v2 = vld [vmem:[#allocation25_spill] sm:$0xff] }
 0x6b8   :  { %4665 = vmatprep.subr.bf16.mxu0 %v1705_v45 }
 0x6b9   :  { %4666 = vmatpush3.bf16.msra.mxu0 %v1705_v45 }
 0x6ba   :  { %4667 = vmatprep.subr.bf16.mxu0 %v1706_v27 }
 0x6bd   :  { %4668 = vmatpush3.bf16.msra.mxu0 %v1706_v27 }
 0x6c0   :  { %4670 = vmatmul.mubr.msk.bf16.vlgmr.msra.gmra.mrb[48].mxu0 %vm230_vm1, %v7575_v41 }
 0x6c1   :  { %4673 = vmatprep.mubr.msk.bf16.mxu0 %vm230_vm1, %v7582_v47 }
 0x6c8   :  { %4674 = vmatmul.mubr.msk.bf16.gmra.mrb[52].mxu0 %vm230_vm1, %v7589_v14 }
 0x6c9   :  { %4677 = vmatprep.mubr.msk.bf16.mxu0 %vm230_vm1, %v7596_v38 }
 0x6d0   :  { %4678 = vmatmul.mubr.msk.bf16.gmra.mrb[56].mxu0 %vm230_vm1, %v7672_v43 }
 0x6d1   :  { %4681 = vmatprep.mubr.msk.bf16.mxu0 %vm230_vm1, %v7679_v11 }
 0x6d8   :  { %4682 = vmatmul.mubr.msk.bf16.gmra.mrb[60].mxu0 %vm230_vm1, %v7686_v31 }
 0x6d9   :  { %4709 = vmatprep.mubr.msk.bf16.mxu0 %vm230_vm1, %v7609_v49 }
 0x793   :  { %v4671_v29 = vpop.f32.mrb[48].mxu0 }
 0x794   :  { %v1770_v24 = vadd.f32 %v4671_v29, %v8686_v32  ;;  %v1761_v53 = vpop.f32.mrb[49].mxu0 }
 0x795   :  { %v1762_v39 = vadd.f32 %v1761_v53, %v8687_v25  ;;  %v4672_v55 = vpop.f32.mrb[50].mxu0 }
 0x796   :  { %v1826_v23 = vadd.f32 %v1770_v24, %v6534_v16  ;;  %v1773_v5 = vadd.f32 %v4672_v55, %v8688_v48  ;;  %v1764_v28 = vpop.f32.mrb[51].mxu0  ;;  %v8694_v55 = vld [vmem:[#allocation147_spill] sm:$0xff] }
 0x797   :  { %v1824_v59 = vadd.f32 %v1762_v39, %v6378_v21  ;;  %v1765_v26 = vadd.f32 %v1764_v28, %v8689_v1 }
 0x798   :  { %v4186_v37 = vmul.f32 -1.442695, %v1826_v23  ;;  %v1827_v30 = vadd.f32 %v1773_v5, %v6532_v42 }
 0x799   :  { %v4184_v61 = vmul.f32 -1.442695, %v1824_v59  ;;  %v1825_v22 = vadd.f32 %v1765_v26, %v6376_v6  ;;  %v8695_v59 = vld [vmem:[#allocation123_spill] sm:$0xff] }
 0x79a   :  { %5261 = vpow2.f32 %v4186_v37  ;;  %v4187_v34 = vmul.f32 -1.442695, %v1827_v30 }
 0x79b   :  { %5263 = vpow2.f32 %v4184_v61  ;;  %v4185_v10 = vmul.f32 -1.442695, %v1825_v22  ;;  %v4675_v8 = vpop.f32.mrb[52].mxu0  ;;  %v8696_v61 = vld [vmem:[#allocation148_spill] sm:$0xff] }
 0x79c   :  { %5265 = vpow2.f32 %v4187_v34  ;;  %v1786_v58 = vadd.f32 %v4675_v8, %v8690_v56  ;;  %v1777_v46 = vpop.f32.mrb[53].mxu0 }
 0x79d   :  { %5267 = vpow2.f32 %v4185_v10  ;;  %v1778_v19 = vadd.f32 %v1777_v46, %v8691_v62  ;;  %v4676_v9 = vpop.f32.mrb[54].mxu0 }
 0x79e   :  { %v1830_v0 = vadd.f32 %v1786_v58, %v6612_v15  ;;  %v1789_v33 = vadd.f32 %v4676_v9, %v8692_v63  ;;  %v1780_v51 = vpop.f32.mrb[55].mxu0  ;;  %v8697_v58 = vld [vmem:[#allocation124_spill] sm:$0xff] }
 0x79f   :  { %v1828_v44 = vadd.f32 %v1778_v19, %v6456_v17  ;;  %v1781_v35 = vadd.f32 %v1780_v51, %v8693_v2  ;;  %v8698_v51 = vld [vmem:[#allocation156_spill] sm:$0xff] }
 0x7a0   :  { %v4190_v45 = vmul.f32 -1.442695, %v1830_v0  ;;  %v1831_v27 = vadd.f32 %v1789_v33, %v6610_v36 }
 0x7a1   :  { %v4188_v29 = vmul.f32 -1.442695, %v1828_v44  ;;  %v1829_v32 = vadd.f32 %v1781_v35, %v6454_v40 }
 0x7a2   :  { %5269 = vpow2.f32 %v4190_v45  ;;  %v4191_v24 = vmul.f32 -1.442695, %v1831_v27  ;;  %v8699_v27 = vld [vmem:[#allocation135_spill] sm:$0xff] }
 0x7a3   :  { %5271 = vpow2.f32 %v4188_v29  ;;  %v4189_v53 = vmul.f32 -1.442695, %v1829_v32  ;;  %v4679_v25 = vpop.f32.mrb[56].mxu0 }
 0x7a4   :  { %v5262_v39 = vpop.eup %5261  ;;  %5273 = vpow2.f32 %v4191_v24  ;;  %v1802_v23 = vadd.f32 %v4679_v25, %v8694_v55  ;;  %v1793_v48 = vpop.f32.mrb[57].mxu0 }
 0x7a5   :  { %v5264_v5 = vpop.eup %5263  ;;  %v1878_v28 = vadd.f32 1.0, %v5262_v39  ;;  %5275 = vpow2.f32 %v4189_v53  ;;  %v1794_v1 = vadd.f32 %v1793_v48, %v8695_v59  ;;  %v4680_v26 = vpop.f32.mrb[58].mxu0  ;;  %v8700_v39 = vld [vmem:[#allocation157_spill] sm:$0xff]  ;;  %v8701_v59 = vld [vmem:[#allocation136_spill] sm:$0xff] }
 0x7a6   :  { %v5266_v37 = vpop.eup %5265  ;;  %v1876_v30 = vadd.f32 1.0, %v5264_v5  ;;  %v1805_v22 = vadd.f32 %v4680_v26, %v8696_v61  ;;  %v1796_v34 = vpop.f32.mrb[59].mxu0  ;;  %v1834_v56 = vadd.f32 %v1802_v23, %v7240_v20 }
 0x7a7   :  { %v5268_v10 = vpop.eup %5267  ;;  %5277 = vrcp.f32 %v1878_v28  ;;  %v1879_v8 = vadd.f32 1.0, %v5266_v37  ;;  %v1797_v46 = vadd.f32 %v1796_v34, %v8697_v58  ;;  %v1832_v19 = vadd.f32 %v1794_v1, %v7212_v50 }
 0x7a8   :  { %5279 = vrcp.f32 %v1876_v30  ;;  %v1877_v62 = vadd.f32 1.0, %v5268_v10  ;;  %v1835_v9 = vadd.f32 %v1805_v22, %v7243_v3 }
 0x7a9   :  { %5281 = vrcp.f32 %v1879_v8  ;;  %v1833_v0 = vadd.f32 %v1797_v46, %v7218_v13 }
 0x7aa   :  { %5283 = vrcp.f32 %v1877_v62 }
 0x7ab   :  { %5285 = vtanh.f32 %v1834_v56  ;;  %v4683_v63 = vpop.f32.mrb[60].mxu0 }
 0x7ac   :  { %v5270_v33 = vpop.eup %5269  ;;  %5287 = vtanh.f32 %v1832_v19  ;;  %v1818_v44 = vadd.f32 %v4683_v63, %v8698_v51  ;;  %v1809_v2 = vpop.f32.mrb[61].mxu0 }
 0x7ad   :  { %v5272_v35 = vpop.eup %5271  ;;  %v1882_v45 = vadd.f32 1.0, %v5270_v33  ;;  %5289 = vtanh.f32 %v1835_v9  ;;  %v1810_v29 = vadd.f32 %v1809_v2, %v8699_v27  ;;  %v4684_v32 = vpop.f32.mrb[62].mxu0 }
 0x7ae   :  { %v5274_v24 = vpop.eup %5273  ;;  %v1880_v53 = vadd.f32 1.0, %v5272_v35  ;;  %5291 = vtanh.f32 %v1833_v0  ;;  %v1838_v25 = vadd.f32 %v1818_v44, %v7254_v12  ;;  %v1821_v55 = vadd.f32 %v4684_v32, %v8700_v39  ;;  %v1812_v23 = vpop.f32.mrb[63].mxu0 }
 0x7af   :  { %v5276_v48 = vpop.eup %5275  ;;  %5293 = vrcp.f32 %v1882_v45  ;;  %v1883_v5 = vadd.f32 1.0, %v5274_v24  ;;  %v1836_v28 = vadd.f32 %v1810_v29, %v7226_v52  ;;  %v1813_v1 = vadd.f32 %v1812_v23, %v8701_v59 }
 0x7b0   :  { %5295 = vrcp.f32 %v1880_v53  ;;  %v1881_v26 = vadd.f32 1.0, %v5276_v48  ;;  %v4194_v37 = vmul.f32 -1.442695, %v1838_v25  ;;  %v1839_v30 = vadd.f32 %v1821_v55, %v7259_v18 }
 0x7b1   :  { %v5278_v61 = vpop.eup %5277  ;;  %5297 = vrcp.f32 %v1883_v5  ;;  %v4192_v22 = vmul.f32 -1.442695, %v1836_v28  ;;  %v1837_v34 = vadd.f32 %v1813_v1, %v7230_v4 }
 0x7b2   :  { %v5280_v10 = vpop.eup %5279  ;;  %5299 = vrcp.f32 %v1881_v26  ;;  %v4195_v8 = vmul.f32 -1.442695, %v1839_v30 }
 0x7b3   :  { %v5282_v56 = vpop.eup %5281  ;;  %5301 = vpow2.f32 %v4194_v37  ;;  %v4193_v58 = vmul.f32 -1.442695, %v1837_v34 }
 0x7b4   :  { %v5284_v46 = vpop.eup %5283  ;;  %5303 = vpow2.f32 %v4192_v22 }
 0x7b5   :  { %v5286_v62 = vpop.eup %5285  ;;  %5305 = vpow2.f32 %v4195_v8 }
 0x7b6   :  { %v5288_v19 = vpop.eup %5287  ;;  %v1922_v9 = vmul.f32 %v5286_v62, %v5278_v61  ;;  %5307 = vpow2.f32 %v4193_v58 }
 0x7b7   :  { %v5290_v0 = vpop.eup %5289  ;;  %v1920_v63 = vmul.f32 %v5288_v19, %v5280_v10 }
 0x7b8   :  { %v5292_v33 = vpop.eup %5291  ;;  %v1923_v51 = vmul.f32 %v5290_v0, %v5282_v56  ;;  %v8702_v0 = vld [vmem:[#allocation37_spill] sm:$0xff] }
 0x7b9   :  { %v5294_v44 = vpop.eup %5293  ;;  %v1921_v2 = vmul.f32 %v5292_v33, %v5284_v46 }
 0x7ba   :  { %v5296_v35 = vpop.eup %5295  ;;  %v1918_v45 = vmul.f32 %v5294_v44, %v7648_v54 }
 0x7bb   :  { %v5298_v27 = vpop.eup %5297  ;;  %v1916_v29 = vmul.f32 %v5296_v35, %v7651_v57 }
 0x7bc   :  { %v5300_v32 = vpop.eup %5299  ;;  %v1919_v24 = vmul.f32 %v5298_v27, %v7653_v7  ;;  %v7727_v53 = vadd.f32 %v1922_v9, %v1918_v45  ;;  %v8704_v45 = vld [vmem:[#allocation38_spill] sm:$0xff] }
 0x7bd   :  { %v5302_v25 = vpop.eup %5301  ;;  %v1917_v39 = vmul.f32 %v5300_v32, %v7656_v60  ;;  %v7730_v55 = vadd.f32 %v1920_v63, %v1916_v29 }
 0x7be   :  { %v5304_v23 = vpop.eup %5303  ;;  %v7732_v48 = vadd.f32 %v1923_v51, %v1919_v24  ;;  %v1886_v5 = vadd.f32 1.0, %v5302_v25  ;;  %5309 = vtanh.f32 %v7727_v53  ;;  %v8703_v51 = vld [vmem:[#allocation14_spill] sm:$0xff] }
 0x7bf   :  { %v5306_v54 = vpop.eup %5305  ;;  %v7735_v28 = vadd.f32 %v1921_v2, %v1917_v39  ;;  %v1884_v57 = vadd.f32 1.0, %v5304_v23  ;;  %5311 = vtanh.f32 %v7730_v55  ;;  %v8705_v24 = vld [vmem:[#allocation26_spill] sm:$0xff] }
 0x7c0   :  { %v5308_v7 = vpop.eup %5307  ;;  %5313 = vrcp.f32 %v1886_v5  ;;  %v1887_v59 = vadd.f32 1.0, %v5306_v54 }
 0x7c1   :  { %5315 = vrcp.f32 %v1884_v57  ;;  %v1885_v1 = vadd.f32 1.0, %v5308_v7 }
 0x7c2   :  { %5317 = vrcp.f32 %v1887_v59 }
 0x7c3   :  { %5319 = vrcp.f32 %v1885_v1  ;;  %v8706_v1 = vld [vmem:[#allocation49_spill] sm:$0xff] }
 0x7c4   :  { %5321 = vtanh.f32 %v7735_v28 }
 0x7c5   :  { %5323 = vtanh.f32 %v7732_v48 }
 0x7c8   :  { %v5310_v60 = vpop.eup %5309 }
 0x7c9   :  { %v5312_v26 = vpop.eup %5311 }
 0x7ca   :  { %v5314_v37 = vpop.eup %5313 }
 0x7cb   :  { %v5316_v30 = vpop.eup %5315  ;;  %v1934_v58 = vmul.f32 %v5314_v37, %v5310_v60  ;;  %v8707_v37 = vld [vmem:[#allocation15_spill] sm:$0xff] }
 0x7cc   :  { %v5318_v61 = vpop.eup %5317  ;;  %v1932_v8 = vmul.f32 %v5316_v30, %v5312_v26 }
 0x7cd   :  { %v5320_v22 = vpop.eup %5319 }
 0x7ce   :  { %v5322_v34 = vpop.eup %5321 }
 0x7cf   :  { %v5324_v10 = vpop.eup %5323  ;;  %v1933_v56 = vmul.f32 %v5322_v34, %v5320_v22  ;;  %v8708_v34 = vld [vmem:[#allocation50_spill] sm:$0xff] }
 0x7d0   :  { %v1935_v46 = vmul.f32 %v5324_v10, %v5318_v61 }
 0x7d1   :  { %v1937_v62 = vpack.c.bf16 %v1933_v56, %v1932_v8 }
 0x7d2   :  { %v1938_v19 = vpack.c.bf16 %v1935_v46, %v1934_v58  ;;  %v8709_v58 = vld [vmem:[#allocation27_spill] sm:$0xff] }
 0x7d3   :  { %4685 = vmatprep.subr.bf16.mxu1 %v1937_v62 }
 0x7d4   :  { %4686 = vmatpush3.bf16.msra.mxu1 %v1937_v62 }
 0x7d5   :  { %4687 = vmatprep.subr.bf16.mxu1 %v1938_v19 }
 0x7d8   :  { %4688 = vmatpush3.bf16.msra.mxu1 %v1938_v19 }
 0x7db   :  { %4690 = vmatmul.mubr.msk.bf16.vlgmr.msra.gmra.mrb[48].mxu1 %vm230_vm1, %v7575_v41 }
 0x7dc   :  { %4693 = vmatprep.mubr.msk.bf16.mxu1 %vm230_vm1, %v7582_v47 }
 0x7e3   :  { %4694 = vmatmul.mubr.msk.bf16.gmra.mrb[52].mxu1 %vm230_vm1, %v7589_v14 }
 0x7e4   :  { %4697 = vmatprep.mubr.msk.bf16.mxu1 %vm230_vm1, %v7596_v38 }
 0x7eb   :  { %4698 = vmatmul.mubr.msk.bf16.gmra.mrb[56].mxu1 %vm230_vm1, %v7672_v43 }
 0x7ec   :  { %4701 = vmatprep.mubr.msk.bf16.mxu1 %vm230_vm1, %v7679_v11 }
 0x7f3   :  { %4702 = vmatmul.mubr.msk.bf16.gmra.mrb[60].mxu1 %vm230_vm1, %v7686_v31 }
 0x7f4   :  { %4729 = vmatprep.mubr.msk.bf16.mxu1 %vm230_vm1, %v7609_v49 }
 0x8ae   :  { %v4691_v9 = vpop.f32.mrb[48].mxu1 }
 0x8af   :  { %v2002_v63 = vadd.f32 %v4691_v9, %v8702_v0  ;;  %v1993_v33 = vpop.f32.mrb[49].mxu1 }
 0x8b0   :  { %v1994_v44 = vadd.f32 %v1993_v33, %v8703_v51  ;;  %v4692_v2 = vpop.f32.mrb[50].mxu1 }
 0x8b1   :  { %v2058_v35 = vadd.f32 %v2002_v63, %v6534_v16  ;;  %v2005_v27 = vadd.f32 %v4692_v2, %v8704_v45  ;;  %v1996_v29 = vpop.f32.mrb[51].mxu1  ;;  %v8710_v2 = vld [vmem:[#allocation149_spill] sm:$0xff] }
 0x8b2   :  { %v2056_v32 = vadd.f32 %v1994_v44, %v6378_v21  ;;  %v1997_v25 = vadd.f32 %v1996_v29, %v8705_v24 }
 0x8b3   :  { %v4207_v39 = vmul.f32 -1.442695, %v2058_v35  ;;  %v2059_v23 = vadd.f32 %v2005_v27, %v6532_v42 }
 0x8b4   :  { %v4205_v5 = vmul.f32 -1.442695, %v2056_v32  ;;  %v2057_v54 = vadd.f32 %v1997_v25, %v6376_v6  ;;  %v8711_v32 = vld [vmem:[#allocation125_spill] sm:$0xff] }
 0x8b5   :  { %5325 = vpow2.f32 %v4207_v39  ;;  %v4208_v57 = vmul.f32 -1.442695, %v2059_v23 }
 0x8b6   :  { %5327 = vpow2.f32 %v4205_v5  ;;  %v4206_v7 = vmul.f32 -1.442695, %v2057_v54  ;;  %v4695_v59 = vpop.f32.mrb[52].mxu1  ;;  %v8712_v5 = vld [vmem:[#allocation150_spill] sm:$0xff] }
 0x8b7   :  { %5329 = vpow2.f32 %v4208_v57  ;;  %v2018_v60 = vadd.f32 %v4695_v59, %v8706_v1  ;;  %v2009_v26 = vpop.f32.mrb[53].mxu1 }
 0x8b8   :  { %5331 = vpow2.f32 %v4206_v7  ;;  %v2010_v30 = vadd.f32 %v2009_v26, %v8707_v37  ;;  %v4696_v61 = vpop.f32.mrb[54].mxu1 }
 0x8b9   :  { %v2062_v22 = vadd.f32 %v2018_v60, %v6612_v15  ;;  %v2021_v10 = vadd.f32 %v4696_v61, %v8708_v34  ;;  %v2012_v8 = vpop.f32.mrb[55].mxu1  ;;  %v8713_v60 = vld [vmem:[#allocation126_spill] sm:$0xff] }
 0x8ba   :  { %v2060_v56 = vadd.f32 %v2010_v30, %v6456_v17  ;;  %v2013_v46 = vadd.f32 %v2012_v8, %v8709_v58  ;;  %v8714_v8 = vld [vmem:[#allocation158_spill] sm:$0xff] }
 0x8bb   :  { %v4211_v62 = vmul.f32 -1.442695, %v2062_v22  ;;  %v2063_v19 = vadd.f32 %v2021_v10, %v6610_v36 }
 0x8bc   :  { %v4209_v9 = vmul.f32 -1.442695, %v2060_v56  ;;  %v2061_v0 = vadd.f32 %v2013_v46, %v6454_v40 }
 0x8bd   :  { %5333 = vpow2.f32 %v4211_v62  ;;  %v4212_v63 = vmul.f32 -1.442695, %v2063_v19  ;;  %v8715_v19 = vld [vmem:[#allocation137_spill] sm:$0xff] }
 0x8be   :  { %5335 = vpow2.f32 %v4209_v9  ;;  %v4210_v33 = vmul.f32 -1.442695, %v2061_v0  ;;  %v4699_v51 = vpop.f32.mrb[56].mxu1 }
 0x8bf   :  { %v5326_v44 = vpop.eup %5325  ;;  %5337 = vpow2.f32 %v4212_v63  ;;  %v2034_v35 = vadd.f32 %v4699_v51, %v8710_v2  ;;  %v2025_v45 = vpop.f32.mrb[57].mxu1 }
 0x8c0   :  { %v5328_v27 = vpop.eup %5327  ;;  %v2110_v29 = vadd.f32 1.0, %v5326_v44  ;;  %5339 = vpow2.f32 %v4210_v33  ;;  %v2026_v24 = vadd.f32 %v2025_v45, %v8711_v32  ;;  %v4700_v25 = vpop.f32.mrb[58].mxu1  ;;  %v8716_v44 = vld [vmem:[#allocation159_spill] sm:$0xff]  ;;  %v8717_v32 = vld [vmem:[#allocation138_spill] sm:$0xff] }
 0x8c1   :  { %v5330_v39 = vpop.eup %5329  ;;  %v2108_v23 = vadd.f32 1.0, %v5328_v27  ;;  %v2037_v54 = vadd.f32 %v4700_v25, %v8712_v5  ;;  %v2028_v57 = vpop.f32.mrb[59].mxu1  ;;  %v2066_v1 = vadd.f32 %v2034_v35, %v7240_v20 }
 0x8c2   :  { %v5332_v7 = vpop.eup %5331  ;;  %5341 = vrcp.f32 %v2110_v29  ;;  %v2111_v59 = vadd.f32 1.0, %v5330_v39  ;;  %v2029_v26 = vadd.f32 %v2028_v57, %v8713_v60  ;;  %v2064_v30 = vadd.f32 %v2026_v24, %v7212_v50 }
 0x8c3   :  { %5343 = vrcp.f32 %v2108_v23  ;;  %v2109_v37 = vadd.f32 1.0, %v5332_v7  ;;  %v2067_v61 = vadd.f32 %v2037_v54, %v7243_v3 }
 0x8c4   :  { %5345 = vrcp.f32 %v2111_v59  ;;  %v2065_v22 = vadd.f32 %v2029_v26, %v7218_v13 }
 0x8c5   :  { %5347 = vrcp.f32 %v2109_v37 }
 0x8c6   :  { %5349 = vtanh.f32 %v2066_v1  ;;  %v4703_v34 = vpop.f32.mrb[60].mxu1 }
 0x8c7   :  { %v5334_v10 = vpop.eup %5333  ;;  %5351 = vtanh.f32 %v2064_v30  ;;  %v2050_v56 = vadd.f32 %v4703_v34, %v8714_v8  ;;  %v2041_v58 = vpop.f32.mrb[61].mxu1 }
 0x8c8   :  { %v5336_v46 = vpop.eup %5335  ;;  %v2114_v62 = vadd.f32 1.0, %v5334_v10  ;;  %5353 = vtanh.f32 %v2067_v61  ;;  %v2042_v9 = vadd.f32 %v2041_v58, %v8715_v19  ;;  %v4704_v0 = vpop.f32.mrb[62].mxu1 }
 0x8c9   :  { %v5338_v63 = vpop.eup %5337  ;;  %v2112_v33 = vadd.f32 1.0, %v5336_v46  ;;  %5355 = vtanh.f32 %v2065_v22  ;;  %v2070_v51 = vadd.f32 %v2050_v56, %v7254_v12  ;;  %v2053_v2 = vadd.f32 %v4704_v0, %v8716_v44  ;;  %v2044_v35 = vpop.f32.mrb[63].mxu1 }
 0x8ca   :  { %v5340_v45 = vpop.eup %5339  ;;  %5357 = vrcp.f32 %v2114_v62  ;;  %v2115_v27 = vadd.f32 1.0, %v5338_v63  ;;  %v2068_v29 = vadd.f32 %v2042_v9, %v7226_v52  ;;  %v2045_v24 = vadd.f32 %v2044_v35, %v8717_v32 }
 0x8cb   :  { %5359 = vrcp.f32 %v2112_v33  ;;  %v2113_v25 = vadd.f32 1.0, %v5340_v45  ;;  %v4215_v39 = vmul.f32 -1.442695, %v2070_v51  ;;  %v2071_v23 = vadd.f32 %v2053_v2, %v7259_v18 }
 0x8cc   :  { %v5342_v5 = vpop.eup %5341  ;;  %5361 = vrcp.f32 %v2115_v27  ;;  %v4213_v54 = vmul.f32 -1.442695, %v2068_v29  ;;  %v2069_v57 = vadd.f32 %v2045_v24, %v7230_v4 }
 0x8cd   :  { %v5344_v7 = vpop.eup %5343  ;;  %5363 = vrcp.f32 %v2113_v25  ;;  %v4216_v59 = vmul.f32 -1.442695, %v2071_v23 }
 0x8ce   :  { %v5346_v1 = vpop.eup %5345  ;;  %5365 = vpow2.f32 %v4215_v39  ;;  %v4214_v60 = vmul.f32 -1.442695, %v2069_v57 }
 0x8cf   :  { %v5348_v26 = vpop.eup %5347  ;;  %5367 = vpow2.f32 %v4213_v54 }
 0x8d0   :  { %v5350_v37 = vpop.eup %5349  ;;  %5369 = vpow2.f32 %v4216_v59 }
 0x8d1   :  { %v5352_v30 = vpop.eup %5351  ;;  %v2154_v61 = vmul.f32 %v5350_v37, %v5342_v5  ;;  %5371 = vpow2.f32 %v4214_v60 }
 0x8d2   :  { %v5354_v22 = vpop.eup %5353  ;;  %v2152_v34 = vmul.f32 %v5352_v30, %v5344_v7 }
 0x8d3   :  { %v5356_v10 = vpop.eup %5355  ;;  %v2155_v8 = vmul.f32 %v5354_v22, %v5346_v1 }
 0x8d4   :  { %v5358_v56 = vpop.eup %5357  ;;  %v2153_v58 = vmul.f32 %v5356_v10, %v5348_v26 }
 0x8d5   :  { %v5360_v46 = vpop.eup %5359  ;;  %v2150_v62 = vmul.f32 %v5358_v56, %v7727_v53 }
 0x8d6   :  { %v5362_v19 = vpop.eup %5361  ;;  %v2148_v9 = vmul.f32 %v5360_v46, %v7730_v55 }
 0x8d7   :  { %v5364_v0 = vpop.eup %5363  ;;  %v2151_v63 = vmul.f32 %v5362_v19, %v7732_v48  ;;  %v7791_v33 = vadd.f32 %v2154_v61, %v2150_v62  ;;  %v8721_v62 = vld [vmem:[#allocation54_spill] sm:$0xff] }
 0x8d8   :  { %v5366_v51 = vpop.eup %5365  ;;  %v2149_v44 = vmul.f32 %v5364_v0, %v7735_v28  ;;  %v7794_v2 = vadd.f32 %v2152_v34, %v2148_v9 }
 0x8d9   :  { %v5368_v35 = vpop.eup %5367  ;;  %v7796_v45 = vadd.f32 %v2155_v8, %v2151_v63  ;;  %v2118_v27 = vadd.f32 1.0, %v5366_v51  ;;  %5373 = vtanh.f32 %v7791_v33  ;;  %v8720_v8 = vld [vmem:[#allocation53_spill] sm:$0xff] }
 0x8da   :  { %v5370_v53 = vpop.eup %5369  ;;  %v7799_v29 = vadd.f32 %v2153_v58, %v2149_v44  ;;  %v2116_v55 = vadd.f32 1.0, %v5368_v35  ;;  %5375 = vtanh.f32 %v7794_v2 }
 0x8db   :  { %v5372_v48 = vpop.eup %5371  ;;  %5377 = vrcp.f32 %v2118_v27  ;;  %v2119_v32 = vadd.f32 1.0, %v5370_v53  ;;  %v8722_v27 = vld [vmem:[#allocation55_spill] sm:$0xff] }
 0x8dc   :  { %5379 = vrcp.f32 %v2116_v55  ;;  %v2117_v24 = vadd.f32 1.0, %v5372_v48  ;;  %v8723_v48 = vld [vmem:[#allocation56_spill] sm:$0xff] }
 0x8dd   :  { %5381 = vrcp.f32 %v2119_v32 }
 0x8de   :  { %5383 = vrcp.f32 %v2117_v24 }
 0x8df   :  { %5385 = vtanh.f32 %v7799_v29 }
 0x8e0   :  { %5387 = vtanh.f32 %v7796_v45 }
 0x8e3   :  { %v5374_v28 = vpop.eup %5373 }
 0x8e4   :  { %v5376_v25 = vpop.eup %5375 }
 0x8e5   :  { %v5378_v39 = vpop.eup %5377 }
 0x8e6   :  { %v5380_v23 = vpop.eup %5379  ;;  %v2166_v60 = vmul.f32 %v5378_v39, %v5374_v28 }
 0x8e7   :  { %v5382_v5 = vpop.eup %5381  ;;  %v2164_v59 = vmul.f32 %v5380_v23, %v5376_v25  ;;  %v8724_v25 = vld [vmem:[#allocation57_spill] sm:$0xff] }
 0x8e8   :  { %v5384_v54 = vpop.eup %5383 }
 0x8e9   :  { %v5386_v57 = vpop.eup %5385 }
 0x8ea   :  { %v5388_v7 = vpop.eup %5387  ;;  %v2165_v1 = vmul.f32 %v5386_v57, %v5384_v54  ;;  %v8725_v54 = vld [vmem:[#allocation58_spill] sm:$0xff] }
 0x8eb   :  { %v2167_v26 = vmul.f32 %v5388_v7, %v5382_v5 }
 0x8ec   :  { %v2169_v37 = vpack.c.bf16 %v2165_v1, %v2164_v59 }
 0x8ed   :  { %v2170_v30 = vpack.c.bf16 %v2167_v26, %v2166_v60 }
 0x8ee   :  { %4705 = vmatprep.subr.bf16.mxu0 %v2169_v37 }
 0x8ef   :  { %4706 = vmatpush3.bf16.msra.mxu0 %v2169_v37 }
 0x8f0   :  { %4707 = vmatprep.subr.bf16.mxu0 %v2170_v30 }
 0x8f3   :  { %4708 = vmatpush3.bf16.msra.mxu0 %v2170_v30 }
 0x8f6   :  { %4710 = vmatmul.mubr.msk.bf16.vlgmr.msra.gmra.mrb[64].mxu0 %vm230_vm1, %v7575_v41 }
 0x8f7   :  { %4713 = vmatprep.mubr.msk.bf16.mxu0 %vm230_vm1, %v7582_v47  ;;  %v8718_v47 = vld [vmem:[#allocation51_spill] sm:$0xff] }
 0x8fe   :  { %4714 = vmatmul.mubr.msk.bf16.gmra.mrb[68].mxu0 %vm230_vm1, %v7589_v14  ;;  %v8719_v14 = vld [vmem:[#allocation52_spill] sm:$0xff] }
 0x8ff   :  { %4717 = vmatprep.mubr.msk.bf16.mxu0 %vm230_vm1, %v7596_v38 }
 0x906   :  { %4718 = vmatmul.mubr.msk.bf16.gmra.mrb[72].mxu0 %vm230_vm1, %v7672_v43 }
 0x907   :  { %4721 = vmatprep.mubr.msk.bf16.mxu0 %vm230_vm1, %v7679_v11 }
 0x90e   :  { %4722 = vmatmul.mubr.msk.bf16.gmra.mrb[76].mxu0 %vm230_vm1, %v7686_v31 }
 0x90f   :  { %4749 = vmatprep.mubr.msk.bf16.mxu0 %vm230_vm1, %v7609_v49 }
 0x9c9   :  { %v4711_v41 = vpop.f32.mrb[64].mxu0 }
 0x9ca   :  { %v2234_v61 = vadd.f32 %v4711_v41, %v8718_v47  ;;  %v2225_v22 = vpop.f32.mrb[65].mxu0  ;;  %v8726_v47 = vld [vmem:[#allocation160_spill] sm:$0xff] }
 0x9cb   :  { %v2226_v34 = vadd.f32 %v2225_v22, %v8719_v14  ;;  %v4712_v10 = vpop.f32.mrb[66].mxu0 }
 0x9cc   :  { %v2290_v38 = vadd.f32 %v2234_v61, %v6534_v16  ;;  %v2237_v56 = vadd.f32 %v4712_v10, %v8720_v8  ;;  %v2228_v58 = vpop.f32.mrb[67].mxu0  ;;  %v8727_v10 = vld [vmem:[#allocation161_spill] sm:$0xff] }
 0x9cd   :  { %v2288_v46 = vadd.f32 %v2226_v34, %v6378_v21  ;;  %v2229_v19 = vadd.f32 %v2228_v58, %v8721_v62 }
 0x9ce   :  { %v4228_v9 = vmul.f32 -1.442695, %v2290_v38  ;;  %v2291_v0 = vadd.f32 %v2237_v56, %v6532_v42 }
 0x9cf   :  { %v4226_v49 = vmul.f32 -1.442695, %v2288_v46  ;;  %v2289_v63 = vadd.f32 %v2229_v19, %v6376_v6  ;;  %v8728_v46 = vld [vmem:[#allocation162_spill] sm:$0xff] }
 0x9d0   :  { %5389 = vpow2.f32 %v4228_v9  ;;  %v4229_v51 = vmul.f32 -1.442695, %v2291_v0 }
 0x9d1   :  { %5391 = vpow2.f32 %v4226_v49  ;;  %v4227_v44 = vmul.f32 -1.442695, %v2289_v63  ;;  %v4715_v35 = vpop.f32.mrb[68].mxu0  ;;  %v8729_v63 = vld [vmem:[#allocation163_spill] sm:$0xff] }
 0x9d2   :  { %5393 = vpow2.f32 %v4229_v51  ;;  %v2250_v53 = vadd.f32 %v4715_v35, %v8722_v27  ;;  %v2241_v55 = vpop.f32.mrb[69].mxu0 }
 0x9d3   :  { %5395 = vpow2.f32 %v4227_v44  ;;  %v2242_v32 = vadd.f32 %v2241_v55, %v8723_v48  ;;  %v4716_v24 = vpop.f32.mrb[70].mxu0 }
 0x9d4   :  { %v2294_v28 = vadd.f32 %v2250_v53, %v6612_v15  ;;  %v2253_v39 = vadd.f32 %v4716_v24, %v8724_v25  ;;  %v2244_v23 = vpop.f32.mrb[71].mxu0 }
 0x9d5   :  { %v2292_v5 = vadd.f32 %v2242_v32, %v6456_v17  ;;  %v2245_v57 = vadd.f32 %v2244_v23, %v8725_v54  ;;  %v8730_v32 = vld [vmem:[#allocation164_spill] sm:$0xff]  ;;  %v8731_v23 = vld [vmem:[#allocation165_spill] sm:$0xff] }
 0x9d6   :  { %v4232_v7 = vmul.f32 -1.442695, %v2294_v28  ;;  %v2295_v59 = vadd.f32 %v2253_v39, %v6610_v36 }
 0x9d7   :  { %v4230_v1 = vmul.f32 -1.442695, %v2292_v5  ;;  %v2293_v60 = vadd.f32 %v2245_v57, %v6454_v40 }
 0x9d8   :  { %5397 = vpow2.f32 %v4232_v7  ;;  %v4233_v26 = vmul.f32 -1.442695, %v2295_v59 }
 0x9d9   :  { %5399 = vpow2.f32 %v4230_v1  ;;  %v4231_v37 = vmul.f32 -1.442695, %v2293_v60  ;;  %v4719_v30 = vpop.f32.mrb[72].mxu0  ;;  %v8732_v1 = vld [vmem:[#allocation166_spill] sm:$0xff] }
 0x9da   :  { %v5390_v41 = vpop.eup %5389  ;;  %5401 = vpow2.f32 %v4233_v26  ;;  %v2266_v61 = vadd.f32 %v4719_v30, %v8726_v47  ;;  %v2257_v22 = vpop.f32.mrb[73].mxu0  ;;  %v8733_v47 = vld [vmem:[#allocation167_spill] sm:$0xff] }
 0x9db   :  { %v5392_v14 = vpop.eup %5391  ;;  %v2342_v34 = vadd.f32 1.0, %v5390_v41  ;;  %5403 = vpow2.f32 %v4231_v37  ;;  %v2258_v38 = vadd.f32 %v2257_v22, %v8727_v10  ;;  %v4720_v8 = vpop.f32.mrb[74].mxu0 }
 0x9dc   :  { %v5394_v56 = vpop.eup %5393  ;;  %v2340_v58 = vadd.f32 1.0, %v5392_v14  ;;  %v2269_v62 = vadd.f32 %v4720_v8, %v8728_v46  ;;  %v2260_v19 = vpop.f32.mrb[75].mxu0  ;;  %v2298_v49 = vadd.f32 %v2266_v61, %v7240_v20 }
 0x9dd   :  { %v5396_v9 = vpop.eup %5395  ;;  %5405 = vrcp.f32 %v2342_v34  ;;  %v2343_v0 = vadd.f32 1.0, %v5394_v56  ;;  %v2261_v51 = vadd.f32 %v2260_v19, %v8729_v63  ;;  %v2296_v35 = vadd.f32 %v2258_v38, %v7212_v50 }
 0x9de   :  { %5407 = vrcp.f32 %v2340_v58  ;;  %v2341_v44 = vadd.f32 1.0, %v5396_v9  ;;  %v2299_v27 = vadd.f32 %v2269_v62, %v7243_v3 }
 0x9df   :  { %5409 = vrcp.f32 %v2343_v0  ;;  %v2297_v53 = vadd.f32 %v2261_v51, %v7218_v13 }
 0x9e0   :  { %5411 = vrcp.f32 %v2341_v44 }
 0x9e1   :  { %5413 = vtanh.f32 %v2298_v49  ;;  %v4723_v55 = vpop.f32.mrb[76].mxu0 }
 0x9e2   :  { %v5398_v48 = vpop.eup %5397  ;;  %5415 = vtanh.f32 %v2296_v35  ;;  %v2282_v24 = vadd.f32 %v4723_v55, %v8730_v32  ;;  %v2273_v28 = vpop.f32.mrb[77].mxu0 }
 0x9e3   :  { %v5400_v25 = vpop.eup %5399  ;;  %v2346_v39 = vadd.f32 1.0, %v5398_v48  ;;  %5417 = vtanh.f32 %v2299_v27  ;;  %v2274_v5 = vadd.f32 %v2273_v28, %v8731_v23  ;;  %v4724_v54 = vpop.f32.mrb[78].mxu0 }
 0x9e4   :  { %v5402_v57 = vpop.eup %5401  ;;  %v2344_v7 = vadd.f32 1.0, %v5400_v25  ;;  %5419 = vtanh.f32 %v2297_v53  ;;  %v2302_v59 = vadd.f32 %v2282_v24, %v7254_v12  ;;  %v2285_v60 = vadd.f32 %v4724_v54, %v8732_v1  ;;  %v2276_v26 = vpop.f32.mrb[79].mxu0 }
 0x9e5   :  { %v5404_v37 = vpop.eup %5403  ;;  %5421 = vrcp.f32 %v2346_v39  ;;  %v2347_v30 = vadd.f32 1.0, %v5402_v57  ;;  %v2300_v41 = vadd.f32 %v2274_v5, %v7226_v52  ;;  %v2277_v61 = vadd.f32 %v2276_v26, %v8733_v47 }
 0x9e6   :  { %5423 = vrcp.f32 %v2344_v7  ;;  %v2345_v22 = vadd.f32 1.0, %v5404_v37  ;;  %v4236_v14 = vmul.f32 -1.442695, %v2302_v59  ;;  %v2303_v34 = vadd.f32 %v2285_v60, %v7259_v18 }
 0x9e7   :  { %v5406_v10 = vpop.eup %5405  ;;  %5425 = vrcp.f32 %v2347_v30  ;;  %v4234_v38 = vmul.f32 -1.442695, %v2300_v41  ;;  %v2301_v8 = vadd.f32 %v2277_v61, %v7230_v4 }
 0x9e8   :  { %v5408_v56 = vpop.eup %5407  ;;  %5427 = vrcp.f32 %v2345_v22  ;;  %v4237_v58 = vmul.f32 -1.442695, %v2303_v34 }
 0x9e9   :  { %v5410_v46 = vpop.eup %5409  ;;  %5429 = vpow2.f32 %v4236_v14  ;;  %v4235_v62 = vmul.f32 -1.442695, %v2301_v8 }
 0x9ea   :  { %v5412_v19 = vpop.eup %5411  ;;  %5431 = vpow2.f32 %v4234_v38 }
 0x9eb   :  { %v5414_v9 = vpop.eup %5413  ;;  %5433 = vpow2.f32 %v4237_v58 }
 0x9ec   :  { %v5416_v0 = vpop.eup %5415  ;;  %v2386_v49 = vmul.f32 %v5414_v9, %v5406_v10  ;;  %5435 = vpow2.f32 %v4235_v62  ;;  %v7878_v62 = vld [vmem:[%s8402_s3 + $0x10] sm:$0xff]   ;;  %v7892_v9 = vld [vmem:[%s8402_s3 + $0x20] sm:$0xff]  }
 0x9ed   :  { %v5418_v63 = vpop.eup %5417  ;;  %v2384_v51 = vmul.f32 %v5416_v0, %v5408_v56  ;;  %v7905_v0 = vld [vmem:[%s8402_s3] sm:$0xff]  }
 0x9ee   :  { %v5420_v44 = vpop.eup %5419  ;;  %v2387_v35 = vmul.f32 %v5418_v63, %v5410_v46  ;;  %v7871_v46 = vld [vmem:[%s8402_s3 + $0x8] sm:$0xff]   ;;  %v8734_v63 = vld [vmem:[#allocation59_spill] sm:$0xff] }
 0x9ef   :  { %v5422_v27 = vpop.eup %5421  ;;  %v2385_v53 = vmul.f32 %v5420_v44, %v5412_v19  ;;  %v7885_v19 = vld [vmem:[%s8402_s3 + $0x18] sm:$0xff]  }
 0x9f0   :  { %v5424_v55 = vpop.eup %5423  ;;  %v2382_v48 = vmul.f32 %v5422_v27, %v7791_v33 }
 0x9f1   :  { %v5426_v32 = vpop.eup %5425  ;;  %v2380_v24 = vmul.f32 %v5424_v55, %v7794_v2 }
 0x9f2   :  { %v5428_v28 = vpop.eup %5427  ;;  %v2383_v25 = vmul.f32 %v5426_v32, %v7796_v45  ;;  %v7855_v39 = vadd.f32 %v2386_v49, %v2382_v48  ;;  %v8737_v32 = vld [vmem:[#allocation62_spill] sm:$0xff] }
 0x9f3   :  { %v5430_v23 = vpop.eup %5429  ;;  %v2381_v5 = vmul.f32 %v5428_v28, %v7799_v29  ;;  %v7858_v54 = vadd.f32 %v2384_v51, %v2380_v24 }
 0x9f4   :  { %v5432_v57 = vpop.eup %5431  ;;  %v7860_v7 = vadd.f32 %v2387_v35, %v2383_v25  ;;  %v2350_v59 = vadd.f32 1.0, %v5430_v23  ;;  %5437 = vtanh.f32 %v7855_v39  ;;  %v8735_v35 = vld [vmem:[#allocation60_spill] sm:$0xff] }
 0x9f5   :  { %v5434_v33 = vpop.eup %5433  ;;  %v7863_v1 = vadd.f32 %v2385_v53, %v2381_v5  ;;  %v2348_v2 = vadd.f32 1.0, %v5432_v57  ;;  %5439 = vtanh.f32 %v7858_v54  ;;  %v8736_v53 = vld [vmem:[#allocation61_spill] sm:$0xff] }
 0x9f6   :  { %v5436_v45 = vpop.eup %5435  ;;  %5441 = vrcp.f32 %v2350_v59  ;;  %v2351_v60 = vadd.f32 1.0, %v5434_v33 }
 0x9f7   :  { %5443 = vrcp.f32 %v2348_v2  ;;  %v2349_v26 = vadd.f32 1.0, %v5436_v45  ;;  %v8738_v2 = vld [vmem:[#allocation63_spill] sm:$0xff] }
 0x9f8   :  { %5445 = vrcp.f32 %v2351_v60 }
 0x9f9   :  { %5447 = vrcp.f32 %v2349_v26  ;;  %v8739_v26 = vld [vmem:[#allocation64_spill] sm:$0xff] }
 0x9fa   :  { %5449 = vtanh.f32 %v7863_v1 }
 0x9fb   :  { %5451 = vtanh.f32 %v7860_v7 }
 0x9fe   :  { %v5438_v29 = vpop.eup %5437 }
 0x9ff   :  { %v5440_v37 = vpop.eup %5439 }
 0xa00   :  { %v5442_v30 = vpop.eup %5441 }
 0xa01   :  { %v5444_v41 = vpop.eup %5443  ;;  %v2398_v38 = vmul.f32 %v5442_v30, %v5438_v29 }
 0xa02   :  { %v5446_v47 = vpop.eup %5445  ;;  %v2396_v34 = vmul.f32 %v5444_v41, %v5440_v37  ;;  %v8740_v41 = vld [vmem:[#allocation65_spill] sm:$0xff] }
 0xa03   :  { %v5448_v61 = vpop.eup %5447 }
 0xa04   :  { %v5450_v22 = vpop.eup %5449 }
 0xa05   :  { %v5452_v14 = vpop.eup %5451  ;;  %v2397_v10 = vmul.f32 %v5450_v22, %v5448_v61 }
 0xa06   :  { %v2399_v8 = vmul.f32 %v5452_v14, %v5446_v47  ;;  %v8741_v14 = vld [vmem:[#allocation66_spill] sm:$0xff] }
 0xa07   :  { %v2401_v56 = vpack.c.bf16 %v2397_v10, %v2396_v34 }
 0xa08   :  { %v2402_v58 = vpack.c.bf16 %v2399_v8, %v2398_v38 }
 0xa09   :  { %4725 = vmatprep.subr.bf16.mxu1 %v2401_v56 }
 0xa0a   :  { %4726 = vmatpush3.bf16.msra.mxu1 %v2401_v56 }
 0xa0b   :  { %4727 = vmatprep.subr.bf16.mxu1 %v2402_v58 }
 0xa0e   :  { %4728 = vmatpush3.bf16.msra.mxu1 %v2402_v58 }
 0xa11   :  { %4730 = vmatmul.mubr.msk.bf16.vlgmr.msra.gmra.mrb[64].mxu1 %vm230_vm1, %v7871_v46 }
 0xa12   :  { %4733 = vmatprep.mubr.msk.bf16.mxu1 %vm230_vm1, %v7878_v62 }
 0xa19   :  { %4734 = vmatmul.mubr.msk.bf16.gmra.mrb[68].mxu1 %vm230_vm1, %v7885_v19 }
 0xa1a   :  { %4737 = vmatprep.mubr.msk.bf16.mxu1 %vm230_vm1, %v7892_v9 }
 0xa21   :  { %4738 = vmatmul.mubr.msk.bf16.gmra.mrb[72].mxu1 %vm230_vm1, %v7672_v43 }
 0xa22   :  { %4741 = vmatprep.mubr.msk.bf16.mxu1 %vm230_vm1, %v7679_v11 }
 0xa29   :  { %4742 = vmatmul.mubr.msk.bf16.gmra.mrb[76].mxu1 %vm230_vm1, %v7686_v31 }
 0xa2a   :  { %4769 = vmatprep.mubr.msk.bf16.mxu1 %vm230_vm1, %v7905_v0 }
 0xae4   :  { %v4731_v49 = vpop.f32.mrb[64].mxu1 }
 0xae5   :  { %v2466_v51 = vadd.f32 %v4731_v49, %v8734_v63  ;;  %v2457_v44 = vpop.f32.mrb[65].mxu1 }
 0xae6   :  { %v2458_v43 = vadd.f32 %v2457_v44, %v8735_v35  ;;  %v4732_v27 = vpop.f32.mrb[66].mxu1  ;;  %v8742_v44 = vld [vmem:[#allocation168_spill] sm:$0xff] }
 0xae7   :  { %v2522_v11 = vadd.f32 %v2466_v51, %v6534_v16  ;;  %v2469_v55 = vadd.f32 %v4732_v27, %v8736_v53  ;;  %v2460_v31 = vpop.f32.mrb[67].mxu1  ;;  %v8743_v53 = vld [vmem:[#allocation169_spill] sm:$0xff] }
 0xae8   :  { %v2520_v48 = vadd.f32 %v2458_v43, %v6378_v21  ;;  %v2461_v24 = vadd.f32 %v2460_v31, %v8737_v32 }
 0xae9   :  { %v4249_v28 = vmul.f32 -1.442695, %v2522_v11  ;;  %v2523_v25 = vadd.f32 %v2469_v55, %v6532_v42 }
 0xaea   :  { %v4247_v23 = vmul.f32 -1.442695, %v2520_v48  ;;  %v2521_v5 = vadd.f32 %v2461_v24, %v6376_v6  ;;  %v8744_v24 = vld [vmem:[#allocation170_spill] sm:$0xff] }
 0xaeb   :  { %5453 = vpow2.f32 %v4249_v28  ;;  %v4250_v57 = vmul.f32 -1.442695, %v2523_v25 }
 0xaec   :  { %5455 = vpow2.f32 %v4247_v23  ;;  %v4248_v59 = vmul.f32 -1.442695, %v2521_v5  ;;  %v4735_v33 = vpop.f32.mrb[68].mxu1 }
 0xaed   :  { %5457 = vpow2.f32 %v4250_v57  ;;  %v2482_v45 = vadd.f32 %v4735_v33, %v8738_v2  ;;  %v2473_v60 = vpop.f32.mrb[69].mxu1 }
 0xaee   :  { %5459 = vpow2.f32 %v4248_v59  ;;  %v2474_v29 = vadd.f32 %v2473_v60, %v8739_v26  ;;  %v4736_v37 = vpop.f32.mrb[70].mxu1  ;;  %v8745_v59 = vld [vmem:[#allocation171_spill] sm:$0xff] }
 0xaef   :  { %v2526_v30 = vadd.f32 %v2482_v45, %v6612_v15  ;;  %v2485_v47 = vadd.f32 %v4736_v37, %v8740_v41  ;;  %v2476_v61 = vpop.f32.mrb[71].mxu1 }
 0xaf0   :  { %v2524_v22 = vadd.f32 %v2474_v29, %v6456_v17  ;;  %v2477_v34 = vadd.f32 %v2476_v61, %v8741_v14  ;;  %v8747_v14 = vld [vmem:[#allocation173_spill] sm:$0xff] }
 0xaf1   :  { %v4253_v10 = vmul.f32 -1.442695, %v2526_v30  ;;  %v2527_v38 = vadd.f32 %v2485_v47, %v6610_v36  ;;  %v8746_v30 = vld [vmem:[#allocation172_spill] sm:$0xff] }
 0xaf2   :  { %v4251_v8 = vmul.f32 -1.442695, %v2524_v22  ;;  %v2525_v56 = vadd.f32 %v2477_v34, %v6454_v40 }
 0xaf3   :  { %5461 = vpow2.f32 %v4253_v10  ;;  %v4254_v58 = vmul.f32 -1.442695, %v2527_v38 }
 0xaf4   :  { %5463 = vpow2.f32 %v4251_v8  ;;  %v4252_v49 = vmul.f32 -1.442695, %v2525_v56  ;;  %v4739_v63 = vpop.f32.mrb[72].mxu1 }
 0xaf5   :  { %v5454_v51 = vpop.eup %5453  ;;  %5465 = vpow2.f32 %v4254_v58  ;;  %v2498_v35 = vadd.f32 %v4739_v63, %v8742_v44  ;;  %v2489_v43 = vpop.f32.mrb[73].mxu1  ;;  %v8748_v58 = vld [vmem:[#allocation174_spill] sm:$0xff] }
 0xaf6   :  { %v5456_v27 = vpop.eup %5455  ;;  %v2574_v11 = vadd.f32 1.0, %v5454_v51  ;;  %5467 = vpow2.f32 %v4252_v49  ;;  %v2490_v55 = vadd.f32 %v2489_v43, %v8743_v53  ;;  %v4740_v31 = vpop.f32.mrb[74].mxu1  ;;  %v8749_v43 = vld [vmem:[#allocation175_spill] sm:$0xff] }
 0xaf7   :  { %v5458_v48 = vpop.eup %5457  ;;  %v2572_v32 = vadd.f32 1.0, %v5456_v27  ;;  %v2501_v28 = vadd.f32 %v4740_v31, %v8744_v24  ;;  %v2492_v25 = vpop.f32.mrb[75].mxu1  ;;  %v2530_v57 = vadd.f32 %v2498_v35, %v7240_v20 }
 0xaf8   :  { %v5460_v23 = vpop.eup %5459  ;;  %5469 = vrcp.f32 %v2574_v11  ;;  %v2575_v5 = vadd.f32 1.0, %v5458_v48  ;;  %v2493_v33 = vadd.f32 %v2492_v25, %v8745_v59  ;;  %v2528_v45 = vadd.f32 %v2490_v55, %v7212_v50 }
 0xaf9   :  { %5471 = vrcp.f32 %v2572_v32  ;;  %v2573_v2 = vadd.f32 1.0, %v5460_v23  ;;  %v2531_v60 = vadd.f32 %v2501_v28, %v7243_v3 }
 0xafa   :  { %5473 = vrcp.f32 %v2575_v5  ;;  %v2529_v26 = vadd.f32 %v2493_v33, %v7218_v13 }
 0xafb   :  { %5475 = vrcp.f32 %v2573_v2 }
 0xafc   :  { %5477 = vtanh.f32 %v2530_v57  ;;  %v4743_v29 = vpop.f32.mrb[76].mxu1 }
 0xafd   :  { %v5462_v37 = vpop.eup %5461  ;;  %5479 = vtanh.f32 %v2528_v45  ;;  %v2514_v41 = vadd.f32 %v4743_v29, %v8746_v30  ;;  %v2505_v47 = vpop.f32.mrb[77].mxu1 }
 0xafe   :  { %v5464_v61 = vpop.eup %5463  ;;  %v2578_v22 = vadd.f32 1.0, %v5462_v37  ;;  %5481 = vtanh.f32 %v2531_v60  ;;  %v2506_v34 = vadd.f32 %v2505_v47, %v8747_v14  ;;  %v4744_v10 = vpop.f32.mrb[78].mxu1 }
 0xaff   :  { %v5466_v38 = vpop.eup %5465  ;;  %v2576_v8 = vadd.f32 1.0, %v5464_v61  ;;  %5483 = vtanh.f32 %v2529_v26  ;;  %v2534_v56 = vadd.f32 %v2514_v41, %v7254_v12  ;;  %v2517_v49 = vadd.f32 %v4744_v10, %v8748_v58  ;;  %v2508_v63 = vpop.f32.mrb[79].mxu1 }
 0xb00   :  { %v5468_v51 = vpop.eup %5467  ;;  %5485 = vrcp.f32 %v2578_v22  ;;  %v2579_v44 = vadd.f32 1.0, %v5466_v38  ;;  %v2532_v35 = vadd.f32 %v2506_v34, %v7226_v52  ;;  %v2509_v27 = vadd.f32 %v2508_v63, %v8749_v43 }
 0xb01   :  { %5487 = vrcp.f32 %v2576_v8  ;;  %v2577_v11 = vadd.f32 1.0, %v5468_v51  ;;  %v4257_v53 = vmul.f32 -1.442695, %v2534_v56  ;;  %v2535_v55 = vadd.f32 %v2517_v49, %v7259_v18 }
 0xb02   :  { %v5470_v31 = vpop.eup %5469  ;;  %5489 = vrcp.f32 %v2579_v44  ;;  %v4255_v48 = vmul.f32 -1.442695, %v2532_v35  ;;  %v2533_v32 = vadd.f32 %v2509_v27, %v7230_v4 }
 0xb03   :  { %v5472_v24 = vpop.eup %5471  ;;  %5491 = vrcp.f32 %v2577_v11  ;;  %v4258_v28 = vmul.f32 -1.442695, %v2535_v55 }
 0xb04   :  { %v5474_v25 = vpop.eup %5473  ;;  %5493 = vpow2.f32 %v4257_v53  ;;  %v4256_v23 = vmul.f32 -1.442695, %v2533_v32 }
 0xb05   :  { %v5476_v5 = vpop.eup %5475  ;;  %5495 = vpow2.f32 %v4255_v48 }
 0xb06   :  { %v5478_v57 = vpop.eup %5477  ;;  %5497 = vpow2.f32 %v4258_v28 }
 0xb07   :  { %v5480_v59 = vpop.eup %5479  ;;  %v2618_v33 = vmul.f32 %v5478_v57, %v5470_v31  ;;  %5499 = vpow2.f32 %v4256_v23  ;;  %v7975_v57 = vld [vmem:[%s8402_s3 + $0x30] sm:$0xff]  }
 0xb08   :  { %v5482_v2 = vpop.eup %5481  ;;  %v2616_v45 = vmul.f32 %v5480_v59, %v5472_v24  ;;  %v7982_v59 = vld [vmem:[%s8402_s3 + $0x38] sm:$0xff]  }
 0xb09   :  { %v5484_v60 = vpop.eup %5483  ;;  %v2619_v26 = vmul.f32 %v5482_v2, %v5474_v25  ;;  %v8750_v2 = vld [vmem:[#allocation67_spill] sm:$0xff] }
 0xb0a   :  { %v5486_v29 = vpop.eup %5485  ;;  %v2617_v37 = vmul.f32 %v5484_v60, %v5476_v5  ;;  %v7968_v5 = vld [vmem:[%s8402_s3 + $0x28] sm:$0xff]  }
 0xb0b   :  { %v5488_v30 = vpop.eup %5487  ;;  %v2614_v41 = vmul.f32 %v5486_v29, %v7855_v39 }
 0xb0c   :  { %v5490_v47 = vpop.eup %5489  ;;  %v2612_v61 = vmul.f32 %v5488_v30, %v7858_v54 }
 0xb0d   :  { %v5492_v22 = vpop.eup %5491  ;;  %v2615_v14 = vmul.f32 %v5490_v47, %v7860_v7  ;;  %v7944_v34 = vadd.f32 %v2618_v33, %v2614_v41  ;;  %v8752_v41 = vld [vmem:[#allocation69_spill] sm:$0xff] }
 0xb0e   :  { %v5494_v10 = vpop.eup %5493  ;;  %v2613_v38 = vmul.f32 %v5492_v22, %v7863_v1  ;;  %v7947_v8 = vadd.f32 %v2616_v45, %v2612_v61 }
 0xb0f   :  { %v5496_v56 = vpop.eup %5495  ;;  %v7949_v58 = vadd.f32 %v2619_v26, %v2615_v14  ;;  %v2582_v49 = vadd.f32 1.0, %v5494_v10  ;;  %5501 = vtanh.f32 %v7944_v34  ;;  %v8751_v26 = vld [vmem:[#allocation68_spill] sm:$0xff]  ;;  %v8753_v14 = vld [vmem:[#allocation70_spill] sm:$0xff] }
 0xb10   :  { %v5498_v39 = vpop.eup %5497  ;;  %v7952_v63 = vadd.f32 %v2617_v37, %v2613_v38  ;;  %v2580_v54 = vadd.f32 1.0, %v5496_v56  ;;  %5503 = vtanh.f32 %v7947_v8 }
 0xb11   :  { %v5500_v7 = vpop.eup %5499  ;;  %5505 = vrcp.f32 %v2582_v49  ;;  %v2583_v51 = vadd.f32 1.0, %v5498_v39 }
 0xb12   :  { %5507 = vrcp.f32 %v2580_v54  ;;  %v2581_v44 = vadd.f32 1.0, %v5500_v7 }
 0xb13   :  { %5509 = vrcp.f32 %v2583_v51 }
 0xb14   :  { %5511 = vrcp.f32 %v2581_v44  ;;  %v8754_v44 = vld [vmem:[#allocation71_spill] sm:$0xff] }
 0xb15   :  { %5513 = vtanh.f32 %v7952_v63 }
 0xb16   :  { %5515 = vtanh.f32 %v7949_v58 }
 0xb19   :  { %v5502_v1 = vpop.eup %5501 }
 0xb1a   :  { %v5504_v35 = vpop.eup %5503 }
 0xb1b   :  { %v5506_v43 = vpop.eup %5505 }
 0xb1c   :  { %v5508_v27 = vpop.eup %5507  ;;  %v2630_v24 = vmul.f32 %v5506_v43, %v5502_v1  ;;  %v8755_v43 = vld [vmem:[#allocation72_spill] sm:$0xff] }
 0xb1d   :  { %v5510_v11 = vpop.eup %5509  ;;  %v2628_v48 = vmul.f32 %v5508_v27, %v5504_v35 }
 0xb1e   :  { %v5512_v53 = vpop.eup %5511 }
 0xb1f   :  { %v5514_v55 = vpop.eup %5513 }
 0xb20   :  { %v5516_v31 = vpop.eup %5515  ;;  %v2629_v32 = vmul.f32 %v5514_v55, %v5512_v53  ;;  %v8756_v55 = vld [vmem:[#allocation73_spill] sm:$0xff] }
 0xb21   :  { %v2631_v28 = vmul.f32 %v5516_v31, %v5510_v11 }
 0xb22   :  { %v2633_v25 = vpack.c.bf16 %v2629_v32, %v2628_v48 }
 0xb23   :  { %v2634_v23 = vpack.c.bf16 %v2631_v28, %v2630_v24  ;;  %v8757_v24 = vld [vmem:[#allocation74_spill] sm:$0xff] }
 0xb24   :  { %4745 = vmatprep.subr.bf16.mxu0 %v2633_v25 }
 0xb25   :  { %4746 = vmatpush3.bf16.msra.mxu0 %v2633_v25 }
 0xb26   :  { %4747 = vmatprep.subr.bf16.mxu0 %v2634_v23 }
 0xb29   :  { %4748 = vmatpush3.bf16.msra.mxu0 %v2634_v23 }
 0xb2c   :  { %4750 = vmatmul.mubr.msk.bf16.vlgmr.msra.gmra.mrb[80].mxu0 %vm230_vm1, %v7871_v46 }
 0xb2d   :  { %4753 = vmatprep.mubr.msk.bf16.mxu0 %vm230_vm1, %v7878_v62 }
 0xb34   :  { %4754 = vmatmul.mubr.msk.bf16.gmra.mrb[84].mxu0 %vm230_vm1, %v7885_v19 }
 0xb35   :  { %4757 = vmatprep.mubr.msk.bf16.mxu0 %vm230_vm1, %v7892_v9 }
 0xb3c   :  { %4758 = vmatmul.mubr.msk.bf16.gmra.mrb[88].mxu0 %vm230_vm1, %v7968_v5 }
 0xb3d   :  { %4761 = vmatprep.mubr.msk.bf16.mxu0 %vm230_vm1, %v7975_v57 }
 0xb44   :  { %4762 = vmatmul.mubr.msk.bf16.gmra.mrb[92].mxu0 %vm230_vm1, %v7982_v59 }
 0xb45   :  { %4789 = vmatprep.mubr.msk.bf16.mxu0 %vm230_vm1, %v7905_v0 }
 0xbff   :  { %v4751_v33 = vpop.f32.mrb[80].mxu0 }
 0xc00   :  { %v2698_v45 = vadd.f32 %v4751_v33, %v8750_v2  ;;  %v2689_v60 = vpop.f32.mrb[81].mxu0 }
 0xc01   :  { %v2690_v29 = vadd.f32 %v2689_v60, %v8751_v26  ;;  %v4752_v37 = vpop.f32.mrb[82].mxu0 }
 0xc02   :  { %v2754_v30 = vadd.f32 %v2698_v45, %v6534_v16  ;;  %v2701_v47 = vadd.f32 %v4752_v37, %v8752_v41  ;;  %v2692_v61 = vpop.f32.mrb[83].mxu0  ;;  %v8758_v37 = vld [vmem:[#allocation176_spill] sm:$0xff] }
 0xc03   :  { %v2752_v22 = vadd.f32 %v2690_v29, %v6378_v21  ;;  %v2693_v10 = vadd.f32 %v2692_v61, %v8753_v14 }
 0xc04   :  { %v4270_v38 = vmul.f32 -1.442695, %v2754_v30  ;;  %v2755_v56 = vadd.f32 %v2701_v47, %v6532_v42 }
 0xc05   :  { %v4268_v49 = vmul.f32 -1.442695, %v2752_v22  ;;  %v2753_v39 = vadd.f32 %v2693_v10, %v6376_v6  ;;  %v8759_v22 = vld [vmem:[#allocation177_spill] sm:$0xff] }
 0xc06   :  { %5517 = vpow2.f32 %v4270_v38  ;;  %v4271_v54 = vmul.f32 -1.442695, %v2755_v56 }
 0xc07   :  { %5519 = vpow2.f32 %v4268_v49  ;;  %v4269_v7 = vmul.f32 -1.442695, %v2753_v39  ;;  %v4755_v51 = vpop.f32.mrb[84].mxu0  ;;  %v8760_v49 = vld [vmem:[#allocation178_spill] sm:$0xff] }
 0xc08   :  { %5521 = vpow2.f32 %v4271_v54  ;;  %v2714_v1 = vadd.f32 %v4755_v51, %v8754_v44  ;;  %v2705_v35 = vpop.f32.mrb[85].mxu0 }
 0xc09   :  { %5523 = vpow2.f32 %v4269_v7  ;;  %v2706_v27 = vadd.f32 %v2705_v35, %v8755_v43  ;;  %v4756_v11 = vpop.f32.mrb[86].mxu0 }
 0xc0a   :  { %v2758_v53 = vadd.f32 %v2714_v1, %v6612_v15  ;;  %v2717_v31 = vadd.f32 %v4756_v11, %v8756_v55  ;;  %v2708_v48 = vpop.f32.mrb[87].mxu0  ;;  %v8761_v1 = vld [vmem:[#allocation179_spill] sm:$0xff] }
 0xc0b   :  { %v2756_v32 = vadd.f32 %v2706_v27, %v6456_v17  ;;  %v2709_v28 = vadd.f32 %v2708_v48, %v8757_v24  ;;  %v8762_v48 = vld [vmem:[#allocation180_spill] sm:$0xff] }
 0xc0c   :  { %v4274_v25 = vmul.f32 -1.442695, %v2758_v53  ;;  %v2759_v23 = vadd.f32 %v2717_v31, %v6610_v36 }
 0xc0d   :  { %v4272_v33 = vmul.f32 -1.442695, %v2756_v32  ;;  %v2757_v2 = vadd.f32 %v2709_v28, %v6454_v40 }
 0xc0e   :  { %5525 = vpow2.f32 %v4274_v25  ;;  %v4275_v45 = vmul.f32 -1.442695, %v2759_v23  ;;  %v8763_v23 = vld [vmem:[#allocation181_spill] sm:$0xff] }
 0xc0f   :  { %5527 = vpow2.f32 %v4272_v33  ;;  %v4273_v60 = vmul.f32 -1.442695, %v2757_v2  ;;  %v4759_v26 = vpop.f32.mrb[88].mxu0 }
 0xc10   :  { %v5518_v29 = vpop.eup %5517  ;;  %5529 = vpow2.f32 %v4275_v45  ;;  %v2730_v30 = vadd.f32 %v4759_v26, %v8758_v37  ;;  %v2721_v41 = vpop.f32.mrb[89].mxu0 }
 0xc11   :  { %v5520_v47 = vpop.eup %5519  ;;  %v2806_v61 = vadd.f32 1.0, %v5518_v29  ;;  %5531 = vpow2.f32 %v4273_v60  ;;  %v2722_v14 = vadd.f32 %v2721_v41, %v8759_v22  ;;  %v4760_v10 = vpop.f32.mrb[90].mxu0  ;;  %v8764_v29 = vld [vmem:[#allocation182_spill] sm:$0xff]  ;;  %v8765_v22 = vld [vmem:[#allocation183_spill] sm:$0xff] }
 0xc12   :  { %v5522_v38 = vpop.eup %5521  ;;  %v2804_v56 = vadd.f32 1.0, %v5520_v47  ;;  %v2733_v39 = vadd.f32 %v4760_v10, %v8760_v49  ;;  %v2724_v54 = vpop.f32.mrb[91].mxu0  ;;  %v2762_v44 = vadd.f32 %v2730_v30, %v7240_v20 }
 0xc13   :  { %v5524_v7 = vpop.eup %5523  ;;  %5533 = vrcp.f32 %v2806_v61  ;;  %v2807_v51 = vadd.f32 1.0, %v5522_v38  ;;  %v2725_v35 = vadd.f32 %v2724_v54, %v8761_v1  ;;  %v2760_v27 = vadd.f32 %v2722_v14, %v7212_v50 }
 0xc14   :  { %5535 = vrcp.f32 %v2804_v56  ;;  %v2805_v43 = vadd.f32 1.0, %v5524_v7  ;;  %v2763_v11 = vadd.f32 %v2733_v39, %v7243_v3 }
 0xc15   :  { %5537 = vrcp.f32 %v2807_v51  ;;  %v2761_v53 = vadd.f32 %v2725_v35, %v7218_v13 }
 0xc16   :  { %5539 = vrcp.f32 %v2805_v43 }
 0xc17   :  { %5541 = vtanh.f32 %v2762_v44  ;;  %v4763_v55 = vpop.f32.mrb[92].mxu0 }
 0xc18   :  { %v5526_v31 = vpop.eup %5525  ;;  %5543 = vtanh.f32 %v2760_v27  ;;  %v2746_v32 = vadd.f32 %v4763_v55, %v8762_v48  ;;  %v2737_v24 = vpop.f32.mrb[93].mxu0 }
 0xc19   :  { %v5528_v28 = vpop.eup %5527  ;;  %v2810_v25 = vadd.f32 1.0, %v5526_v31  ;;  %5545 = vtanh.f32 %v2763_v11  ;;  %v2738_v33 = vadd.f32 %v2737_v24, %v8763_v23  ;;  %v4764_v2 = vpop.f32.mrb[94].mxu0 }
 0xc1a   :  { %v5530_v45 = vpop.eup %5529  ;;  %v2808_v60 = vadd.f32 1.0, %v5528_v28  ;;  %5547 = vtanh.f32 %v2761_v53  ;;  %v2766_v26 = vadd.f32 %v2746_v32, %v7254_v12  ;;  %v2749_v37 = vadd.f32 %v4764_v2, %v8764_v29  ;;  %v2740_v30 = vpop.f32.mrb[95].mxu0 }
 0xc1b   :  { %v5532_v41 = vpop.eup %5531  ;;  %5549 = vrcp.f32 %v2810_v25  ;;  %v2811_v47 = vadd.f32 1.0, %v5530_v45  ;;  %v2764_v61 = vadd.f32 %v2738_v33, %v7226_v52  ;;  %v2741_v14 = vadd.f32 %v2740_v30, %v8765_v22 }
 0xc1c   :  { %5551 = vrcp.f32 %v2808_v60  ;;  %v2809_v10 = vadd.f32 1.0, %v5532_v41  ;;  %v4278_v38 = vmul.f32 -1.442695, %v2766_v26  ;;  %v2767_v56 = vadd.f32 %v2749_v37, %v7259_v18 }
 0xc1d   :  { %v5534_v49 = vpop.eup %5533  ;;  %5553 = vrcp.f32 %v2811_v47  ;;  %v4276_v39 = vmul.f32 -1.442695, %v2764_v61  ;;  %v2765_v54 = vadd.f32 %v2741_v14, %v7230_v4 }
 0xc1e   :  { %v5536_v7 = vpop.eup %5535  ;;  %5555 = vrcp.f32 %v2809_v10  ;;  %v4279_v51 = vmul.f32 -1.442695, %v2767_v56 }
 0xc1f   :  { %v5538_v44 = vpop.eup %5537  ;;  %5557 = vpow2.f32 %v4278_v38  ;;  %v4277_v1 = vmul.f32 -1.442695, %v2765_v54 }
 0xc20   :  { %v5540_v35 = vpop.eup %5539  ;;  %5559 = vpow2.f32 %v4276_v39 }
 0xc21   :  { %v5542_v43 = vpop.eup %5541  ;;  %5561 = vpow2.f32 %v4279_v51 }
 0xc22   :  { %v5544_v27 = vpop.eup %5543  ;;  %v2850_v11 = vmul.f32 %v5542_v43, %v5534_v49  ;;  %5563 = vpow2.f32 %v4277_v1 }
 0xc23   :  { %v5546_v53 = vpop.eup %5545  ;;  %v2848_v55 = vmul.f32 %v5544_v27, %v5536_v7 }
 0xc24   :  { %v5548_v31 = vpop.eup %5547  ;;  %v2851_v48 = vmul.f32 %v5546_v53, %v5538_v44  ;;  %v8766_v53 = vld [vmem:[#allocation75_spill] sm:$0xff] }
 0xc25   :  { %v5550_v32 = vpop.eup %5549  ;;  %v2849_v24 = vmul.f32 %v5548_v31, %v5540_v35 }
 0xc26   :  { %v5552_v28 = vpop.eup %5551  ;;  %v2846_v25 = vmul.f32 %v5550_v32, %v7944_v34 }
 0xc27   :  { %v5554_v23 = vpop.eup %5553  ;;  %v2844_v33 = vmul.f32 %v5552_v28, %v7947_v8 }
 0xc28   :  { %v5556_v2 = vpop.eup %5555  ;;  %v2847_v45 = vmul.f32 %v5554_v23, %v7949_v58  ;;  %v8023_v60 = vadd.f32 %v2850_v11, %v2846_v25  ;;  %v8768_v25 = vld [vmem:[#allocation77_spill] sm:$0xff] }
 0xc29   :  { %v5558_v26 = vpop.eup %5557  ;;  %v2845_v29 = vmul.f32 %v5556_v2, %v7952_v63  ;;  %v8026_v37 = vadd.f32 %v2848_v55, %v2844_v33 }
 0xc2a   :  { %v5560_v30 = vpop.eup %5559  ;;  %v8028_v41 = vadd.f32 %v2851_v48, %v2847_v45  ;;  %v2814_v47 = vadd.f32 1.0, %v5558_v26  ;;  %5565 = vtanh.f32 %v8023_v60  ;;  %v8767_v48 = vld [vmem:[#allocation76_spill] sm:$0xff]  ;;  %v8769_v45 = vld [vmem:[#allocation78_spill] sm:$0xff] }
 0xc2b   :  { %v5562_v34 = vpop.eup %5561  ;;  %v8031_v61 = vadd.f32 %v2849_v24, %v2845_v29  ;;  %v2812_v8 = vadd.f32 1.0, %v5560_v30  ;;  %5567 = vtanh.f32 %v8026_v37 }
 0xc2c   :  { %v5564_v58 = vpop.eup %5563  ;;  %5569 = vrcp.f32 %v2814_v47  ;;  %v2815_v22 = vadd.f32 1.0, %v5562_v34 }
 0xc2d   :  { %5571 = vrcp.f32 %v2812_v8  ;;  %v2813_v14 = vadd.f32 1.0, %v5564_v58 }
 0xc2e   :  { %5573 = vrcp.f32 %v2815_v22 }
 0xc2f   :  { %5575 = vrcp.f32 %v2813_v14  ;;  %v8770_v14 = vld [vmem:[#allocation79_spill] sm:$0xff] }
 0xc30   :  { %5577 = vtanh.f32 %v8031_v61 }
 0xc31   :  { %5579 = vtanh.f32 %v8028_v41 }
 0xc34   :  { %v5566_v63 = vpop.eup %5565 }
 0xc35   :  { %v5568_v10 = vpop.eup %5567 }
 0xc36   :  { %v5570_v38 = vpop.eup %5569 }
 0xc37   :  { %v5572_v56 = vpop.eup %5571  ;;  %v2862_v1 = vmul.f32 %v5570_v38, %v5566_v63  ;;  %v8771_v38 = vld [vmem:[#allocation80_spill] sm:$0xff] }
 0xc38   :  { %v5574_v49 = vpop.eup %5573  ;;  %v2860_v51 = vmul.f32 %v5572_v56, %v5568_v10 }
 0xc39   :  { %v5576_v39 = vpop.eup %5575 }
 0xc3a   :  { %v5578_v54 = vpop.eup %5577 }
 0xc3b   :  { %v5580_v7 = vpop.eup %5579  ;;  %v2861_v44 = vmul.f32 %v5578_v54, %v5576_v39  ;;  %v8772_v54 = vld [vmem:[#allocation81_spill] sm:$0xff] }
 0xc3c   :  { %v2863_v35 = vmul.f32 %v5580_v7, %v5574_v49 }
 0xc3d   :  { %v2865_v43 = vpack.c.bf16 %v2861_v44, %v2860_v51 }
 0xc3e   :  { %v2866_v27 = vpack.c.bf16 %v2863_v35, %v2862_v1  ;;  %v8773_v1 = vld [vmem:[#allocation82_spill] sm:$0xff] }
 0xc3f   :  { %4765 = vmatprep.subr.bf16.mxu1 %v2865_v43 }
 0xc40   :  { %4766 = vmatpush3.bf16.msra.mxu1 %v2865_v43 }
 0xc41   :  { %4767 = vmatprep.subr.bf16.mxu1 %v2866_v27 }
 0xc44   :  { %4768 = vmatpush3.bf16.msra.mxu1 %v2866_v27 }
 0xc47   :  { %4770 = vmatmul.mubr.msk.bf16.vlgmr.msra.gmra.mrb[80].mxu1 %vm230_vm1, %v7871_v46 }
 0xc48   :  { %4773 = vmatprep.mubr.msk.bf16.mxu1 %vm230_vm1, %v7878_v62 }
 0xc4f   :  { %4774 = vmatmul.mubr.msk.bf16.gmra.mrb[84].mxu1 %vm230_vm1, %v7885_v19 }
 0xc50   :  { %4777 = vmatprep.mubr.msk.bf16.mxu1 %vm230_vm1, %v7892_v9 }
 0xc57   :  { %4778 = vmatmul.mubr.msk.bf16.gmra.mrb[88].mxu1 %vm230_vm1, %v7968_v5 }
 0xc58   :  { %4781 = vmatprep.mubr.msk.bf16.mxu1 %vm230_vm1, %v7975_v57 }
 0xc5f   :  { %4782 = vmatmul.mubr.msk.bf16.gmra.mrb[92].mxu1 %vm230_vm1, %v7982_v59 }
 0xc60   :  { %4809 = vmatprep.mubr.msk.bf16.mxu1 %vm230_vm1, %v7905_v0 }
 0xd1a   :  { %v4771_v11 = vpop.f32.mrb[80].mxu1 }
 0xd1b   :  { %v2930_v55 = vadd.f32 %v4771_v11, %v8766_v53  ;;  %v2921_v31 = vpop.f32.mrb[81].mxu1 }
 0xd1c   :  { %v2922_v32 = vadd.f32 %v2921_v31, %v8767_v48  ;;  %v4772_v24 = vpop.f32.mrb[82].mxu1 }
 0xd1d   :  { %v2986_v28 = vadd.f32 %v2930_v55, %v6534_v16  ;;  %v2933_v23 = vadd.f32 %v4772_v24, %v8768_v25  ;;  %v2924_v33 = vpop.f32.mrb[83].mxu1  ;;  %v8774_v24 = vld [vmem:[#allocation184_spill] sm:$0xff] }
 0xd1e   :  { %v2984_v2 = vadd.f32 %v2922_v32, %v6378_v21  ;;  %v2925_v26 = vadd.f32 %v2924_v33, %v8769_v45 }
 0xd1f   :  { %v4291_v29 = vmul.f32 -1.442695, %v2986_v28  ;;  %v2987_v30 = vadd.f32 %v2933_v23, %v6532_v42 }
 0xd20   :  { %v4289_v47 = vmul.f32 -1.442695, %v2984_v2  ;;  %v2985_v34 = vadd.f32 %v2925_v26, %v6376_v6  ;;  %v8775_v2 = vld [vmem:[#allocation185_spill] sm:$0xff] }
 0xd21   :  { %5581 = vpow2.f32 %v4291_v29  ;;  %v4292_v8 = vmul.f32 -1.442695, %v2987_v30 }
 0xd22   :  { %5583 = vpow2.f32 %v4289_v47  ;;  %v4290_v58 = vmul.f32 -1.442695, %v2985_v34  ;;  %v4775_v22 = vpop.f32.mrb[84].mxu1  ;;  %v8776_v47 = vld [vmem:[#allocation186_spill] sm:$0xff] }
 0xd23   :  { %5585 = vpow2.f32 %v4292_v8  ;;  %v2946_v63 = vadd.f32 %v4775_v22, %v8770_v14  ;;  %v2937_v10 = vpop.f32.mrb[85].mxu1 }
 0xd24   :  { %5587 = vpow2.f32 %v4290_v58  ;;  %v2938_v56 = vadd.f32 %v2937_v10, %v8771_v38  ;;  %v4776_v49 = vpop.f32.mrb[86].mxu1 }
 0xd25   :  { %v2990_v39 = vadd.f32 %v2946_v63, %v6612_v15  ;;  %v2949_v7 = vadd.f32 %v4776_v49, %v8772_v54  ;;  %v2940_v51 = vpop.f32.mrb[87].mxu1  ;;  %v8777_v63 = vld [vmem:[#allocation187_spill] sm:$0xff] }
 0xd26   :  { %v2988_v44 = vadd.f32 %v2938_v56, %v6456_v17  ;;  %v2941_v35 = vadd.f32 %v2940_v51, %v8773_v1  ;;  %v8778_v51 = vld [vmem:[#allocation188_spill] sm:$0xff] }
 0xd27   :  { %v4295_v43 = vmul.f32 -1.442695, %v2990_v39  ;;  %v2991_v27 = vadd.f32 %v2949_v7, %v6610_v36 }
 0xd28   :  { %v4293_v11 = vmul.f32 -1.442695, %v2988_v44  ;;  %v2989_v53 = vadd.f32 %v2941_v35, %v6454_v40 }
 0xd29   :  { %5589 = vpow2.f32 %v4295_v43  ;;  %v4296_v55 = vmul.f32 -1.442695, %v2991_v27  ;;  %v8779_v27 = vld [vmem:[#allocation189_spill] sm:$0xff] }
 0xd2a   :  { %5591 = vpow2.f32 %v4293_v11  ;;  %v4294_v31 = vmul.f32 -1.442695, %v2989_v53  ;;  %v4779_v48 = vpop.f32.mrb[88].mxu1 }
 0xd2b   :  { %v5582_v32 = vpop.eup %5581  ;;  %5593 = vpow2.f32 %v4296_v55  ;;  %v2962_v28 = vadd.f32 %v4779_v48, %v8774_v24  ;;  %v2953_v25 = vpop.f32.mrb[89].mxu1 }
 0xd2c   :  { %v5584_v23 = vpop.eup %5583  ;;  %v3038_v33 = vadd.f32 1.0, %v5582_v32  ;;  %5595 = vpow2.f32 %v4294_v31  ;;  %v2954_v45 = vadd.f32 %v2953_v25, %v8775_v2  ;;  %v4780_v26 = vpop.f32.mrb[90].mxu1  ;;  %v8780_v32 = vld [vmem:[#allocation190_spill] sm:$0xff]  ;;  %v8781_v2 = vld [vmem:[#allocation191_spill] sm:$0xff] }
 0xd2d   :  { %v5586_v29 = vpop.eup %5585  ;;  %v3036_v30 = vadd.f32 1.0, %v5584_v23  ;;  %v2965_v34 = vadd.f32 %v4780_v26, %v8776_v47  ;;  %v2956_v8 = vpop.f32.mrb[91].mxu1  ;;  %v2994_v14 = vadd.f32 %v2962_v28, %v7240_v20 }
 0xd2e   :  { %v5588_v58 = vpop.eup %5587  ;;  %5597 = vrcp.f32 %v3038_v33  ;;  %v3039_v22 = vadd.f32 1.0, %v5586_v29  ;;  %v2957_v10 = vadd.f32 %v2956_v8, %v8777_v63  ;;  %v2992_v56 = vadd.f32 %v2954_v45, %v7212_v50 }
 0xd2f   :  { %5599 = vrcp.f32 %v3036_v30  ;;  %v3037_v38 = vadd.f32 1.0, %v5588_v58  ;;  %v2995_v49 = vadd.f32 %v2965_v34, %v7243_v3 }
 0xd30   :  { %5601 = vrcp.f32 %v3039_v22  ;;  %v2993_v39 = vadd.f32 %v2957_v10, %v7218_v13 }
 0xd31   :  { %5603 = vrcp.f32 %v3037_v38 }
 0xd32   :  { %5605 = vtanh.f32 %v2994_v14  ;;  %v4783_v54 = vpop.f32.mrb[92].mxu1 }
 0xd33   :  { %v5590_v7 = vpop.eup %5589  ;;  %5607 = vtanh.f32 %v2992_v56  ;;  %v2978_v44 = vadd.f32 %v4783_v54, %v8778_v51  ;;  %v2969_v1 = vpop.f32.mrb[93].mxu1 }
 0xd34   :  { %v5592_v35 = vpop.eup %5591  ;;  %v3042_v43 = vadd.f32 1.0, %v5590_v7  ;;  %5609 = vtanh.f32 %v2995_v49  ;;  %v2970_v11 = vadd.f32 %v2969_v1, %v8779_v27  ;;  %v4784_v53 = vpop.f32.mrb[94].mxu1 }
 0xd35   :  { %v5594_v55 = vpop.eup %5593  ;;  %v3040_v31 = vadd.f32 1.0, %v5592_v35  ;;  %5611 = vtanh.f32 %v2993_v39  ;;  %v2998_v48 = vadd.f32 %v2978_v44, %v7254_v12  ;;  %v2981_v24 = vadd.f32 %v4784_v53, %v8780_v32  ;;  %v2972_v28 = vpop.f32.mrb[95].mxu1 }
 0xd36   :  { %v5596_v25 = vpop.eup %5595  ;;  %5613 = vrcp.f32 %v3042_v43  ;;  %v3043_v23 = vadd.f32 1.0, %v5594_v55  ;;  %v2996_v33 = vadd.f32 %v2970_v11, %v7226_v52  ;;  %v2973_v45 = vadd.f32 %v2972_v28, %v8781_v2 }
 0xd37   :  { %5615 = vrcp.f32 %v3040_v31  ;;  %v3041_v26 = vadd.f32 1.0, %v5596_v25  ;;  %v4299_v29 = vmul.f32 -1.442695, %v2998_v48  ;;  %v2999_v30 = vadd.f32 %v2981_v24, %v7259_v18 }
 0xd38   :  { %v5598_v47 = vpop.eup %5597  ;;  %5617 = vrcp.f32 %v3043_v23  ;;  %v4297_v34 = vmul.f32 -1.442695, %v2996_v33  ;;  %v2997_v8 = vadd.f32 %v2973_v45, %v7230_v4 }
 0xd39   :  { %v5600_v58 = vpop.eup %5599  ;;  %5619 = vrcp.f32 %v3041_v26  ;;  %v4300_v22 = vmul.f32 -1.442695, %v2999_v30 }
 0xd3a   :  { %v5602_v14 = vpop.eup %5601  ;;  %5621 = vpow2.f32 %v4299_v29  ;;  %v4298_v63 = vmul.f32 -1.442695, %v2997_v8 }
 0xd3b   :  { %v5604_v10 = vpop.eup %5603  ;;  %5623 = vpow2.f32 %v4297_v34 }
 0xd3c   :  { %v5606_v38 = vpop.eup %5605  ;;  %5625 = vpow2.f32 %v4300_v22 }
 0xd3d   :  { %v5608_v56 = vpop.eup %5607  ;;  %v3082_v49 = vmul.f32 %v5606_v38, %v5598_v47  ;;  %5627 = vpow2.f32 %v4298_v63 }
 0xd3e   :  { %v5610_v39 = vpop.eup %5609  ;;  %v3080_v54 = vmul.f32 %v5608_v56, %v5600_v58 }
 0xd3f   :  { %v5612_v7 = vpop.eup %5611  ;;  %v3083_v51 = vmul.f32 %v5610_v39, %v5602_v14 }
 0xd40   :  { %v5614_v44 = vpop.eup %5613  ;;  %v3081_v1 = vmul.f32 %v5612_v7, %v5604_v10 }
 0xd41   :  { %v5616_v35 = vpop.eup %5615  ;;  %v3078_v43 = vmul.f32 %v5614_v44, %v8023_v60 }
 0xd42   :  { %v5618_v27 = vpop.eup %5617  ;;  %v3076_v11 = vmul.f32 %v5616_v35, %v8026_v37 }
 0xd43   :  { %v5620_v53 = vpop.eup %5619  ;;  %v3079_v55 = vmul.f32 %v5618_v27, %v8028_v41  ;;  %v8087_v31 = vadd.f32 %v3082_v49, %v3078_v43  ;;  %v8785_v43 = vld [vmem:[#allocation86_spill] sm:$0xff] }
 0xd44   :  { %v5622_v48 = vpop.eup %5621  ;;  %v3077_v32 = vmul.f32 %v5620_v53, %v8031_v61  ;;  %v8090_v24 = vadd.f32 %v3080_v54, %v3076_v11 }
 0xd45   :  { %v5624_v28 = vpop.eup %5623  ;;  %v8092_v25 = vadd.f32 %v3083_v51, %v3079_v55  ;;  %v3046_v23 = vadd.f32 1.0, %v5622_v48  ;;  %5629 = vtanh.f32 %v8087_v31  ;;  %v8784_v51 = vld [vmem:[#allocation85_spill] sm:$0xff] }
 0xd46   :  { %v5626_v60 = vpop.eup %5625  ;;  %v8095_v33 = vadd.f32 %v3081_v1, %v3077_v32  ;;  %v3044_v37 = vadd.f32 1.0, %v5624_v28  ;;  %5631 = vtanh.f32 %v8090_v24 }
 0xd47   :  { %v5628_v41 = vpop.eup %5627  ;;  %5633 = vrcp.f32 %v3046_v23  ;;  %v3047_v2 = vadd.f32 1.0, %v5626_v60  ;;  %v8786_v23 = vld [vmem:[#allocation87_spill] sm:$0xff] }
 0xd48   :  { %5635 = vrcp.f32 %v3044_v37  ;;  %v3045_v45 = vadd.f32 1.0, %v5628_v41  ;;  %v8787_v41 = vld [vmem:[#allocation88_spill] sm:$0xff] }
 0xd49   :  { %5637 = vrcp.f32 %v3047_v2 }
 0xd4a   :  { %5639 = vrcp.f32 %v3045_v45 }
 0xd4b   :  { %5641 = vtanh.f32 %v8095_v33 }
 0xd4c   :  { %5643 = vtanh.f32 %v8092_v25 }
 0xd4f   :  { %v5630_v61 = vpop.eup %5629 }
 0xd50   :  { %v5632_v26 = vpop.eup %5631 }
 0xd51   :  { %v5634_v29 = vpop.eup %5633 }
 0xd52   :  { %v5636_v30 = vpop.eup %5635  ;;  %v3094_v63 = vmul.f32 %v5634_v29, %v5630_v61 }
 0xd53   :  { %v5638_v47 = vpop.eup %5637  ;;  %v3092_v22 = vmul.f32 %v5636_v30, %v5632_v26  ;;  %v8788_v26 = vld [vmem:[#allocation89_spill] sm:$0xff] }
 0xd54   :  { %v5640_v34 = vpop.eup %5639 }
 0xd55   :  { %v5642_v8 = vpop.eup %5641 }
 0xd56   :  { %v5644_v58 = vpop.eup %5643  ;;  %v3093_v14 = vmul.f32 %v5642_v8, %v5640_v34  ;;  %v8789_v34 = vld [vmem:[#allocation90_spill] sm:$0xff] }
 0xd57   :  { %v3095_v10 = vmul.f32 %v5644_v58, %v5638_v47 }
 0xd58   :  { %v3097_v38 = vpack.c.bf16 %v3093_v14, %v3092_v22 }
 0xd59   :  { %v3098_v56 = vpack.c.bf16 %v3095_v10, %v3094_v63 }
 0xd5a   :  { %4785 = vmatprep.subr.bf16.mxu0 %v3097_v38 }
 0xd5b   :  { %4786 = vmatpush3.bf16.msra.mxu0 %v3097_v38 }
 0xd5c   :  { %4787 = vmatprep.subr.bf16.mxu0 %v3098_v56 }
 0xd5f   :  { %4788 = vmatpush3.bf16.msra.mxu0 %v3098_v56 }
 0xd62   :  { %4790 = vmatmul.mubr.msk.bf16.vlgmr.msra.gmra.mrb[96].mxu0 %vm230_vm1, %v7871_v46 }
 0xd63   :  { %4793 = vmatprep.mubr.msk.bf16.mxu0 %vm230_vm1, %v7878_v62  ;;  %v8782_v62 = vld [vmem:[#allocation83_spill] sm:$0xff] }
 0xd6a   :  { %4794 = vmatmul.mubr.msk.bf16.gmra.mrb[100].mxu0 %vm230_vm1, %v7885_v19  ;;  %v8783_v19 = vld [vmem:[#allocation84_spill] sm:$0xff] }
 0xd6b   :  { %4797 = vmatprep.mubr.msk.bf16.mxu0 %vm230_vm1, %v7892_v9 }
 0xd72   :  { %4798 = vmatmul.mubr.msk.bf16.gmra.mrb[104].mxu0 %vm230_vm1, %v7968_v5 }
 0xd73   :  { %4801 = vmatprep.mubr.msk.bf16.mxu0 %vm230_vm1, %v7975_v57 }
 0xd7a   :  { %4802 = vmatmul.mubr.msk.bf16.gmra.mrb[108].mxu0 %vm230_vm1, %v7982_v59 }
 0xd7b   :  { %4829 = vmatprep.mubr.msk.bf16.mxu0 %vm230_vm1, %v7905_v0 }
 0xe35   :  { %v4791_v46 = vpop.f32.mrb[96].mxu0 }
 0xe36   :  { %v3162_v49 = vadd.f32 %v4791_v46, %v8782_v62  ;;  %v3153_v39 = vpop.f32.mrb[97].mxu0  ;;  %v8790_v62 = vld [vmem:[#allocation192_spill] sm:$0xff] }
 0xe37   :  { %v3154_v54 = vadd.f32 %v3153_v39, %v8783_v19  ;;  %v4792_v7 = vpop.f32.mrb[98].mxu0 }
 0xe38   :  { %v3218_v9 = vadd.f32 %v3162_v49, %v6534_v16  ;;  %v3165_v44 = vadd.f32 %v4792_v7, %v8784_v51  ;;  %v3156_v1 = vpop.f32.mrb[99].mxu0  ;;  %v8791_v7 = vld [vmem:[#allocation193_spill] sm:$0xff] }
 0xe39   :  { %v3216_v35 = vadd.f32 %v3154_v54, %v6378_v21  ;;  %v3157_v27 = vadd.f32 %v3156_v1, %v8785_v43 }
 0xe3a   :  { %v4312_v11 = vmul.f32 -1.442695, %v3218_v9  ;;  %v3219_v53 = vadd.f32 %v3165_v44, %v6532_v42 }
 0xe3b   :  { %v4310_v0 = vmul.f32 -1.442695, %v3216_v35  ;;  %v3217_v55 = vadd.f32 %v3157_v27, %v6376_v6  ;;  %v8792_v35 = vld [vmem:[#allocation194_spill] sm:$0xff] }
 0xe3c   :  { %5645 = vpow2.f32 %v4312_v11  ;;  %v4313_v48 = vmul.f32 -1.442695, %v3219_v53 }
 0xe3d   :  { %5647 = vpow2.f32 %v4310_v0  ;;  %v4311_v32 = vmul.f32 -1.442695, %v3217_v55  ;;  %v4795_v28 = vpop.f32.mrb[100].mxu0  ;;  %v8793_v55 = vld [vmem:[#allocation195_spill] sm:$0xff] }
 0xe3e   :  { %5649 = vpow2.f32 %v4313_v48  ;;  %v3178_v60 = vadd.f32 %v4795_v28, %v8786_v23  ;;  %v3169_v37 = vpop.f32.mrb[101].mxu0 }
 0xe3f   :  { %5651 = vpow2.f32 %v4311_v32  ;;  %v3170_v2 = vadd.f32 %v3169_v37, %v8787_v41  ;;  %v4796_v45 = vpop.f32.mrb[102].mxu0 }
 0xe40   :  { %v3222_v61 = vadd.f32 %v3178_v60, %v6612_v15  ;;  %v3181_v29 = vadd.f32 %v4796_v45, %v8788_v26  ;;  %v3172_v30 = vpop.f32.mrb[103].mxu0 }
 0xe41   :  { %v3220_v47 = vadd.f32 %v3170_v2, %v6456_v17  ;;  %v3173_v8 = vadd.f32 %v3172_v30, %v8789_v34  ;;  %v8794_v2 = vld [vmem:[#allocation196_spill] sm:$0xff]  ;;  %v8795_v30 = vld [vmem:[#allocation197_spill] sm:$0xff] }
 0xe42   :  { %v4316_v58 = vmul.f32 -1.442695, %v3222_v61  ;;  %v3223_v22 = vadd.f32 %v3181_v29, %v6610_v36 }
 0xe43   :  { %v4314_v14 = vmul.f32 -1.442695, %v3220_v47  ;;  %v3221_v63 = vadd.f32 %v3173_v8, %v6454_v40 }
 0xe44   :  { %5653 = vpow2.f32 %v4316_v58  ;;  %v4317_v10 = vmul.f32 -1.442695, %v3223_v22 }
 0xe45   :  { %5655 = vpow2.f32 %v4314_v14  ;;  %v4315_v38 = vmul.f32 -1.442695, %v3221_v63  ;;  %v4799_v56 = vpop.f32.mrb[104].mxu0  ;;  %v8796_v14 = vld [vmem:[#allocation198_spill] sm:$0xff] }
 0xe46   :  { %v5646_v46 = vpop.eup %5645  ;;  %5657 = vpow2.f32 %v4317_v10  ;;  %v3194_v49 = vadd.f32 %v4799_v56, %v8790_v62  ;;  %v3185_v39 = vpop.f32.mrb[105].mxu0  ;;  %v8797_v62 = vld [vmem:[#allocation199_spill] sm:$0xff] }
 0xe47   :  { %v5648_v19 = vpop.eup %5647  ;;  %v3270_v54 = vadd.f32 1.0, %v5646_v46  ;;  %5659 = vpow2.f32 %v4315_v38  ;;  %v3186_v9 = vadd.f32 %v3185_v39, %v8791_v7  ;;  %v4800_v51 = vpop.f32.mrb[106].mxu0 }
 0xe48   :  { %v5650_v44 = vpop.eup %5649  ;;  %v3268_v1 = vadd.f32 1.0, %v5648_v19  ;;  %v3197_v43 = vadd.f32 %v4800_v51, %v8792_v35  ;;  %v3188_v27 = vpop.f32.mrb[107].mxu0  ;;  %v3226_v0 = vadd.f32 %v3194_v49, %v7240_v20 }
 0xe49   :  { %v5652_v11 = vpop.eup %5651  ;;  %5661 = vrcp.f32 %v3270_v54  ;;  %v3271_v53 = vadd.f32 1.0, %v5650_v44  ;;  %v3189_v48 = vadd.f32 %v3188_v27, %v8793_v55  ;;  %v3224_v28 = vadd.f32 %v3186_v9, %v7212_v50 }
 0xe4a   :  { %5663 = vrcp.f32 %v3268_v1  ;;  %v3269_v32 = vadd.f32 1.0, %v5652_v11  ;;  %v3227_v23 = vadd.f32 %v3197_v43, %v7243_v3 }
 0xe4b   :  { %5665 = vrcp.f32 %v3271_v53  ;;  %v3225_v60 = vadd.f32 %v3189_v48, %v7218_v13 }
 0xe4c   :  { %5667 = vrcp.f32 %v3269_v32 }
 0xe4d   :  { %5669 = vtanh.f32 %v3226_v0  ;;  %v4803_v37 = vpop.f32.mrb[108].mxu0 }
 0xe4e   :  { %v5654_v41 = vpop.eup %5653  ;;  %5671 = vtanh.f32 %v3224_v28  ;;  %v3210_v45 = vadd.f32 %v4803_v37, %v8794_v2  ;;  %v3201_v61 = vpop.f32.mrb[109].mxu0 }
 0xe4f   :  { %v5656_v26 = vpop.eup %5655  ;;  %v3274_v29 = vadd.f32 1.0, %v5654_v41  ;;  %5673 = vtanh.f32 %v3227_v23  ;;  %v3202_v47 = vadd.f32 %v3201_v61, %v8795_v30  ;;  %v4804_v34 = vpop.f32.mrb[110].mxu0 }
 0xe50   :  { %v5658_v8 = vpop.eup %5657  ;;  %v3272_v58 = vadd.f32 1.0, %v5656_v26  ;;  %5675 = vtanh.f32 %v3225_v60  ;;  %v3230_v22 = vadd.f32 %v3210_v45, %v7254_v12  ;;  %v3213_v63 = vadd.f32 %v4804_v34, %v8796_v14  ;;  %v3204_v10 = vpop.f32.mrb[111].mxu0 }
 0xe51   :  { %v5660_v38 = vpop.eup %5659  ;;  %5677 = vrcp.f32 %v3274_v29  ;;  %v3275_v56 = vadd.f32 1.0, %v5658_v8  ;;  %v3228_v46 = vadd.f32 %v3202_v47, %v7226_v52  ;;  %v3205_v49 = vadd.f32 %v3204_v10, %v8797_v62 }
 0xe52   :  { %5679 = vrcp.f32 %v3272_v58  ;;  %v3273_v39 = vadd.f32 1.0, %v5660_v38  ;;  %v4320_v19 = vmul.f32 -1.442695, %v3230_v22  ;;  %v3231_v54 = vadd.f32 %v3213_v63, %v7259_v18 }
 0xe53   :  { %v5662_v7 = vpop.eup %5661  ;;  %5681 = vrcp.f32 %v3275_v56  ;;  %v4318_v9 = vmul.f32 -1.442695, %v3228_v46  ;;  %v3229_v51 = vadd.f32 %v3205_v49, %v7230_v4 }
 0xe54   :  { %v5664_v44 = vpop.eup %5663  ;;  %5683 = vrcp.f32 %v3273_v39  ;;  %v4321_v1 = vmul.f32 -1.442695, %v3231_v54 }
 0xe55   :  { %v5666_v35 = vpop.eup %5665  ;;  %5685 = vpow2.f32 %v4320_v19  ;;  %v4319_v43 = vmul.f32 -1.442695, %v3229_v51 }
 0xe56   :  { %v5668_v27 = vpop.eup %5667  ;;  %5687 = vpow2.f32 %v4318_v9 }
 0xe57   :  { %v5670_v11 = vpop.eup %5669  ;;  %5689 = vpow2.f32 %v4321_v1 }
 0xe58   :  { %v5672_v53 = vpop.eup %5671  ;;  %v3314_v0 = vmul.f32 %v5670_v11, %v5662_v7  ;;  %5691 = vpow2.f32 %v4319_v43  ;;  %v8174_v43 = vld [vmem:[%s8402_s3 + $0x10] sm:$0xff]   ;;  %v8188_v11 = vld [vmem:[%s8402_s3 + $0x20] sm:$0xff]  }
 0xe59   :  { %v5674_v55 = vpop.eup %5673  ;;  %v3312_v48 = vmul.f32 %v5672_v53, %v5664_v44  ;;  %v5929_v53 = vld [vmem:[%s8402_s3] sm:$0xff]  }
 0xe5a   :  { %v5676_v32 = vpop.eup %5675  ;;  %v3315_v28 = vmul.f32 %v5674_v55, %v5666_v35  ;;  %v8167_v35 = vld [vmem:[%s8402_s3 + $0x8] sm:$0xff]   ;;  %v8798_v55 = vld [vmem:[#allocation91_spill] sm:$0xff] }
 0xe5b   :  { %v5678_v23 = vpop.eup %5677  ;;  %v3313_v60 = vmul.f32 %v5676_v32, %v5668_v27  ;;  %v8181_v27 = vld [vmem:[%s8402_s3 + $0x18] sm:$0xff]  }
 0xe5c   :  { %v5680_v37 = vpop.eup %5679  ;;  %v3310_v41 = vmul.f32 %v5678_v23, %v8087_v31 }
 0xe5d   :  { %v5682_v2 = vpop.eup %5681  ;;  %v3308_v45 = vmul.f32 %v5680_v37, %v8090_v24  ;;  %v8800_v37 = vld [vmem:[#allocation93_spill] sm:$0xff] }
 0xe5e   :  { %v5684_v61 = vpop.eup %5683  ;;  %v3311_v26 = vmul.f32 %v5682_v2, %v8092_v25  ;;  %v8151_v29 = vadd.f32 %v3314_v0, %v3310_v41  ;;  %v8801_v2 = vld [vmem:[#allocation94_spill] sm:$0xff] }
 0xe5f   :  { %v5686_v30 = vpop.eup %5685  ;;  %v3309_v47 = vmul.f32 %v5684_v61, %v8095_v33  ;;  %v8154_v34 = vadd.f32 %v3312_v48, %v3308_v45 }
 0xe60   :  { %v5688_v8 = vpop.eup %5687  ;;  %v8156_v58 = vadd.f32 %v3315_v28, %v3311_v26  ;;  %v3278_v22 = vadd.f32 1.0, %v5686_v30  ;;  %5693 = vtanh.f32 %v8151_v29  ;;  %v8799_v28 = vld [vmem:[#allocation92_spill] sm:$0xff] }
 0xe61   :  { %v5690_v31 = vpop.eup %5689  ;;  %v8159_v14 = vadd.f32 %v3313_v60, %v3309_v47  ;;  %v3276_v24 = vadd.f32 1.0, %v5688_v8  ;;  %5695 = vtanh.f32 %v8154_v34 }
 0xe62   :  { %v5692_v25 = vpop.eup %5691  ;;  %5697 = vrcp.f32 %v3278_v22  ;;  %v3279_v63 = vadd.f32 1.0, %v5690_v31 }
 0xe63   :  { %5699 = vrcp.f32 %v3276_v24  ;;  %v3277_v10 = vadd.f32 1.0, %v5692_v25  ;;  %v8802_v24 = vld [vmem:[#allocation95_spill] sm:$0xff] }
 0xe64   :  { %5701 = vrcp.f32 %v3279_v63 }
 0xe65   :  { %5703 = vrcp.f32 %v3277_v10  ;;  %v8803_v10 = vld [vmem:[#allocation96_spill] sm:$0xff] }
 0xe66   :  { %5705 = vtanh.f32 %v8159_v14 }
 0xe67   :  { %5707 = vtanh.f32 %v8156_v58 }
 0xe6a   :  { %v5694_v33 = vpop.eup %5693 }
 0xe6b   :  { %v5696_v38 = vpop.eup %5695 }
 0xe6c   :  { %v5698_v56 = vpop.eup %5697 }
 0xe6d   :  { %v5700_v46 = vpop.eup %5699  ;;  %v3326_v9 = vmul.f32 %v5698_v56, %v5694_v33 }
 0xe6e   :  { %v5702_v62 = vpop.eup %5701  ;;  %v3324_v54 = vmul.f32 %v5700_v46, %v5696_v38  ;;  %v8804_v46 = vld [vmem:[#allocation97_spill] sm:$0xff] }
 0xe6f   :  { %v5704_v49 = vpop.eup %5703 }
 0xe70   :  { %v5706_v39 = vpop.eup %5705 }
 0xe71   :  { %v5708_v19 = vpop.eup %5707  ;;  %v3325_v7 = vmul.f32 %v5706_v39, %v5704_v49 }
 0xe72   :  { %v3327_v51 = vmul.f32 %v5708_v19, %v5702_v62  ;;  %v8805_v19 = vld [vmem:[#allocation98_spill] sm:$0xff] }
 0xe73   :  { %v3329_v44 = vpack.c.bf16 %v3325_v7, %v3324_v54 }
 0xe74   :  { %v3330_v1 = vpack.c.bf16 %v3327_v51, %v3326_v9 }
 0xe75   :  { %4805 = vmatprep.subr.bf16.mxu1 %v3329_v44 }
 0xe76   :  { %4806 = vmatpush3.bf16.msra.mxu1 %v3329_v44 }
 0xe77   :  { %4807 = vmatprep.subr.bf16.mxu1 %v3330_v1 }
 0xe7a   :  { %4808 = vmatpush3.bf16.msra.mxu1 %v3330_v1 }
 0xe7d   :  { %4810 = vmatmul.mubr.msk.bf16.vlgmr.msra.gmra.mrb[96].mxu1 %vm230_vm1, %v8167_v35 }
 0xe7e   :  { %4813 = vmatprep.mubr.msk.bf16.mxu1 %vm230_vm1, %v8174_v43 }
 0xe85   :  { %4814 = vmatmul.mubr.msk.bf16.gmra.mrb[100].mxu1 %vm230_vm1, %v8181_v27 }
 0xe86   :  { %4817 = vmatprep.mubr.msk.bf16.mxu1 %vm230_vm1, %v8188_v11 }
 0xe8d   :  { %4818 = vmatmul.mubr.msk.bf16.gmra.mrb[104].mxu1 %vm230_vm1, %v7968_v5 }
 0xe8e   :  { %4821 = vmatprep.mubr.msk.bf16.mxu1 %vm230_vm1, %v7975_v57 }
 0xe95   :  { %4822 = vmatmul.mubr.msk.bf16.gmra.mrb[108].mxu1 %vm230_vm1, %v7982_v59 }
 0xe96   :  { %4849 = vmatprep.mubr.msk.bf16.mxu1 %vm230_vm1, %v5929_v53 }
 0xf50   :  { %v4811_v0 = vpop.f32.mrb[96].mxu1 }
 0xf51   :  { %v3394_v48 = vadd.f32 %v4811_v0, %v8798_v55  ;;  %v3385_v32 = vpop.f32.mrb[97].mxu1 }
 0xf52   :  { %v3386_v23 = vadd.f32 %v3385_v32, %v8799_v28  ;;  %v4812_v60 = vpop.f32.mrb[98].mxu1 }
 0xf53   :  { %v3450_v5 = vadd.f32 %v3394_v48, %v6534_v16  ;;  %v3397_v57 = vadd.f32 %v4812_v60, %v8800_v37  ;;  %v3388_v41 = vpop.f32.mrb[99].mxu1  ;;  %v8806_v48 = vld [vmem:[#allocation200_spill] sm:$0xff] }
 0xf54   :  { %v3448_v59 = vadd.f32 %v3386_v23, %v6378_v21  ;;  %v3389_v45 = vadd.f32 %v3388_v41, %v8801_v2  ;;  %v8808_v2 = vld [vmem:[#allocation202_spill] sm:$0xff] }
 0xf55   :  { %v4333_v61 = vmul.f32 -1.442695, %v3450_v5  ;;  %v3451_v26 = vadd.f32 %v3397_v57, %v6532_v42  ;;  %v8807_v5 = vld [vmem:[#allocation201_spill] sm:$0xff] }
 0xf56   :  { %v4331_v30 = vmul.f32 -1.442695, %v3448_v59  ;;  %v3449_v47 = vadd.f32 %v3389_v45, %v6376_v6 }
 0xf57   :  { %5709 = vpow2.f32 %v4333_v61  ;;  %v4334_v8 = vmul.f32 -1.442695, %v3451_v26 }
 0xf58   :  { %5711 = vpow2.f32 %v4331_v30  ;;  %v4332_v22 = vmul.f32 -1.442695, %v3449_v47  ;;  %v4815_v31 = vpop.f32.mrb[100].mxu1 }
 0xf59   :  { %5713 = vpow2.f32 %v4334_v8  ;;  %v3410_v25 = vadd.f32 %v4815_v31, %v8802_v24  ;;  %v3401_v63 = vpop.f32.mrb[101].mxu1  ;;  %v8809_v8 = vld [vmem:[#allocation203_spill] sm:$0xff] }
 0xf5a   :  { %5715 = vpow2.f32 %v4332_v22  ;;  %v3402_v33 = vadd.f32 %v3401_v63, %v8803_v10  ;;  %v4816_v38 = vpop.f32.mrb[102].mxu1 }
 0xf5b   :  { %v3454_v56 = vadd.f32 %v3410_v25, %v6612_v15  ;;  %v3413_v62 = vadd.f32 %v4816_v38, %v8804_v46  ;;  %v3404_v49 = vpop.f32.mrb[103].mxu1  ;;  %v8810_v38 = vld [vmem:[#allocation204_spill] sm:$0xff] }
 0xf5c   :  { %v3452_v39 = vadd.f32 %v3402_v33, %v6456_v17  ;;  %v3405_v54 = vadd.f32 %v3404_v49, %v8805_v19 }
 0xf5d   :  { %v4337_v7 = vmul.f32 -1.442695, %v3454_v56  ;;  %v3455_v9 = vadd.f32 %v3413_v62, %v6610_v36 }
 0xf5e   :  { %v4335_v51 = vmul.f32 -1.442695, %v3452_v39  ;;  %v3453_v44 = vadd.f32 %v3405_v54, %v6454_v40  ;;  %v8811_v39 = vld [vmem:[#allocation205_spill] sm:$0xff] }
 0xf5f   :  { %5717 = vpow2.f32 %v4337_v7  ;;  %v4338_v1 = vmul.f32 -1.442695, %v3455_v9 }
 0xf60   :  { %5719 = vpow2.f32 %v4335_v51  ;;  %v4336_v53 = vmul.f32 -1.442695, %v3453_v44  ;;  %v4819_v0 = vpop.f32.mrb[104].mxu1  ;;  %v8812_v44 = vld [vmem:[#allocation206_spill] sm:$0xff] }
 0xf61   :  { %v5710_v55 = vpop.eup %5709  ;;  %5721 = vpow2.f32 %v4338_v1  ;;  %v3426_v32 = vadd.f32 %v4819_v0, %v8806_v48  ;;  %v3417_v28 = vpop.f32.mrb[105].mxu1 }
 0xf62   :  { %v5712_v23 = vpop.eup %5711  ;;  %v3502_v60 = vadd.f32 1.0, %v5710_v55  ;;  %5723 = vpow2.f32 %v4336_v53  ;;  %v3418_v37 = vadd.f32 %v3417_v28, %v8807_v5  ;;  %v4820_v57 = vpop.f32.mrb[106].mxu1 }
 0xf63   :  { %v5714_v41 = vpop.eup %5713  ;;  %v3500_v59 = vadd.f32 1.0, %v5712_v23  ;;  %v3429_v45 = vadd.f32 %v4820_v57, %v8808_v2  ;;  %v3420_v61 = vpop.f32.mrb[107].mxu1  ;;  %v3458_v47 = vadd.f32 %v3426_v32, %v7240_v20  ;;  %v8813_v32 = vld [vmem:[#allocation207_spill] sm:$0xff] }
 0xf64   :  { %v5716_v26 = vpop.eup %5715  ;;  %5725 = vrcp.f32 %v3502_v60  ;;  %v3503_v30 = vadd.f32 1.0, %v5714_v41  ;;  %v3421_v22 = vadd.f32 %v3420_v61, %v8809_v8  ;;  %v3456_v24 = vadd.f32 %v3418_v37, %v7212_v50 }
 0xf65   :  { %5727 = vrcp.f32 %v3500_v59  ;;  %v3501_v31 = vadd.f32 1.0, %v5716_v26  ;;  %v3459_v25 = vadd.f32 %v3429_v45, %v7243_v3 }
 0xf66   :  { %5729 = vrcp.f32 %v3503_v30  ;;  %v3457_v63 = vadd.f32 %v3421_v22, %v7218_v13 }
 0xf67   :  { %5731 = vrcp.f32 %v3501_v31 }
 0xf68   :  { %5733 = vtanh.f32 %v3458_v47  ;;  %v4823_v10 = vpop.f32.mrb[108].mxu1 }
 0xf69   :  { %v5718_v33 = vpop.eup %5717  ;;  %5735 = vtanh.f32 %v3456_v24  ;;  %v3442_v56 = vadd.f32 %v4823_v10, %v8810_v38  ;;  %v3433_v46 = vpop.f32.mrb[109].mxu1 }
 0xf6a   :  { %v5720_v62 = vpop.eup %5719  ;;  %v3506_v49 = vadd.f32 1.0, %v5718_v33  ;;  %5737 = vtanh.f32 %v3459_v25  ;;  %v3434_v19 = vadd.f32 %v3433_v46, %v8811_v39  ;;  %v4824_v54 = vpop.f32.mrb[110].mxu1 }
 0xf6b   :  { %v5722_v7 = vpop.eup %5721  ;;  %v3504_v9 = vadd.f32 1.0, %v5720_v62  ;;  %5739 = vtanh.f32 %v3457_v63  ;;  %v3462_v51 = vadd.f32 %v3442_v56, %v7254_v12  ;;  %v3445_v1 = vadd.f32 %v4824_v54, %v8812_v44  ;;  %v3436_v53 = vpop.f32.mrb[111].mxu1 }
 0xf6c   :  { %v5724_v0 = vpop.eup %5723  ;;  %5741 = vrcp.f32 %v3506_v49  ;;  %v3507_v55 = vadd.f32 1.0, %v5722_v7  ;;  %v3460_v48 = vadd.f32 %v3434_v19, %v7226_v52  ;;  %v3437_v28 = vadd.f32 %v3436_v53, %v8813_v32 }
 0xf6d   :  { %5743 = vrcp.f32 %v3504_v9  ;;  %v3505_v23 = vadd.f32 1.0, %v5724_v0  ;;  %v4341_v60 = vmul.f32 -1.442695, %v3462_v51  ;;  %v3463_v5 = vadd.f32 %v3445_v1, %v7259_v18 }
 0xf6e   :  { %v5726_v37 = vpop.eup %5725  ;;  %5745 = vrcp.f32 %v3507_v55  ;;  %v4339_v57 = vmul.f32 -1.442695, %v3460_v48  ;;  %v3461_v41 = vadd.f32 %v3437_v28, %v7230_v4 }
 0xf6f   :  { %v5728_v59 = vpop.eup %5727  ;;  %5747 = vrcp.f32 %v3505_v23  ;;  %v4342_v2 = vmul.f32 -1.442695, %v3463_v5 }
 0xf70   :  { %v5730_v45 = vpop.eup %5729  ;;  %5749 = vpow2.f32 %v4341_v60  ;;  %v4340_v61 = vmul.f32 -1.442695, %v3461_v41 }
 0xf71   :  { %v5732_v26 = vpop.eup %5731  ;;  %5751 = vpow2.f32 %v4339_v57 }
 0xf72   :  { %v5734_v30 = vpop.eup %5733  ;;  %5753 = vpow2.f32 %v4342_v2 }
 0xf73   :  { %v5736_v47 = vpop.eup %5735  ;;  %v3546_v8 = vmul.f32 %v5734_v30, %v5726_v37  ;;  %5755 = vpow2.f32 %v4340_v61  ;;  %v8261_v61 = vld [vmem:[%s8402_s3 + $0x28] sm:$0xff]   ;;  %v8275_v30 = vld [vmem:[%s8402_s3 + $0x38] sm:$0xff]  }
 0xf74   :  { %v5738_v22 = vpop.eup %5737  ;;  %v3544_v31 = vmul.f32 %v5736_v47, %v5728_v59 }
 0xf75   :  { %v5740_v24 = vpop.eup %5739  ;;  %v3547_v25 = vmul.f32 %v5738_v22, %v5730_v45 }
 0xf76   :  { %v5742_v63 = vpop.eup %5741  ;;  %v3545_v10 = vmul.f32 %v5740_v24, %v5732_v26  ;;  %v8268_v26 = vld [vmem:[%s8402_s3 + $0x30] sm:$0xff]   ;;  %v8815_v24 = vld [vmem:[#allocation100_spill] sm:$0xff] }
 0xf77   :  { %v5744_v33 = vpop.eup %5743  ;;  %v3542_v38 = vmul.f32 %v5742_v63, %v8151_v29 }
 0xf78   :  { %v5746_v56 = vpop.eup %5745  ;;  %v3540_v46 = vmul.f32 %v5744_v33, %v8154_v34  ;;  %v8816_v33 = vld [vmem:[#allocation101_spill] sm:$0xff] }
 0xf79   :  { %v5748_v62 = vpop.eup %5747  ;;  %v3543_v49 = vmul.f32 %v5746_v56, %v8156_v58  ;;  %v8237_v39 = vadd.f32 %v3546_v8, %v3542_v38  ;;  %v8814_v8 = vld [vmem:[#allocation99_spill] sm:$0xff] }
 0xf7a   :  { %v5750_v19 = vpop.eup %5749  ;;  %v3541_v54 = vmul.f32 %v5748_v62, %v8159_v14  ;;  %v8240_v7 = vadd.f32 %v3544_v31, %v3540_v46  ;;  %v8817_v62 = vld [vmem:[#allocation102_spill] sm:$0xff] }
 0xf7b   :  { %v5752_v9 = vpop.eup %5751  ;;  %v8242_v51 = vadd.f32 %v3547_v25, %v3543_v49  ;;  %v3510_v44 = vadd.f32 1.0, %v5750_v19  ;;  %5757 = vtanh.f32 %v8237_v39 }
 0xf7c   :  { %v5754_v29 = vpop.eup %5753  ;;  %v8245_v1 = vadd.f32 %v3545_v10, %v3541_v54  ;;  %v3508_v34 = vadd.f32 1.0, %v5752_v9  ;;  %5759 = vtanh.f32 %v8240_v7 }
 0xf7d   :  { %v5756_v58 = vpop.eup %5755  ;;  %5761 = vrcp.f32 %v3510_v44  ;;  %v3511_v53 = vadd.f32 1.0, %v5754_v29 }
 0xf7e   :  { %5763 = vrcp.f32 %v3508_v34  ;;  %v3509_v0 = vadd.f32 1.0, %v5756_v58 }
 0xf7f   :  { %5765 = vrcp.f32 %v3511_v53  ;;  %v8818_v53 = vld [vmem:[#allocation103_spill] sm:$0xff] }
 0xf80   :  { %5767 = vrcp.f32 %v3509_v0 }
 0xf81   :  { %5769 = vtanh.f32 %v8245_v1 }
 0xf82   :  { %5771 = vtanh.f32 %v8242_v51 }
 0xf85   :  { %v5758_v14 = vpop.eup %5757 }
 0xf86   :  { %v5760_v55 = vpop.eup %5759 }
 0xf87   :  { %v5762_v48 = vpop.eup %5761 }
 0xf88   :  { %v5764_v32 = vpop.eup %5763  ;;  %v3558_v41 = vmul.f32 %v5762_v48, %v5758_v14 }
 0xf89   :  { %v5766_v28 = vpop.eup %5765  ;;  %v3556_v37 = vmul.f32 %v5764_v32, %v5760_v55  ;;  %v8819_v55 = vld [vmem:[#allocation104_spill] sm:$0xff] }
 0xf8a   :  { %v5768_v23 = vpop.eup %5767 }
 0xf8b   :  { %v5770_v60 = vpop.eup %5769 }
 0xf8c   :  { %v5772_v5 = vpop.eup %5771  ;;  %v3557_v57 = vmul.f32 %v5770_v60, %v5768_v23  ;;  %v8820_v23 = vld [vmem:[#allocation105_spill] sm:$0xff] }
 0xf8d   :  { %v3559_v59 = vmul.f32 %v5772_v5, %v5766_v28 }
 0xf8e   :  { %v3561_v2 = vpack.c.bf16 %v3557_v57, %v3556_v37  ;;  %v8821_v57 = vld [vmem:[#allocation106_spill] sm:$0xff] }
 0xf8f   :  { %v3562_v45 = vpack.c.bf16 %v3559_v59, %v3558_v41 }
 0xf90   :  { %4825 = vmatprep.subr.bf16.mxu0 %v3561_v2 }
 0xf91   :  { %4826 = vmatpush3.bf16.msra.mxu0 %v3561_v2 }
 0xf92   :  { %4827 = vmatprep.subr.bf16.mxu0 %v3562_v45 }
 0xf95   :  { %4828 = vmatpush3.bf16.msra.mxu0 %v3562_v45 }
 0xf98   :  { %4830 = vmatmul.mubr.msk.bf16.vlgmr.msra.gmra.mrb[112].mxu0 %vm230_vm1, %v8167_v35 }
 0xf99   :  { %4833 = vmatprep.mubr.msk.bf16.mxu0 %vm230_vm1, %v8174_v43 }
 0xfa0   :  { %4834 = vmatmul.mubr.msk.bf16.gmra.mrb[116].mxu0 %vm230_vm1, %v8181_v27 }
 0xfa1   :  { %4837 = vmatprep.mubr.msk.bf16.mxu0 %vm230_vm1, %v8188_v11 }
 0xfa8   :  { %4838 = vmatmul.mubr.msk.bf16.gmra.mrb[120].mxu0 %vm230_vm1, %v8261_v61 }
 0xfa9   :  { %4841 = vmatprep.mubr.msk.bf16.mxu0 %vm230_vm1, %v8268_v26 }
 0xfb0   :  { %4842 = vmatmul.mubr.msk.bf16.gmra.mrb[124].mxu0 %vm230_vm1, %v8275_v30 }
0x106b   :  { %v4831_v47 = vpop.f32.mrb[112].mxu0 }
0x106c   :  { %v3626_v22 = vadd.f32 %v4831_v47, %v8814_v8  ;;  %v3617_v31 = vpop.f32.mrb[113].mxu0 }
0x106d   :  { %v3618_v25 = vadd.f32 %v3617_v31, %v8815_v24  ;;  %v4832_v63 = vpop.f32.mrb[114].mxu0 }
0x106e   :  { %v3682_v10 = vadd.f32 %v3626_v22, %v6534_v16  ;;  %v3629_v38 = vadd.f32 %v4832_v63, %v8816_v33  ;;  %v3620_v56 = vpop.f32.mrb[115].mxu0 }
0x106f   :  { %v3680_v46 = vadd.f32 %v3618_v25, %v6378_v21  ;;  %v3621_v49 = vadd.f32 %v3620_v56, %v8817_v62  ;;  %v8822_v25 = vld [vmem:[#allocation208_spill] sm:$0xff]  ;;  %v8823_v56 = vld [vmem:[#allocation209_spill] sm:$0xff] }
0x1070   :  { %v4354_v19 = vmul.f32 -1.442695, %v3682_v10  ;;  %v3683_v54 = vadd.f32 %v3629_v38, %v6532_v42 }
0x1071   :  { %v4352_v9 = vmul.f32 -1.442695, %v3680_v46  ;;  %v3681_v44 = vadd.f32 %v3621_v49, %v6376_v6 }
0x1072   :  { %5773 = vpow2.f32 %v4354_v19  ;;  %v4355_v29 = vmul.f32 -1.442695, %v3683_v54  ;;  %v8824_v54 = vld [vmem:[#allocation210_spill] sm:$0xff] }
0x1073   :  { %5775 = vpow2.f32 %v4352_v9  ;;  %v4353_v34 = vmul.f32 -1.442695, %v3681_v44  ;;  %v4835_v58 = vpop.f32.mrb[116].mxu0 }
0x1074   :  { %5777 = vpow2.f32 %v4355_v29  ;;  %v3642_v0 = vadd.f32 %v4835_v58, %v8818_v53  ;;  %v3633_v14 = vpop.f32.mrb[117].mxu0  ;;  %v8825_v53 = vld [vmem:[#allocation211_spill] sm:$0xff] }
0x1075   :  { %5779 = vpow2.f32 %v4353_v34  ;;  %v3634_v48 = vadd.f32 %v3633_v14, %v8819_v55  ;;  %v4836_v32 = vpop.f32.mrb[118].mxu0 }
0x1076   :  { %v3686_v28 = vadd.f32 %v3642_v0, %v6612_v15  ;;  %v3645_v60 = vadd.f32 %v4836_v32, %v8820_v23  ;;  %v3636_v5 = vpop.f32.mrb[119].mxu0 }
0x1077   :  { %v3684_v37 = vadd.f32 %v3634_v48, %v6456_v17  ;;  %v3637_v41 = vadd.f32 %v3636_v5, %v8821_v57 }
0x1078   :  { %v4358_v59 = vmul.f32 -1.442695, %v3686_v28  ;;  %v3687_v2 = vadd.f32 %v3645_v60, %v6610_v36  ;;  %v8826_v60 = vld [vmem:[#allocation212_spill] sm:$0xff] }
0x1079   :  { %v4356_v45 = vmul.f32 -1.442695, %v3684_v37  ;;  %v3685_v47 = vadd.f32 %v3637_v41, %v6454_v40 }
0x107a   :  { %5781 = vpow2.f32 %v4358_v59  ;;  %v4359_v8 = vmul.f32 -1.442695, %v3687_v2  ;;  %v8827_v59 = vld [vmem:[#allocation213_spill] sm:$0xff] }
0x107b   :  { %5783 = vpow2.f32 %v4356_v45  ;;  %v4357_v22 = vmul.f32 -1.442695, %v3685_v47  ;;  %v4839_v31 = vpop.f32.mrb[120].mxu0 }
0x107c   :  { %v5774_v24 = vpop.eup %5773  ;;  %5785 = vpow2.f32 %v4359_v8  ;;  %v3658_v63 = vadd.f32 %v4839_v31, %v8822_v25  ;;  %v3649_v10 = vpop.f32.mrb[121].mxu0  ;;  %v8828_v31 = vld [vmem:[#allocation214_spill] sm:$0xff] }
0x107d   :  { %v5776_v33 = vpop.eup %5775  ;;  %v3734_v38 = vadd.f32 1.0, %v5774_v24  ;;  %5787 = vpow2.f32 %v4357_v22  ;;  %v3650_v46 = vadd.f32 %v3649_v10, %v8823_v56  ;;  %v4840_v62 = vpop.f32.mrb[122].mxu0 }
0x107e   :  { %v5778_v49 = vpop.eup %5777  ;;  %v3732_v19 = vadd.f32 1.0, %v5776_v33  ;;  %v3661_v9 = vadd.f32 %v4840_v62, %v8824_v54  ;;  %v3652_v44 = vpop.f32.mrb[123].mxu0  ;;  %v3690_v58 = vadd.f32 %v3658_v63, %v7240_v20 }
0x107f   :  { %v5780_v29 = vpop.eup %5779  ;;  %5789 = vrcp.f32 %v3734_v38  ;;  %v3735_v34 = vadd.f32 1.0, %v5778_v49  ;;  %v3653_v0 = vadd.f32 %v3652_v44, %v8825_v53  ;;  %v3688_v55 = vadd.f32 %v3650_v46, %v7212_v50  ;;  %v8829_v38 = vld [vmem:[#allocation215_spill] sm:$0xff] }
0x1080   :  { %5791 = vrcp.f32 %v3732_v19  ;;  %v3733_v14 = vadd.f32 1.0, %v5780_v29  ;;  %v3691_v48 = vadd.f32 %v3661_v9, %v7243_v3 }
0x1081   :  { %5793 = vrcp.f32 %v3735_v34  ;;  %v3689_v32 = vadd.f32 %v3653_v0, %v7218_v13 }
0x1082   :  { %5795 = vrcp.f32 %v3733_v14 }
0x1083   :  { %5797 = vtanh.f32 %v3690_v58  ;;  %v4843_v28 = vpop.f32.mrb[124].mxu0 }
0x1084   :  { %v5782_v23 = vpop.eup %5781  ;;  %5799 = vtanh.f32 %v3688_v55  ;;  %v3674_v5 = vadd.f32 %v4843_v28, %v8826_v60  ;;  %v3665_v37 = vpop.f32.mrb[125].mxu0 }
0x1085   :  { %v5784_v57 = vpop.eup %5783  ;;  %v3738_v41 = vadd.f32 1.0, %v5782_v23  ;;  %5801 = vtanh.f32 %v3691_v48  ;;  %v3666_v2 = vadd.f32 %v3665_v37, %v8827_v59  ;;  %v4844_v45 = vpop.f32.mrb[126].mxu0 }
0x1086   :  { %v5786_v47 = vpop.eup %5785  ;;  %v3736_v8 = vadd.f32 1.0, %v5784_v57  ;;  %5803 = vtanh.f32 %v3689_v32  ;;  %v3694_v22 = vadd.f32 %v3674_v5, %v7254_v12  ;;  %v3677_v24 = vadd.f32 %v4844_v45, %v8828_v31  ;;  %v3668_v25 = vpop.f32.mrb[127].mxu0 }
0x1087   :  { %v5788_v63 = vpop.eup %5787  ;;  %5805 = vrcp.f32 %v3738_v41  ;;  %v3739_v10 = vadd.f32 1.0, %v5786_v47  ;;  %v3692_v33 = vadd.f32 %v3666_v2, %v7226_v52  ;;  %v3669_v56 = vadd.f32 %v3668_v25, %v8829_v38 }
0x1088   :  { %5807 = vrcp.f32 %v3736_v8  ;;  %v3737_v46 = vadd.f32 1.0, %v5788_v63  ;;  %v4362_v62 = vmul.f32 -1.442695, %v3694_v22  ;;  %v3695_v49 = vadd.f32 %v3677_v24, %v7259_v18 }
0x1089   :  { %v5790_v19 = vpop.eup %5789  ;;  %5809 = vrcp.f32 %v3739_v10  ;;  %v4360_v54 = vmul.f32 -1.442695, %v3692_v33  ;;  %v3693_v9 = vadd.f32 %v3669_v56, %v7230_v4 }
0x108a   :  { %v5792_v44 = vpop.eup %5791  ;;  %5811 = vrcp.f32 %v3737_v46  ;;  %v4363_v29 = vmul.f32 -1.442695, %v3695_v49 }
0x108b   :  { %v5794_v34 = vpop.eup %5793  ;;  %5813 = vpow2.f32 %v4362_v62  ;;  %v4361_v58 = vmul.f32 -1.442695, %v3693_v9 }
0x108c   :  { %v5796_v53 = vpop.eup %5795  ;;  %5815 = vpow2.f32 %v4360_v54 }
0x108d   :  { %v5798_v0 = vpop.eup %5797  ;;  %5817 = vpow2.f32 %v4363_v29 }
0x108e   :  { %v5800_v14 = vpop.eup %5799  ;;  %v3778_v55 = vmul.f32 %v5798_v0, %v5790_v19  ;;  %5819 = vpow2.f32 %v4361_v58 }
0x108f   :  { %v5802_v48 = vpop.eup %5801  ;;  %v3776_v32 = vmul.f32 %v5800_v14, %v5792_v44 }
0x1090   :  { %v5804_v28 = vpop.eup %5803  ;;  %v3779_v23 = vmul.f32 %v5802_v48, %v5794_v34 }
0x1091   :  { %v5806_v60 = vpop.eup %5805  ;;  %v3777_v5 = vmul.f32 %v5804_v28, %v5796_v53 }
0x1092   :  { %v5808_v37 = vpop.eup %5807  ;;  %v3774_v57 = vmul.f32 %v5806_v60, %v8237_v39 }
0x1093   :  { %v5810_v41 = vpop.eup %5809  ;;  %v3772_v59 = vmul.f32 %v5808_v37, %v8240_v7 }
0x1094   :  { %v5812_v2 = vpop.eup %5811  ;;  %v3775_v45 = vmul.f32 %v5810_v41, %v8242_v51  ;;  %v8314_v47 = vadd.f32 %v3778_v55, %v3774_v57 }
0x1095   :  { %v5814_v8 = vpop.eup %5813  ;;  %v3773_v22 = vmul.f32 %v5812_v2, %v8245_v1  ;;  %v8317_v31 = vadd.f32 %v3776_v32, %v3772_v59 }
0x1096   :  { %v5816_v24 = vpop.eup %5815  ;;  %v8319_v25 = vadd.f32 %v3779_v23, %v3775_v45  ;;  %v3742_v63 = vadd.f32 1.0, %v5814_v8  ;;  %5821 = vtanh.f32 %v8314_v47  ;;  %v8832_v23 = vld [vmem:[#allocation109_spill] sm:$0xff] }
0x1097   :  { %v5818_v39 = vpop.eup %5817  ;;  %v8322_v10 = vadd.f32 %v3777_v5, %v3773_v22  ;;  %v3740_v7 = vadd.f32 1.0, %v5816_v24  ;;  %5823 = vtanh.f32 %v8317_v31  ;;  %v8833_v5 = vld [vmem:[#allocation110_spill] sm:$0xff]  ;;  %v8835_v24 = vld [vmem:[#allocation112_spill] sm:$0xff] }
0x1098   :  { %v5820_v51 = vpop.eup %5819  ;;  %5825 = vrcp.f32 %v3742_v63  ;;  %v3743_v33 = vadd.f32 1.0, %v5818_v39 }
0x1099   :  { %5827 = vrcp.f32 %v3740_v7  ;;  %v3741_v38 = vadd.f32 1.0, %v5820_v51  ;;  %v8836_v7 = vld [vmem:[#allocation113_spill] sm:$0xff] }
0x109a   :  { %5829 = vrcp.f32 %v3743_v33  ;;  %v8837_v33 = vld [vmem:[#allocation114_spill] sm:$0xff] }
0x109b   :  { %5831 = vrcp.f32 %v3741_v38 }
0x109c   :  { %5833 = vtanh.f32 %v8322_v10 }
0x109d   :  { %5835 = vtanh.f32 %v8319_v25 }
0x10a0   :  { %v5822_v1 = vpop.eup %5821 }
0x10a1   :  { %v5824_v56 = vpop.eup %5823 }
0x10a2   :  { %v5826_v46 = vpop.eup %5825 }
0x10a3   :  { %v5828_v62 = vpop.eup %5827  ;;  %v3790_v34 = vmul.f32 %v5826_v46, %v5822_v1 }
0x10a4   :  { %v5830_v49 = vpop.eup %5829  ;;  %v3788_v44 = vmul.f32 %v5828_v62, %v5824_v56 }
0x10a5   :  { %v5832_v19 = vpop.eup %5831 }
0x10a6   :  { %v5834_v54 = vpop.eup %5833 }
0x10a7   :  { %v5836_v9 = vpop.eup %5835  ;;  %v3789_v29 = vmul.f32 %v5834_v54, %v5832_v19 }
0x10a8   :  { %v3791_v58 = vmul.f32 %v5836_v9, %v5830_v49 }
0x10a9   :  { %v3793_v53 = vpack.c.bf16 %v3789_v29, %v3788_v44 }
0x10aa   :  { %v3794_v0 = vpack.c.bf16 %v3791_v58, %v3790_v34  ;;  %v8839_v58 = vld [vmem:[#allocation217_spill] sm:$0xff] }
0x10ab   :  { %4845 = vmatprep.subr.bf16.mxu1 %v3793_v53 }
0x10ac   :  { %4846 = vmatpush3.bf16.msra.mxu1 %v3793_v53 }
0x10ad   :  { %4847 = vmatprep.subr.bf16.mxu1 %v3794_v0 }
0x10b0   :  { %4848 = vmatpush3.bf16.msra.mxu1 %v3794_v0 }
0x10b3   :  { %4850 = vmatmul.mubr.msk.bf16.vlgmr.msra.gmra.mrb[112].mxu1 %vm230_vm1, %v8167_v35  ;;  %v8830_v35 = vld [vmem:[#allocation107_spill] sm:$0xff] }
0x10b4   :  { %4853 = vmatprep.mubr.msk.bf16.mxu1 %vm230_vm1, %v8174_v43  ;;  %v8831_v43 = vld [vmem:[#allocation108_spill] sm:$0xff] }
0x10bb   :  { %4854 = vmatmul.mubr.msk.bf16.gmra.mrb[116].mxu1 %vm230_vm1, %v8181_v27 }
0x10bc   :  { %4857 = vmatprep.mubr.msk.bf16.mxu1 %vm230_vm1, %v8188_v11 }
0x10c3   :  { %4858 = vmatmul.mubr.msk.bf16.gmra.mrb[120].mxu1 %vm230_vm1, %v8261_v61 }
0x10c4   :  { %4861 = vmatprep.mubr.msk.bf16.mxu1 %vm230_vm1, %v8268_v26 }
0x10cb   :  { %4862 = vmatmul.mubr.msk.bf16.gmra.mrb[124].mxu1 %vm230_vm1, %v8275_v30 }
0x1186   :  { %v4851_v14 = vpop.f32.mrb[112].mxu1 }
0x1187   :  { %v3858_v55 = vadd.f32 %v4851_v14, %v8830_v35  ;;  %v3849_v48 = vpop.f32.mrb[113].mxu1  ;;  %v8840_v35 = vld [vmem:[#allocation218_spill] sm:$0xff] }
0x1188   :  { %v3850_v32 = vadd.f32 %v3849_v48, %v8831_v43  ;;  %v4852_v28 = vpop.f32.mrb[114].mxu1 }
0x1189   :  { %v3914_v27 = vadd.f32 %v3858_v55, %v6534_v16  ;;  %v3861_v11 = vadd.f32 %v4852_v28, %v8832_v23  ;;  %v3852_v60 = vpop.f32.mrb[115].mxu1  ;;  %v8834_v16 = vld [vmem:[#allocation111_spill] sm:$0xff] }
0x118a   :  { %v3912_v61 = vadd.f32 %v3850_v32, %v6378_v21  ;;  %v3853_v37 = vadd.f32 %v3852_v60, %v8833_v5  ;;  %v8841_v28 = vld [vmem:[#allocation219_spill] sm:$0xff] }
0x118b   :  { %v4375_v26 = vmul.f32 -1.442695, %v3914_v27  ;;  %v3915_v57 = vadd.f32 %v3861_v11, %v6532_v42 }
0x118c   :  { %v4373_v30 = vmul.f32 -1.442695, %v3912_v61  ;;  %v3913_v41 = vadd.f32 %v3853_v37, %v6376_v6 }
0x118d   :  { %5837 = vpow2.f32 %v4375_v26  ;;  %v4376_v59 = vmul.f32 -1.442695, %v3915_v57  ;;  %v8842_v26 = vld [vmem:[#allocation220_spill] sm:$0xff] }
0x118e   :  { %5839 = vpow2.f32 %v4373_v30  ;;  %v4374_v2 = vmul.f32 -1.442695, %v3913_v41  ;;  %v4855_v45 = vpop.f32.mrb[116].mxu1 }
0x118f   :  { %5841 = vpow2.f32 %v4376_v59  ;;  %v3874_v8 = vadd.f32 %v4855_v45, %v8834_v16  ;;  %v3865_v22 = vpop.f32.mrb[117].mxu1  ;;  %v8843_v59 = vld [vmem:[#allocation221_spill] sm:$0xff] }
0x1190   :  { %5843 = vpow2.f32 %v4374_v2  ;;  %v3866_v21 = vadd.f32 %v3865_v22, %v8835_v24  ;;  %v4856_v63 = vpop.f32.mrb[118].mxu1 }
0x1191   :  { %v3918_v39 = vadd.f32 %v3874_v8, %v6612_v15  ;;  %v3877_v42 = vadd.f32 %v4856_v63, %v8836_v7  ;;  %v3868_v51 = vpop.f32.mrb[119].mxu1  ;;  %v8838_v15 = vld [vmem:[#allocation216_spill] sm:$0xff]  ;;  %v8844_v8 = vld [vmem:[#allocation222_spill] sm:$0xff] }
0x1192   :  { %v3916_v6 = vadd.f32 %v3866_v21, %v6456_v17  ;;  %v3869_v38 = vadd.f32 %v3868_v51, %v8837_v33 }
0x1193   :  { %v4379_v1 = vmul.f32 -1.442695, %v3918_v39  ;;  %v3919_v56 = vadd.f32 %v3877_v42, %v6610_v36  ;;  %v8845_v39 = vld [vmem:[#allocation223_spill] sm:$0xff] }
0x1194   :  { %v4377_v46 = vmul.f32 -1.442695, %v3916_v6  ;;  %v3917_v62 = vadd.f32 %v3869_v38, %v6454_v40 }
0x1195   :  { %5845 = vpow2.f32 %v4379_v1  ;;  %v4380_v49 = vmul.f32 -1.442695, %v3919_v56 }
0x1196   :  { %5847 = vpow2.f32 %v4377_v46  ;;  %v4378_v19 = vmul.f32 -1.442695, %v3917_v62  ;;  %v4859_v54 = vpop.f32.mrb[120].mxu1 }
0x1197   :  { %v5838_v9 = vpop.eup %5837  ;;  %5849 = vpow2.f32 %v4380_v49  ;;  %v3890_v44 = vadd.f32 %v4859_v54, %v8838_v15  ;;  %v3881_v29 = vpop.f32.mrb[121].mxu1 }
0x1198   :  { %v5840_v34 = vpop.eup %5839  ;;  %v3966_v17 = vadd.f32 1.0, %v5838_v9  ;;  %5851 = vpow2.f32 %v4378_v19  ;;  %v3882_v53 = vadd.f32 %v3881_v29, %v8839_v58  ;;  %v4860_v0 = vpop.f32.mrb[122].mxu1 }
0x1199   :  { %v5842_v36 = vpop.eup %5841  ;;  %v3964_v14 = vadd.f32 1.0, %v5840_v34  ;;  %v3893_v40 = vadd.f32 %v4860_v0, %v8840_v35  ;;  %v3884_v55 = vpop.f32.mrb[123].mxu1  ;;  %v3922_v32 = vadd.f32 %v3890_v44, %v7240_v20 }
0x119a   :  { %v5844_v48 = vpop.eup %5843  ;;  %5853 = vrcp.f32 %v3966_v17  ;;  %v3967_v43 = vadd.f32 1.0, %v5842_v36  ;;  %v3885_v27 = vadd.f32 %v3884_v55, %v8841_v28  ;;  %v3920_v11 = vadd.f32 %v3882_v53, %v7212_v50 }
0x119b   :  { %5855 = vrcp.f32 %v3964_v14  ;;  %v3965_v23 = vadd.f32 1.0, %v5844_v48  ;;  %v3923_v60 = vadd.f32 %v3893_v40, %v7243_v3 }
0x119c   :  { %5857 = vrcp.f32 %v3967_v43  ;;  %v3921_v61 = vadd.f32 %v3885_v27, %v7218_v13 }
0x119d   :  { %5859 = vrcp.f32 %v3965_v23 }
0x119e   :  { %5861 = vtanh.f32 %v3922_v32  ;;  %v4863_v5 = vpop.f32.mrb[124].mxu1 }
0x119f   :  { %v5846_v37 = vpop.eup %5845  ;;  %5863 = vtanh.f32 %v3920_v11  ;;  %v3906_v57 = vadd.f32 %v4863_v5, %v8842_v26  ;;  %v3897_v30 = vpop.f32.mrb[125].mxu1 }
0x11a0   :  { %v5848_v20 = vpop.eup %5847  ;;  %v3970_v41 = vadd.f32 1.0, %v5846_v37  ;;  %5865 = vtanh.f32 %v3923_v60  ;;  %v3898_v2 = vadd.f32 %v3897_v30, %v8843_v59  ;;  %v4864_v45 = vpop.f32.mrb[126].mxu1 }
0x11a1   :  { %v5850_v50 = vpop.eup %5849  ;;  %v3968_v16 = vadd.f32 1.0, %v5848_v20  ;;  %5867 = vtanh.f32 %v3921_v61  ;;  %v3926_v3 = vadd.f32 %v3906_v57, %v7254_v12  ;;  %v3909_v13 = vadd.f32 %v4864_v45, %v8844_v8  ;;  %v3900_v22 = vpop.f32.mrb[127].mxu1 }
0x11a2   :  { %v5852_v24 = vpop.eup %5851  ;;  %5869 = vrcp.f32 %v3970_v41  ;;  %v3971_v21 = vadd.f32 1.0, %v5850_v50  ;;  %v3924_v63 = vadd.f32 %v3898_v2, %v7226_v52  ;;  %v3901_v7 = vadd.f32 %v3900_v22, %v8845_v39 }
0x11a3   :  { %5871 = vrcp.f32 %v3968_v16  ;;  %v3969_v42 = vadd.f32 1.0, %v5852_v24  ;;  %v4383_v51 = vmul.f32 -1.442695, %v3926_v3  ;;  %v3927_v6 = vadd.f32 %v3909_v13, %v7259_v18 }
0x11a4   :  { %v5854_v33 = vpop.eup %5853  ;;  %5873 = vrcp.f32 %v3971_v21  ;;  %v4381_v38 = vmul.f32 -1.442695, %v3924_v63  ;;  %v3925_v12 = vadd.f32 %v3901_v7, %v7230_v4 }
0x11a5   :  { %v5856_v1 = vpop.eup %5855  ;;  %5875 = vrcp.f32 %v3969_v42  ;;  %v4384_v56 = vmul.f32 -1.442695, %v3927_v6 }
0x11a6   :  { %v5858_v46 = vpop.eup %5857  ;;  %5877 = vpow2.f32 %v4383_v51  ;;  %v4382_v62 = vmul.f32 -1.442695, %v3925_v12 }
0x11a7   :  { %v5860_v49 = vpop.eup %5859  ;;  %5879 = vpow2.f32 %v4381_v38 }
0x11a8   :  { %v5862_v52 = vpop.eup %5861  ;;  %5881 = vpow2.f32 %v4384_v56 }
0x11a9   :  { %v5864_v19 = vpop.eup %5863  ;;  %v4010_v54 = vmul.f32 %v5862_v52, %v5854_v33  ;;  %5883 = vpow2.f32 %v4382_v62 }
0x11aa   :  { %v5866_v9 = vpop.eup %5865  ;;  %v4008_v18 = vmul.f32 %v5864_v19, %v5856_v1 }
0x11ab   :  { %v5868_v15 = vpop.eup %5867  ;;  %v4011_v44 = vmul.f32 %v5866_v9, %v5858_v46 }
0x11ac   :  { %v5870_v29 = vpop.eup %5869  ;;  %v4009_v34 = vmul.f32 %v5868_v15, %v5860_v49 }
0x11ad   :  { %v5872_v4 = vpop.eup %5871  ;;  %v4006_v17 = vmul.f32 %v5870_v29, %v8314_v47 }
0x11ae   :  { %v5874_v58 = vpop.eup %5873  ;;  %v4004_v53 = vmul.f32 %v5872_v4, %v8317_v31 }
0x11af   :  { %v5876_v0 = vpop.eup %5875  ;;  %v4007_v36 = vmul.f32 %v5874_v58, %v8319_v25  ;;  %v4014_v14 = vadd.f32 %v4010_v54, %v4006_v17 }
0x11b0   :  { %v5878_v35 = vpop.eup %5877  ;;  %v4005_v40 = vmul.f32 %v5876_v0, %v8322_v10  ;;  %v4012_v55 = vadd.f32 %v4008_v18, %v4004_v53 }
0x11b1   :  { %v5880_v48 = vpop.eup %5879  ;;  %5885 = vtanh.f32 %v4014_v14  ;;  %4031 = vst.msk [vmem:[#allocation3 + $0x10] sm:$0xff] %vm22_vm0, %v4014_v14  ;;  %v4015_v43 = vadd.f32 %v4011_v44, %v4007_v36  ;;  %v3974_v32 = vadd.f32 1.0, %v5878_v35 }
0x11b2   :  { %v5882_v28 = vpop.eup %5881  ;;  %5887 = vtanh.f32 %v4012_v55  ;;  %4029 = vst.msk [vmem:[#allocation3] sm:$0xff] %vm22_vm0, %v4012_v55  ;;  %v4013_v47 = vadd.f32 %v4009_v34, %v4005_v40  ;;  %v3972_v31 = vadd.f32 1.0, %v5880_v48 }
0x11b3   :  { %v5884_v27 = vpop.eup %5883  ;;  %5889 = vtanh.f32 %v4015_v43  ;;  %4032 = vst.msk [vmem:[#allocation3 + $0x18] sm:$0xff] %vm22_vm0, %v4015_v43  ;;  %v3975_v25 = vadd.f32 1.0, %v5882_v28 }
0x11b4   :  { %5891 = vtanh.f32 %v4013_v47  ;;  %4030 = vst.msk [vmem:[#allocation3 + $0x8] sm:$0xff] %vm22_vm0, %v4013_v47  ;;  %v3973_v10 = vadd.f32 1.0, %v5884_v27 }
0x11b5   :  { %5893 = vrcp.f32 %v3974_v32 }
0x11b6   :  { %5895 = vrcp.f32 %v3972_v31 }
0x11b7   :  { %5897 = vrcp.f32 %v3975_v25 }
0x11b8   :  { %5899 = vrcp.f32 %v3973_v10 }
0x11bb   :  { %v5886_v23 = vpop.eup %5885 }
0x11bc   :  { %v5888_v11 = vpop.eup %5887 }
0x11bd   :  { %v5890_v60 = vpop.eup %5889 }
0x11be   :  { %v5892_v61 = vpop.eup %5891 }
0x11bf   :  { %v5894_v5 = vpop.eup %5893 }
0x11c0   :  { %v5896_v37 = vpop.eup %5895  ;;  %v4022_v26 = vmul.f32 %v5894_v5, %v5886_v23 }
0x11c1   :  { %v5898_v57 = vpop.eup %5897  ;;  %v4020_v30 = vmul.f32 %v5896_v37, %v5888_v11 }
0x11c2   :  { %v5900_v20 = vpop.eup %5899  ;;  %4027 = vst.msk [vmem:[#allocation2 + $0x10] sm:$0xff] %vm22_vm0, %v4022_v26  ;;  %4035 = vst.msk [vmem:[%s8405_s4 + $0x10] sm:$0xff] %vm22_vm0, %v4022_v26  ;;  %v4023_v41 = vmul.f32 %v5898_v57, %v5890_v60 }
0x11c3   :  { %4025 = vst.msk [vmem:[#allocation2] sm:$0xff] %vm22_vm0, %v4020_v30  ;;  %4033 = vst.msk [vmem:[%s8405_s4] sm:$0xff] %vm22_vm0, %v4020_v30  ;;  %v4021_v59 = vmul.f32 %v5900_v20, %v5892_v61 }
0x11c4   :  { %4028 = vst.msk [vmem:[#allocation2 + $0x18] sm:$0xff] %vm22_vm0, %v4023_v41  ;;  %4036 = vst.msk [vmem:[%s8405_s4 + $0x18] sm:$0xff] %vm22_vm0, %v4023_v41 }
0x11c5   :  { %4026 = vst.msk [vmem:[#allocation2 + $0x8] sm:$0xff] %vm22_vm0, %v4021_v59  ;;  %4034 = vst.msk [vmem:[%s8405_s4 + $0x8] sm:$0xff] %vm22_vm0, %v4021_v59 }

</bundles_post_ra>
